<compile_context>
chip_gen: v7x
topology: tpu7x:2x2x1
jax: 0.10.0
libtpu: 0.0.40
codegen_flags: <defaults>
</compile_context>

<pallas_src>
import jax
import jax.numpy as jnp
from jax.experimental import pallas as pl
from jax.experimental.pallas import tpu as pltpu


def _conv1x1_kernel(w_ref, x_ref, o_ref):
    # w_ref: (Cout_blk, Cin) f32, x_ref: (Cin, HW) f32, o_ref: (Cout_blk, HW) f32
    # bf16 operands -> single-pass MXU matmul; f32 accumulation; f32 store.
    w = w_ref[...].astype(jnp.bfloat16)
    x = x_ref[...].astype(jnp.bfloat16)
    o_ref[...] = jnp.dot(
        w, x, preferred_element_type=jnp.float32
    ).astype(o_ref.dtype)


def _pick_cout_blocks(cout):
    """4 Cout blocks on dual-TC v7x (>=2 pipeline steps per core), 2 elsewhere."""
    try:
        kind = jax.devices()[0].device_kind.lower()
    except Exception:
        kind = ""
    preferred = 4 if ("v7" in kind or "7x" in kind) else 2
    for nb in (preferred, 2, 1):
        if cout % nb == 0 and (cout // nb) % 8 == 0:
            return nb
    return 1


def conv1x1(x_nchw, weight_oi):
    """1x1 conv, no bias, NCHW in / NCHW out.

    x_nchw:    (N, Cin, H, W) float32
    weight_oi: (Cout, Cin)    float32 (PyTorch Conv2d weight, 1x1 spatial squeezed)
    returns    (N, Cout, H, W) float32
    """
    N, Cin, H, W = x_nchw.shape
    Cout = weight_oi.shape[0]
    HW = H * W

    # Free, contiguous reshape (no transpose): (N, Cin, H, W) -> (N, Cin, H*W).
    x3 = x_nchw.reshape(N, Cin, HW)

    n_cout_blocks = _pick_cout_blocks(Cout)
    cout_blk = Cout // n_cout_blocks

    flops = 2 * N * HW * Cin * Cout
    bytes_accessed = 4 * (N * Cin * HW + Cout * Cin + N * Cout * HW)

    out3 = pl.pallas_call(
        _conv1x1_kernel,
        out_shape=jax.ShapeDtypeStruct((N, Cout, HW), x_nchw.dtype),
        grid_spec=pltpu.PrefetchScalarGridSpec(
            num_scalar_prefetch=0,
            # Cout-block axis OUTER, batch INNER: the weight half stays VMEM-resident
            # across the whole batch instead of being re-DMA'd every grid step.
            grid=(n_cout_blocks, N),
            in_specs=[
                # Weight block: depends only on the Cout-block index.
                pl.BlockSpec((cout_blk, Cin), lambda j, n: (j, 0)),
                # Activations: one full (Cin, HW) slab per batch element
                # (constant across the Cout axis -> fetched once per batch element).
                pl.BlockSpec((None, Cin, HW), lambda j, n: (n, 0, 0)),
            ],
            out_specs=pl.BlockSpec((None, cout_blk, HW), lambda j, n: (n, j, 0)),
        ),
        compiler_params=pltpu.CompilerParams(
            dimension_semantics=("parallel", "parallel"),
        ),
        cost_estimate=pl.CostEstimate(
            flops=flops, transcendentals=0, bytes_accessed=bytes_accessed
        ),
    )(weight_oi, x3)

    # Free reshape back to NCHW: (N, Cout, H*W) -> (N, Cout, H, W).
    return out3.reshape(N, Cout, H, W)


if __name__ == "__main__":
    key = jax.random.PRNGKey(0)
    k_x, k_w = jax.random.split(key)

    N, C, H, W = 1, 672, 28, 28  # shapes implied by the module's forward
    x = jax.random.normal(k_x, (N, C, H, W), dtype=jnp.float32)

    # Deterministic weight (shape matches Conv2d(672, 672, 1, bias=False) weight
    # (Cout, Cin, 1, 1) with the trailing 1x1 spatial dims squeezed out).
    fan_in = C  # Cin * 1 * 1
    bound = 1.0 / (fan_in ** 0.5)
    weight = jax.random.uniform(
        k_w, (C, C), dtype=jnp.float32, minval=-bound, maxval=bound
    )

    out = conv1x1(x, weight)
    jax.block_until_ready(out)

    # Reference with the same bf16 operand rounding + f32 accumulation as the kernel.
    ref = jnp.einsum(
        "nchw,oc->nohw",
        x.astype(jnp.bfloat16),
        weight.astype(jnp.bfloat16),
        preferred_element_type=jnp.float32,
    )
    assert out.shape == (N, C, H, W)
    assert jnp.allclose(out, ref, atol=1e-2, rtol=1e-2)

    print("KERNEL_OK")
</pallas_src>

<mosaic_0001>
module attributes {stable_mosaic.version = 11 : i64} {
  func.func @_conv1x1_kernel(%arg0: i32, %arg1: i32, %arg2: memref<336x672xf32, #tpu.memory_space<vmem>>, %arg3: memref<1x672x784xf32, #tpu.memory_space<vmem>>, %arg4: memref<1x336x784xf32, #tpu.memory_space<vmem>>) attributes {dimension_semantics = [#tpu.dimension_semantics<parallel>, #tpu.dimension_semantics<parallel>], iteration_bounds = array<i64: 2, 1>, scalar_prefetch = 0 : i64, scratch_operands = 0 : i64, tpu.core_type = #tpu.core_type<tc>, window_params = [{transform_indices = @transform_0, window_bounds = array<i64: 336, 672>}, {transform_indices = @transform_1, window_bounds = array<i64: 1, 672, 784>}, {transform_indices = @transform_2, window_bounds = array<i64: 1, 336, 784>}]} {
    %c0 = arith.constant 0 : index
    %c0_0 = arith.constant 0 : index
    %0 = vector.load %arg2[%c0, %c0_0] : memref<336x672xf32, #tpu.memory_space<vmem>>, vector<336x672xf32>
    %1 = arith.truncf %0 : vector<336x672xf32> to vector<336x672xbf16>
    %c0_1 = arith.constant 0 : index
    %c0_2 = arith.constant 0 : index
    %c0_3 = arith.constant 0 : index
    %2 = vector.load %arg3[%c0_1, %c0_2, %c0_3] : memref<1x672x784xf32, #tpu.memory_space<vmem>>, vector<1x672x784xf32>
    %3 = vector.shape_cast %2 : vector<1x672x784xf32> to vector<672x784xf32>
    %4 = arith.truncf %3 : vector<672x784xf32> to vector<672x784xbf16>
    %cst = arith.constant dense<0.000000e+00> : vector<336x784xf32>
    %5 = tpu.matmul %1, %4, %cst {dimension_numbers = #tpu.dot_dimension_numbers<[1], [0], [0], [1], [0, 0, 1, 1], [], []>} : vector<336x672xbf16>, vector<672x784xbf16>, vector<336x784xf32> -> vector<336x784xf32>
    %c0_4 = arith.constant 0 : index
    %c0_5 = arith.constant 0 : index
    %c0_6 = arith.constant 0 : index
    %6 = vector.load %arg4[%c0_4, %c0_5, %c0_6] : memref<1x336x784xf32, #tpu.memory_space<vmem>>, vector<1x336x784xf32>
    %7 = vector.shape_cast %6 : vector<1x336x784xf32> to vector<336x784xf32>
    %8 = vector.shape_cast %5 : vector<336x784xf32> to vector<1x336x784xf32>
    tpu.vector_store %arg4[%c0_4, %c0_5, %c0_6], %8 {strides = array<i32>} : memref<1x336x784xf32, #tpu.memory_space<vmem>>, vector<1x336x784xf32>,
    return
  }
  func.func @transform_0(%arg0: i32, %arg1: i32) -> (i32, i32) {
    %c0_i32 = arith.constant 0 : i32
    %c0_i32_0 = arith.constant 0 : i32
    return %arg0, %c0_i32 : i32, i32
  }
  func.func @transform_1(%arg0: i32, %arg1: i32) -> (i32, i32, i32) {
    %c0_i32 = arith.constant 0 : i32
    %c0_i32_0 = arith.constant 0 : i32
    %c0_i32_1 = arith.constant 0 : i32
    return %arg1, %c0_i32, %c0_i32_0 : i32, i32, i32
  }
  func.func @transform_2(%arg0: i32, %arg1: i32) -> (i32, i32, i32) {
    %c0_i32 = arith.constant 0 : i32
    %c0_i32_0 = arith.constant 0 : i32
    return %arg1, %arg0, %c0_i32 : i32, i32, i32
  }
}

</mosaic_0001>

<bundles_post_ra>
// kernel: tpu_custom_call.1
= control target key start
LH: loop header
LB: loop body
LE: loop exit
PB: predicated region body
PF: predicated region fallthrough
CT: control target
= control target key end

     0   :  { %7 = vsyncpa [#allocation3], 0  ;;  %s7439_s0 = inlined_call_operand.hbm [shape: f32[672,672], index: 0, kind: input, shape index: {}]   ;;  %s7440_s1 = inlined_call_operand.hbm [shape: f32[1,672,784], index: 1, kind: input, shape index: {}]   ;;  %s7441_s2 = inlined_call_operand.hbm [shape: f32[1,672,784], index: 2, kind: output, shape index: {}]  }
   0x1   :  { %9 = vsyncpa [#allocation3 + $0x1], 0 }
   0x2   :  { %10 = vsyncpa [#allocation6], 0 }
   0x3   :  { %11 = vsyncpa [#allocation4], 0 }
   0x4   :  { %13 = vsyncpa [#allocation4 + $0x1], 0  ;;  %s5750_s9 = smov 0   ;;  %s5752_s10 = smov 0  }
   0x5   :  { %s5754_s11 = smov 0   ;;  %s5756_s12 = smov 0  }
   0x6   :  { %s5758_s13 = smov 0   ;;  %s5760_s14 = smov 0  }
   0x7 LB: > { %s4725_s15 = sadd.s32 4294967295, %s5723_s14   ;;  %s4726_s16 = sadd.s32 4294967294, %s5723_s14   ;;  %s5723_s14 = sphi %s5760_s14, %s19_s14   ;;  %s5719_s13 = sphi %s5758_s13, %s7787_s13   ;;  %s5715_s12 = sphi %s5756_s12, %s7786_s12   ;;  %s5711_s11 = sphi %s5754_s11, %s7785_s11   ;;  %s5707_s10 = sphi %s5752_s10, %s7784_s10   ;;  %s5703_s9 = sphi %s5750_s9, %s7783_s9  }
   0x8   : > { %p51_p0 = scmp.ne.s32.totalorder %s5707_s10, %s5703_s9  ;;  %p5784_p1 = scmp.eq.s32.totalorder %s4725_s15, 0 }
   0x9   : > { %p5788_p2 = scmp.eq.s32.totalorder %s4725_s15, 1  ;;  %p109_p3 = scmp.eq.s32.totalorder %s4726_s16, 1 }
   0xa   : > { %s7608_s17 = scalar_select %p5784_p1, 1, 0 }
   0xb   : > { %s7609_s18 = scalar_select %p5788_p2, 1, 0 }
   0xc   : > { %p5794_p4 = por %p5784_p1, %p51_p0  ;;  %p4727_p5 = scmp.ge.s32.totalorder %s5723_s14, 1 }
   0xd   : > { %p5799_p6 = por %p109_p3, %p51_p0  ;;  %p116_p7 = scmp.lt.s32.totalorder %s5723_s14, 3 }
   0xe   : > { %s7610_s19 = scalar_select %p5794_p4, 1, 0 }
   0xf   : > { %s7611_s20 = scalar_select %p5799_p6, 1, 0 }
  0x10   : > { %p5804_p8 = pnand %p4727_p5, %p116_p7  ;;  %s5725_s22 = smov [#allocation5]  }
  0x11   : > { %s131_s23 = sshll.u32 %s5725_s22, 4  ;;  %s31_s25 = sadd.s32 1, %s5719_s13  ;;  %s132_s23 = int_to_ptr.vmem [resolvable:$true] %s131_s23 }
  0x12   : > { %s7612_s21 = scalar_select %p5804_p8, 1, 0 }
  0x13   : > { %p5505_p9 = pneg %p5804_p8  ;;  %s5579_s28 = scalar_lea.hbm %s7440_s1, 75264 }
  0x14   : > { %p5580_p12 = scmp.ne.s32.totalorder %s7440_s1, %s5579_s28  ;;  %p5586_p5 = scmp.lt.u32.totalorder %s5579_s28, %s7440_s1 }
  0x15   : > { %p5813_p11 = pnand %p5505_p9, %p5784_p1 }
  0x17   : > { %p5581_p13 = pneg %p5813_p11 }
  0x19   : > { %p5582_p0 = pnand %p5581_p13, %p5580_p12 }
  0x1b   : > { %p5583_p3 = pneg %p5582_p0 }
  0x1d   : > { %p5588_p7 = pnand %p5586_p5, %p5583_p3 }
  0x1f   : > { %5591 = shalt.err (!%p5588_p7)
}
  0x20   : > { %s5592_s5 = scalar_lea.vmem %s132_s23, 75264  ;;  %p5600_p1 = scmp.lt.s32.totalorder %s132_s23, %s132_s23 }
  0x21   : > { %p5593_p9 = scmp.ne.s32.totalorder %s132_s23, %s5592_s5  ;;  %p5601_p4 = scmp.lt.s32.totalorder %s5592_s5, %s5592_s5 }
  0x23   : > { %p5595_p10 = pnand %p5593_p9, %p5581_p13  ;;  %p5602_p8 = por %p5601_p4, %p5600_p1 }
  0x25   : > { %p5596_p6 = pneg %p5595_p10 }
  0x27   : > { %p5603_p2 = pnand %p5602_p8, %p5596_p6 }
  0x29   : > { %5606 = shalt.err (!%p5603_p2)
}
  0x2a   : > { %s5726_s6 = smov 896   ;;  %s5727_s7 = smov 56  }
  0x2b   : > { %5508 = dma.hbm_to_vmem [thread:$0]  (!%p5813_p11), %s7440_s1, 75264, %s132_s23, [#allocation6], %s5726_s6, %s5726_s6, %s5727_s7  }
  0x2c   : > { %p33_p1 = scmp.ge.s32.totalorder %s31_s25, 2  ;;  %s38_s16 = sadd.s32 1, %s5711_s11 }
  0x2d   : > { %p45_p2 = scmp.ne.s32.totalorder %s5711_s11, %s5707_s10  ;;  %p46_p4 = scmp.eq.s32.totalorder %s5723_s14, 0 }
  0x2e   : > { %s7789_s25 = smov (%p33_p1, %s31_s25), 0  ;;  %p7614_p8 = scmp.ne.s32.totalorder %s7609_s18, 0 }
  0x2f   : > { %p47_p6 = por %p46_p4, %p45_p2  ;;  %s35_s26 = ssub.s32 %s5719_s13, %s7789_s25 }
  0x30   : > { %p5842_p10 = por %p7614_p8, %p45_p2  ;;  %p5518_p12 = scmp.lt.s32.totalorder %s5723_s14, 2 }
  0x31   : > { %p36_p13 = scmp.eq.s32.totalorder %s35_s26, 0  ;;  %s145_s24 = sand.u32 1, %s5711_s11  }
  0x32   : > { %s5492_s27 = smul.u32 2016, %s145_s24  ;;  %p5856_p11 = pnand %p5518_p12, %p47_p6 }
  0x33   : > { %s5851_s28 = scalar_select %p36_p13, %s5711_s11, %s38_s16  }
  0x34   : > { %s5519_s23 = smul.u32 32256, %s5719_s13  ;;  %s149_s29 = scalar_lea.vmem [#allocation2], %s5492_s27 }
  0x35   : > { %s157_s30 = sshll.u32 %s149_s29, 4  ;;  %s5865_s6 = scalar_lea.sflag [#allocation3], %s145_s24  ;;  %s5854_s30 = int_to_ptr.vmem [resolvable:$true] %s157_s30 }
  0x36   : > { %s5863_s5 = scalar_lea.hbm %s7439_s0, %s5519_s23  ;;  %p5609_p3 = pneg %p5856_p11 }
  0x37   : > { %s5607_s7 = scalar_lea.hbm %s5863_s5, 32256  ;;  %s5612_s16 = scalar_lea.hbm %s7439_s0, 64512 }
  0x38   : > { %p5608_p0 = scmp.ne.s32.totalorder %s5863_s5, %s5607_s7  ;;  %p5613_p9 = scmp.lt.u32.totalorder %s5863_s5, %s7439_s0 }
  0x39   : > { %p5614_p1 = scmp.lt.u32.totalorder %s5612_s16, %s5607_s7  ;;  %p5616_p4 = scmp.lt.u32.totalorder %s5607_s7, %s5863_s5 }
  0x3a   : > { %p5610_p5 = pnand %p5609_p3, %p5608_p0 }
  0x3b   : > { %p5615_p2 = por %p5614_p1, %p5613_p9 }
  0x3c   : > { %p5611_p7 = pneg %p5610_p5 }
  0x3d   : > { %p5617_p6 = por %p5616_p4, %p5615_p2 }
  0x3f   : > { %p5618_p8 = pnand %p5617_p6, %p5611_p7 }
  0x41   : > { %5621 = shalt.err (!%p5618_p8)
}
  0x42   : > { %s5622_s24 = scalar_lea.vmem %s5854_s30, 32256  ;;  %s5728_s23 = smov [#allocation2]  }
  0x43   : > { %p5623_p12 = scmp.ne.s32.totalorder %s5854_s30, %s5622_s24  ;;  %s5627_s29 = sshll.u32 %s5728_s23, 4  ;;  %s5628_s29 = int_to_ptr.vmem [resolvable:$false] %s5627_s29 }
  0x44   : > { %s5629_s18 = scalar_lea.vmem %s5628_s29, 64512  ;;  %p5630_p5 = scmp.lt.s32.totalorder %s5854_s30, %s5628_s29 }
  0x45   : > { %p5625_p13 = pnand %p5623_p12, %p5609_p3  ;;  %p5631_p9 = scmp.lt.s32.totalorder %s5629_s18, %s5622_s24 }
  0x47   : > { %p5626_p0 = pneg %p5625_p13  ;;  %p5632_p1 = por %p5631_p9, %p5630_p5 }
  0x49   : > { %p5633_p2 = pnand %p5632_p1, %p5626_p0 }
  0x4b   : > { %5636 = shalt.err (!%p5633_p2)
}
  0x4c   : > { %s5729_s4 = smov 768   ;;  %s5730_s7 = smov 48  }
  0x4d   : > { %5512 = dma.hbm_to_vmem [thread:$0]  (!%p5856_p11), %s5863_s5, 32256, %s5854_s30, %s5865_s6, %s5729_s4, %s5729_s4, %s5730_s7  }
  0x4e   : > { %p7617_p3 = scmp.ne.s32.totalorder %s7612_s21, 0 }
  0x50   : > { %169 = sbr.rel (%p7617_p3) target bundleno = 1393 (0x571), region = 28 }
  0x57   : > { %s5896_s8 = sand.u32 1, %s5707_s10   ;;  %p7618_p7 = scmp.ne.s32.totalorder %s7610_s19, 0 }
  0x58   : > { %s5494_s15 = smul.u32 2016, %s5896_s8  ;;  %s172_s16 = scalar_lea.sflag [#allocation3], %s5896_s8 }
  0x5a   : > { %s5900_s26 = scalar_lea.vmem [#allocation2], %s5494_s15 }
  0x5b   : > { %5690 = dma.done.wait (%p7618_p7), %s172_s16, 32256  }
  0x5c   : > { %5692 = vsyncadd (%p7618_p7), %s172_s16, 4294935040  ;;  %p7619_p11 = scmp.ne.s32.totalorder %s7608_s17, 0 }
  0x5e   : > { %5694 = dma.done.wait (%p7619_p11), [#allocation6], 75264  }
  0x5f   : > { %5696 = vsyncadd (%p7619_p11), [#allocation6], 4294892032  ;;  %v582_v0 = vld [vmem:[#allocation5 + $0x8] sm:$0xff]  ;;  %v589_v1 = vld [vmem:[#allocation5 + $0x40] sm:$0xff]  ;;  %vm1463_vm0 = vcmask 261120   ;;  %s5495_s17 = smul.u32 2352, %s5896_s8 }
  0x60   : > { %v584_v2 = vld [vmem:[#allocation5 + $0x18] sm:$0xff]  ;;  %v1170_v3 = vpack.c.bf16 %v589_v1, %v582_v0  ;;  %v591_v4 = vld [vmem:[#allocation5 + $0x50] sm:$0xff]  ;;  %v581_v5 = vld [vmem:[#allocation5] sm:$0xff]  ;;  %vm4323_vm1 = vcmask 130048   ;;  %s5521_s21 = smul.u32 37632, %s5715_s12  ;;  %s4613_s12 = scalar_lea.sflag [#allocation4], %s5896_s8 }
  0x61   : > { %v588_v6 = vld [vmem:[#allocation5 + $0x38] sm:$0xff]  ;;  %v1172_v7 = vpack.c.bf16 %v591_v4, %v584_v2  ;;  %v583_v9 = vld [vmem:[#allocation5 + $0x10] sm:$0xff]  ;;  %v590_v10 = vld [vmem:[#allocation5 + $0x48] sm:$0xff]  ;;  %s6762_s19 = scalar_lea.vmem [#allocation7], %s5495_s17  ;;  %s5732_s24 = smov [#allocation7]  }
  0x62   : > { %v1169_v8 = vpack.c.bf16 %v588_v6, %v581_v5  ;;  %v596_v11 = vld [vmem:[#allocation5 + $0x78] sm:$0xff]  ;;  %1527 = vmatprep.subr.bf16.mxu0 %v1170_v3  ;;  %v1171_v12 = vpack.c.bf16 %v590_v10, %v583_v9  ;;  %v603_v13 = vld [vmem:[#allocation5 + $0xb0] sm:$0xff]  ;;  %v598_v14 = vld [vmem:[#allocation5 + $0x88] sm:$0xff]  ;;  %s4629_s30 = sshll.u32 %s6762_s19, 4  ;;  %s7381_s6 = scalar_lea.hbm %s7441_s2, %s5521_s21  ;;  %s7383_s30 = int_to_ptr.vmem [resolvable:$true] %s4629_s30 }
  0x63   : > { %v605_v15 = vld [vmem:[#allocation5 + $0xc0] sm:$0xff]  ;;  %2256 = vmatprep.subr.bf16.mxu1 %v1172_v7  ;;  %v1177_v16 = vpack.c.bf16 %v603_v13, %v596_v11  ;;  %v595_v18 = vld [vmem:[#allocation5 + $0x70] sm:$0xff]  ;;  %v602_v19 = vld [vmem:[#allocation5 + $0xa8] sm:$0xff]  ;;  %s5637_s27 = scalar_lea.vmem %s7383_s30, 37632  ;;  %s5641_s23 = sshll.u32 %s5732_s24, 4  ;;  %s5642_s23 = int_to_ptr.vmem [resolvable:$false] %s5641_s23 }
  0x64   : > { %1528 = vmatpush1.bf16.msra.mxu0 %v1169_v8  ;;  %v1179_v17 = vpack.c.bf16 %v605_v15, %v598_v14  ;;  %v597_v20 = vld [vmem:[#allocation5 + $0x80] sm:$0xff]  ;;  %2257 = vmatpush1.bf16.msra.mxu1 %v1171_v12  ;;  %v1176_v21 = vpack.c.bf16 %v602_v19, %v595_v18  ;;  %v604_v22 = vld [vmem:[#allocation5 + $0xb8] sm:$0xff]  ;;  %v610_v23 = vld [vmem:[#allocation5 + $0xe8] sm:$0xff]  ;;  %p5638_p4 = scmp.ne.s32.totalorder %s7383_s30, %s5637_s27  ;;  %s5643_s29 = scalar_lea.vmem %s5642_s23, 75264 }
  0x65   : > { %v617_v24 = vld [vmem:[#allocation5 + $0x120] sm:$0xff]  ;;  %1529 = vmatprep.subr.bf16.mxu0 %v1177_v16  ;;  %v1178_v25 = vpack.c.bf16 %v604_v22, %v597_v20  ;;  %v612_v27 = vld [vmem:[#allocation5 + $0xf8] sm:$0xff]  ;;  %v619_v28 = vld [vmem:[#allocation5 + $0x130] sm:$0xff]  ;;  %p5644_p12 = scmp.lt.s32.totalorder %s7383_s30, %s5642_s23  ;;  %p5645_p13 = scmp.lt.s32.totalorder %s5643_s29, %s5637_s27 }
  0x66   : > { %2258 = vmatprep.subr.bf16.mxu1 %v1179_v17  ;;  %v1184_v26 = vpack.c.bf16 %v617_v24, %v610_v23  ;;  %v609_v29 = vld [vmem:[#allocation5 + $0xe0] sm:$0xff]  ;;  %v1186_v30 = vpack.c.bf16 %v619_v28, %v612_v27  ;;  %v616_v31 = vld [vmem:[#allocation5 + $0x118] sm:$0xff]  ;;  %v611_v32 = vld [vmem:[#allocation5 + $0xf0] sm:$0xff]  ;;  %p5639_p6 = pnand %p5638_p4, %p5842_p10 }
  0x67   : > { %v618_v33 = vld [vmem:[#allocation5 + $0x128] sm:$0xff]  ;;  %v1183_v34 = vpack.c.bf16 %v616_v31, %v609_v29  ;;  %v624_v35 = vld [vmem:[#allocation5 + $0x158] sm:$0xff]  ;;  %v631_v36 = vld [vmem:[#allocation5 + $0x190] sm:$0xff]  ;;  %p5646_p0 = por %p5645_p13, %p5644_p12 }
  0x68   : > { %1530 = vmatpush1.bf16.msra.mxu0 %v1176_v21  ;;  %v626_v37 = vld [vmem:[#allocation5 + $0x168] sm:$0xff]  ;;  %2259 = vmatpush1.bf16.msra.mxu1 %v1178_v25  ;;  %v1185_v38 = vpack.c.bf16 %v618_v33, %v611_v32  ;;  %v1191_v39 = vpack.c.bf16 %v631_v36, %v624_v35  ;;  %v633_v40 = vld [vmem:[#allocation5 + $0x1a0] sm:$0xff]  ;;  %v623_v41 = vld [vmem:[#allocation5 + $0x150] sm:$0xff]  ;;  %p5640_p8 = pneg %p5639_p6 }
  0x69   : > { %1531 = vmatprep.subr.bf16.mxu0 %v1184_v26  ;;  %v630_v42 = vld [vmem:[#allocation5 + $0x188] sm:$0xff]  ;;  %2260 = vmatprep.subr.bf16.mxu1 %v1186_v30  ;;  %v1193_v43 = vpack.c.bf16 %v633_v40, %v626_v37  ;;  %v625_v44 = vld [vmem:[#allocation5 + $0x160] sm:$0xff]  ;;  %v632_v45 = vld [vmem:[#allocation5 + $0x198] sm:$0xff] }
  0x6a   : > { %v638_v46 = vld [vmem:[#allocation5 + $0x1c8] sm:$0xff]  ;;  %v645_v47 = vld [vmem:[#allocation5 + $0x200] sm:$0xff]  ;;  %v640_v48 = vld [vmem:[#allocation5 + $0x1d8] sm:$0xff]  ;;  %v1190_v50 = vpack.c.bf16 %v630_v42, %v623_v41  ;;  %v1192_v51 = vpack.c.bf16 %v632_v45, %v625_v44  ;;  %p5647_p5 = pnand %p5646_p0, %p5640_p8 }
  0x6b   : > { %v647_v49 = vld [vmem:[#allocation5 + $0x210] sm:$0xff]  ;;  %v1198_v52 = vpack.c.bf16 %v645_v47, %v638_v46  ;;  %v637_v53 = vld [vmem:[#allocation5 + $0x1c0] sm:$0xff]  ;;  %v644_v54 = vld [vmem:[#allocation5 + $0x1f8] sm:$0xff] }
  0x6c   : > { %1532 = vmatpush1.bf16.msra.mxu0 %v1183_v34  ;;  %2261 = vmatpush1.bf16.msra.mxu1 %v1185_v38  ;;  %v639_v55 = vld [vmem:[#allocation5 + $0x1d0] sm:$0xff]  ;;  %v1200_v56 = vpack.c.bf16 %v647_v49, %v640_v48  ;;  %v646_v57 = vld [vmem:[#allocation5 + $0x208] sm:$0xff]  ;;  %v652_v58 = vld [vmem:[#allocation5 + $0x238] sm:$0xff]  ;;  %v1197_v62 = vpack.c.bf16 %v644_v54, %v637_v53 }
  0x6d   : > { %1533 = vmatprep.subr.bf16.mxu0 %v1191_v39  ;;  %2262 = vmatprep.subr.bf16.mxu1 %v1193_v43  ;;  %v659_v59 = vld [vmem:[#allocation5 + $0x270] sm:$0xff]  ;;  %v654_v60 = vld [vmem:[#allocation5 + $0x248] sm:$0xff]  ;;  %v661_v61 = vld [vmem:[#allocation5 + $0x280] sm:$0xff]  ;;  %v1199_v63 = vpack.c.bf16 %v646_v57, %v639_v55 }
  0x6e   : > { %v1205_v0 = vpack.c.bf16 %v659_v59, %v652_v58  ;;  %v651_v1 = vld [vmem:[#allocation5 + $0x230] sm:$0xff]  ;;  %v658_v2 = vld [vmem:[#allocation5 + $0x268] sm:$0xff]  ;;  %v653_v3 = vld [vmem:[#allocation5 + $0x240] sm:$0xff]  ;;  %v1207_v4 = vpack.c.bf16 %v661_v61, %v654_v60 }
  0x6f   : > { %v660_v5 = vld [vmem:[#allocation5 + $0x278] sm:$0xff]  ;;  %v666_v6 = vld [vmem:[#allocation5 + $0x2a8] sm:$0xff]  ;;  %v673_v7 = vld [vmem:[#allocation5 + $0x2e0] sm:$0xff]  ;;  %v1204_v10 = vpack.c.bf16 %v658_v2, %v651_v1 }
  0x70   : > { %1534 = vmatpush1.bf16.msra.mxu0 %v1190_v50  ;;  %2263 = vmatpush1.bf16.msra.mxu1 %v1192_v51  ;;  %v668_v8 = vld [vmem:[#allocation5 + $0x2b8] sm:$0xff]  ;;  %v675_v9 = vld [vmem:[#allocation5 + $0x2f0] sm:$0xff]  ;;  %v1206_v11 = vpack.c.bf16 %v660_v5, %v653_v3  ;;  %v1212_v12 = vpack.c.bf16 %v673_v7, %v666_v6  ;;  %v665_v13 = vld [vmem:[#allocation5 + $0x2a0] sm:$0xff] }
  0x71   : > { %1535 = vmatprep.subr.bf16.mxu0 %v1198_v52  ;;  %2264 = vmatprep.subr.bf16.mxu1 %v1200_v56  ;;  %v672_v14 = vld [vmem:[#allocation5 + $0x2d8] sm:$0xff]  ;;  %v667_v15 = vld [vmem:[#allocation5 + $0x2b0] sm:$0xff]  ;;  %v1214_v16 = vpack.c.bf16 %v675_v9, %v668_v8  ;;  %v674_v17 = vld [vmem:[#allocation5 + $0x2e8] sm:$0xff] }
  0x72   : > { %v680_v18 = vld [vmem:[#allocation5 + $0x318] sm:$0xff]  ;;  %v687_v19 = vld [vmem:[#allocation5 + $0x350] sm:$0xff]  ;;  %v682_v20 = vld [vmem:[#allocation5 + $0x328] sm:$0xff]  ;;  %v1211_v22 = vpack.c.bf16 %v672_v14, %v665_v13  ;;  %v1213_v23 = vpack.c.bf16 %v674_v17, %v667_v15 }
  0x73   : > { %v689_v21 = vld [vmem:[#allocation5 + $0x360] sm:$0xff]  ;;  %v1219_v24 = vpack.c.bf16 %v687_v19, %v680_v18  ;;  %v679_v25 = vld [vmem:[#allocation5 + $0x310] sm:$0xff]  ;;  %v686_v26 = vld [vmem:[#allocation5 + $0x348] sm:$0xff] }
  0x74   : > { %1536 = vmatpush1.bf16.msra.mxu0 %v1197_v62  ;;  %2265 = vmatpush1.bf16.msra.mxu1 %v1199_v63  ;;  %v681_v27 = vld [vmem:[#allocation5 + $0x320] sm:$0xff]  ;;  %v1221_v28 = vpack.c.bf16 %v689_v21, %v682_v20  ;;  %v688_v29 = vld [vmem:[#allocation5 + $0x358] sm:$0xff]  ;;  %v694_v30 = vld [vmem:[#allocation5 + $0x388] sm:$0xff]  ;;  %v1218_v34 = vpack.c.bf16 %v686_v26, %v679_v25 }
  0x75   : > { %1537 = vmatprep.subr.bf16.mxu0 %v1205_v0  ;;  %2266 = vmatprep.subr.bf16.mxu1 %v1207_v4  ;;  %v701_v31 = vld [vmem:[#allocation5 + $0x3c0] sm:$0xff]  ;;  %v696_v32 = vld [vmem:[#allocation5 + $0x398] sm:$0xff]  ;;  %v703_v33 = vld [vmem:[#allocation5 + $0x3d0] sm:$0xff]  ;;  %v1220_v35 = vpack.c.bf16 %v688_v29, %v681_v27 }
  0x76   : > { %v1226_v36 = vpack.c.bf16 %v701_v31, %v694_v30  ;;  %v693_v37 = vld [vmem:[#allocation5 + $0x380] sm:$0xff]  ;;  %v700_v38 = vld [vmem:[#allocation5 + $0x3b8] sm:$0xff]  ;;  %v695_v39 = vld [vmem:[#allocation5 + $0x390] sm:$0xff]  ;;  %v1228_v40 = vpack.c.bf16 %v703_v33, %v696_v32 }
  0x77   : > { %v702_v41 = vld [vmem:[#allocation5 + $0x3c8] sm:$0xff]  ;;  %v708_v42 = vld [vmem:[#allocation5 + $0x3f8] sm:$0xff]  ;;  %v715_v43 = vld [vmem:[#allocation5 + $0x430] sm:$0xff]  ;;  %v1225_v46 = vpack.c.bf16 %v700_v38, %v693_v37 }
  0x78   : > { %1538 = vmatpush1.bf16.msra.mxu0 %v1204_v10  ;;  %2267 = vmatpush1.bf16.msra.mxu1 %v1206_v11  ;;  %v710_v44 = vld [vmem:[#allocation5 + $0x408] sm:$0xff]  ;;  %v717_v45 = vld [vmem:[#allocation5 + $0x440] sm:$0xff]  ;;  %v1227_v47 = vpack.c.bf16 %v702_v41, %v695_v39  ;;  %v1233_v48 = vpack.c.bf16 %v715_v43, %v708_v42  ;;  %v707_v49 = vld [vmem:[#allocation5 + $0x3f0] sm:$0xff] }
  0x79   : > { %1539 = vmatprep.subr.bf16.mxu0 %v1212_v12  ;;  %2268 = vmatprep.subr.bf16.mxu1 %v1214_v16  ;;  %v714_v50 = vld [vmem:[#allocation5 + $0x428] sm:$0xff]  ;;  %v709_v51 = vld [vmem:[#allocation5 + $0x400] sm:$0xff]  ;;  %v1235_v52 = vpack.c.bf16 %v717_v45, %v710_v44  ;;  %v716_v53 = vld [vmem:[#allocation5 + $0x438] sm:$0xff] }
  0x7a   : > { %v722_v54 = vld [vmem:[#allocation5 + $0x468] sm:$0xff]  ;;  %v729_v55 = vld [vmem:[#allocation5 + $0x4a0] sm:$0xff]  ;;  %v724_v56 = vld [vmem:[#allocation5 + $0x478] sm:$0xff]  ;;  %v1232_v58 = vpack.c.bf16 %v714_v50, %v707_v49  ;;  %v1234_v59 = vpack.c.bf16 %v716_v53, %v709_v51 }
  0x7b   : > { %v731_v57 = vld [vmem:[#allocation5 + $0x4b0] sm:$0xff]  ;;  %v1240_v60 = vpack.c.bf16 %v729_v55, %v722_v54  ;;  %v721_v61 = vld [vmem:[#allocation5 + $0x460] sm:$0xff]  ;;  %v728_v62 = vld [vmem:[#allocation5 + $0x498] sm:$0xff] }
  0x7c   : > { %1540 = vmatpush1.bf16.msra.mxu0 %v1211_v22  ;;  %2269 = vmatpush1.bf16.msra.mxu1 %v1213_v23  ;;  %v723_v63 = vld [vmem:[#allocation5 + $0x470] sm:$0xff]  ;;  %v1242_v0 = vpack.c.bf16 %v731_v57, %v724_v56  ;;  %v730_v1 = vld [vmem:[#allocation5 + $0x4a8] sm:$0xff]  ;;  %v736_v2 = vld [vmem:[#allocation5 + $0x4d8] sm:$0xff]  ;;  %v1239_v6 = vpack.c.bf16 %v728_v62, %v721_v61 }
  0x7d   : > { %1541 = vmatprep.subr.bf16.mxu0 %v1219_v24  ;;  %2270 = vmatprep.subr.bf16.mxu1 %v1221_v28  ;;  %v743_v3 = vld [vmem:[#allocation5 + $0x510] sm:$0xff]  ;;  %v738_v4 = vld [vmem:[#allocation5 + $0x4e8] sm:$0xff]  ;;  %v745_v5 = vld [vmem:[#allocation5 + $0x520] sm:$0xff]  ;;  %v1241_v8 = vpack.c.bf16 %v730_v1, %v723_v63 }
  0x7e   : > { %v735_v7 = vld [vmem:[#allocation5 + $0x4d0] sm:$0xff]  ;;  %v1247_v9 = vpack.c.bf16 %v743_v3, %v736_v2  ;;  %v742_v10 = vld [vmem:[#allocation5 + $0x508] sm:$0xff]  ;;  %v737_v11 = vld [vmem:[#allocation5 + $0x4e0] sm:$0xff]  ;;  %v1249_v13 = vpack.c.bf16 %v745_v5, %v738_v4 }
  0x7f   : > { %v744_v12 = vld [vmem:[#allocation5 + $0x518] sm:$0xff]  ;;  %v750_v14 = vld [vmem:[#allocation5 + $0x548] sm:$0xff]  ;;  %v757_v15 = vld [vmem:[#allocation5 + $0x580] sm:$0xff]  ;;  %v1246_v20 = vpack.c.bf16 %v742_v10, %v735_v7 }
  0x80   : > { %1542 = vmatpush1.bf16.msra.mxu0 %v1218_v34  ;;  %2271 = vmatpush1.bf16.msra.mxu1 %v1220_v35  ;;  %v204_v16 = vld [vmem:[%s5900_s26 + $0x8] sm:$0xff]  ;;  %v752_v17 = vld [vmem:[#allocation5 + $0x558] sm:$0xff]  ;;  %v759_v18 = vld [vmem:[#allocation5 + $0x590] sm:$0xff]  ;;  %v1248_v22 = vpack.c.bf16 %v744_v12, %v737_v11  ;;  %v1254_v23 = vpack.c.bf16 %v757_v15, %v750_v14 }
  0x81   : > { %1543 = vmatprep.subr.bf16.mxu0 %v1226_v36  ;;  %2272 = vmatprep.subr.bf16.mxu1 %v1228_v40  ;;  %v210_v19 = vld [vmem:[%s5900_s26 + $0x38] sm:$0xff]  ;;  %v749_v24 = vld [vmem:[#allocation5 + $0x540] sm:$0xff]  ;;  %v751_v26 = vld [vmem:[#allocation5 + $0x550] sm:$0xff]  ;;  %v1256_v27 = vpack.c.bf16 %v759_v18, %v752_v17 }
  0x82   : > { %v5912_v21 = vpack.c.bf16 %v210_v19, %v204_v16  ;;  %v756_v25 = vld [vmem:[#allocation5 + $0x578] sm:$0xff]  ;;  %v758_v28 = vld [vmem:[#allocation5 + $0x588] sm:$0xff]  ;;  %v771_v30 = vld [vmem:[#allocation5 + $0x5f0] sm:$0xff] }
  0x83   : > { %v764_v29 = vld [vmem:[#allocation5 + $0x5b8] sm:$0xff]  ;;  %v766_v31 = vld [vmem:[#allocation5 + $0x5c8] sm:$0xff]  ;;  %v773_v32 = vld [vmem:[#allocation5 + $0x600] sm:$0xff]  ;;  %v1253_v33 = vpack.c.bf16 %v756_v25, %v749_v24  ;;  %v1255_v34 = vpack.c.bf16 %v758_v28, %v751_v26 }
  0x84   : > { %1544 = vmatpush1.bf16.msra.mxu0 %v1225_v46  ;;  %2273 = vmatpush1.bf16.msra.mxu1 %v1227_v47  ;;  %v1261_v35 = vpack.c.bf16 %v771_v30, %v764_v29  ;;  %v763_v36 = vld [vmem:[#allocation5 + $0x5b0] sm:$0xff]  ;;  %v770_v37 = vld [vmem:[#allocation5 + $0x5e8] sm:$0xff]  ;;  %v765_v38 = vld [vmem:[#allocation5 + $0x5c0] sm:$0xff]  ;;  %v1263_v39 = vpack.c.bf16 %v773_v32, %v766_v31 }
  0x85   : > { %1545 = vmatprep.subr.bf16.mxu0 %v1233_v48  ;;  %2274 = vmatprep.subr.bf16.mxu1 %v1235_v52  ;;  %v772_v40 = vld [vmem:[#allocation5 + $0x5f8] sm:$0xff]  ;;  %v778_v41 = vld [vmem:[#allocation5 + $0x628] sm:$0xff]  ;;  %v785_v42 = vld [vmem:[#allocation5 + $0x660] sm:$0xff]  ;;  %v1260_v45 = vpack.c.bf16 %v770_v37, %v763_v36 }
  0x86   : > { %1559 = vmatprep.mubr.bf16.mxu0 %v5912_v21  ;;  %2288 = vmatprep.mubr.bf16.mxu1 %v5912_v21  ;;  %v780_v43 = vld [vmem:[#allocation5 + $0x638] sm:$0xff]  ;;  %v787_v44 = vld [vmem:[#allocation5 + $0x670] sm:$0xff]  ;;  %v1262_v46 = vpack.c.bf16 %v772_v40, %v765_v38  ;;  %v1268_v47 = vpack.c.bf16 %v785_v42, %v778_v41  ;;  %v777_v48 = vld [vmem:[#allocation5 + $0x620] sm:$0xff] }
  0x87   : > { %v784_v49 = vld [vmem:[#allocation5 + $0x658] sm:$0xff]  ;;  %v779_v50 = vld [vmem:[#allocation5 + $0x630] sm:$0xff]  ;;  %v1270_v51 = vpack.c.bf16 %v787_v44, %v780_v43  ;;  %v786_v52 = vld [vmem:[#allocation5 + $0x668] sm:$0xff] }
  0x88   : > { %1546 = vmatpush1.bf16.msra.mxu0 %v1232_v58  ;;  %2275 = vmatpush1.bf16.msra.mxu1 %v1234_v59  ;;  %v792_v53 = vld [vmem:[#allocation5 + $0x698] sm:$0xff]  ;;  %v799_v54 = vld [vmem:[#allocation5 + $0x6d0] sm:$0xff]  ;;  %v794_v55 = vld [vmem:[#allocation5 + $0x6a8] sm:$0xff]  ;;  %v1267_v57 = vpack.c.bf16 %v784_v49, %v777_v48  ;;  %v1269_v58 = vpack.c.bf16 %v786_v52, %v779_v50 }
  0x89   : > { %1547 = vmatprep.subr.bf16.mxu0 %v1240_v60  ;;  %2276 = vmatprep.subr.bf16.mxu1 %v1242_v0  ;;  %v801_v56 = vld [vmem:[#allocation5 + $0x6e0] sm:$0xff]  ;;  %v1275_v59 = vpack.c.bf16 %v799_v54, %v792_v53  ;;  %v791_v60 = vld [vmem:[#allocation5 + $0x690] sm:$0xff]  ;;  %v798_v61 = vld [vmem:[#allocation5 + $0x6c8] sm:$0xff] }
  0x8a   : > { %v793_v62 = vld [vmem:[#allocation5 + $0x6a0] sm:$0xff]  ;;  %v1277_v63 = vpack.c.bf16 %v801_v56, %v794_v55  ;;  %v800_v0 = vld [vmem:[#allocation5 + $0x6d8] sm:$0xff]  ;;  %v806_v1 = vld [vmem:[#allocation5 + $0x708] sm:$0xff]  ;;  %v1274_v5 = vpack.c.bf16 %v798_v61, %v791_v60 }
  0x8b   : > { %v813_v2 = vld [vmem:[#allocation5 + $0x740] sm:$0xff]  ;;  %v808_v3 = vld [vmem:[#allocation5 + $0x718] sm:$0xff]  ;;  %v815_v4 = vld [vmem:[#allocation5 + $0x750] sm:$0xff] }
  0x8c   : > { %1548 = vmatpush1.bf16.msra.mxu0 %v1239_v6  ;;  %2277 = vmatpush1.bf16.msra.mxu1 %v1241_v8  ;;  %v203_v6 = vld [vmem:[%s5900_s26] sm:$0xff]  ;;  %v209_v7 = vld [vmem:[%s5900_s26 + $0x30] sm:$0xff]  ;;  %v1276_v8 = vpack.c.bf16 %v800_v0, %v793_v62  ;;  %v812_v11 = vld [vmem:[#allocation5 + $0x738] sm:$0xff] }
  0x8d   : > { %1549 = vmatprep.subr.bf16.mxu0 %v1247_v9  ;;  %2278 = vmatprep.subr.bf16.mxu1 %v1249_v13  ;;  %v1282_v9 = vpack.c.bf16 %v813_v2, %v806_v1  ;;  %v805_v10 = vld [vmem:[#allocation5 + $0x700] sm:$0xff]  ;;  %v807_v12 = vld [vmem:[#allocation5 + $0x710] sm:$0xff]  ;;  %v1284_v13 = vpack.c.bf16 %v815_v4, %v808_v3  ;;  %v814_v14 = vld [vmem:[#allocation5 + $0x748] sm:$0xff]  ;;  %v5920_v17 = vpack.c.bf16 %v209_v7, %v203_v6 }
  0x8e   : > { %v216_v15 = vld [vmem:[%s5900_s26 + $0x68] sm:$0xff]  ;;  %v222_v16 = vld [vmem:[%s5900_s26 + $0x98] sm:$0xff]  ;;  %v827_v19 = vld [vmem:[#allocation5 + $0x7b0] sm:$0xff]  ;;  %v1283_v24 = vpack.c.bf16 %v814_v14, %v807_v12 }
  0x8f   : > { %v820_v18 = vld [vmem:[#allocation5 + $0x778] sm:$0xff]  ;;  %v5922_v25 = vpack.c.bf16 %v222_v16, %v216_v15  ;;  %v819_v26 = vld [vmem:[#allocation5 + $0x770] sm:$0xff]  ;;  %v821_v28 = vld [vmem:[#allocation5 + $0x780] sm:$0xff] }
  0x90   : > { %1550 = vmatpush1.bf16.msra.mxu0 %v1246_v20  ;;  %2279 = vmatpush1.bf16.msra.mxu1 %v1248_v22  ;;  %v1281_v20 = vpack.c.bf16 %v812_v11, %v805_v10  ;;  %v822_v22 = vld [vmem:[#allocation5 + $0x788] sm:$0xff]  ;;  %v1289_v29 = vpack.c.bf16 %v827_v19, %v820_v18  ;;  %v828_v30 = vld [vmem:[#allocation5 + $0x7b8] sm:$0xff]  ;;  %v841_v32 = vld [vmem:[#allocation5 + $0x820] sm:$0xff] }
  0x91   : > { %1551 = vmatprep.subr.bf16.mxu0 %v1254_v23  ;;  %2280 = vmatprep.subr.bf16.mxu1 %v1256_v27  ;;  %v829_v23 = vld [vmem:[#allocation5 + $0x7c0] sm:$0xff]  ;;  %v826_v27 = vld [vmem:[#allocation5 + $0x7a8] sm:$0xff]  ;;  %v221_v37 = vld [vmem:[%s5900_s26 + $0x90] sm:$0xff] }
  0x92   : > { %v834_v31 = vld [vmem:[#allocation5 + $0x7e8] sm:$0xff]  ;;  %v215_v36 = vld [vmem:[%s5900_s26 + $0x60] sm:$0xff]  ;;  %v1288_v38 = vpack.c.bf16 %v826_v27, %v819_v26  ;;  %v234_v41 = vld [vmem:[%s5900_s26 + $0xf8] sm:$0xff] }
  0x93   : > { %v228_v40 = vld [vmem:[%s5900_s26 + $0xc8] sm:$0xff]  ;;  %v1296_v42 = vpack.c.bf16 %v841_v32, %v834_v31  ;;  %v833_v43 = vld [vmem:[#allocation5 + $0x7e0] sm:$0xff]  ;;  %v840_v44 = vld [vmem:[#allocation5 + $0x818] sm:$0xff] }
  0x94   : > { %1552 = vmatpush1.bf16.msra.mxu0 %v1253_v33  ;;  %2281 = vmatpush1.bf16.msra.mxu1 %v1255_v34  ;;  %v1291_v33 = vpack.c.bf16 %v829_v23, %v822_v22  ;;  %v836_v34 = vld [vmem:[#allocation5 + $0x7f8] sm:$0xff]  ;;  %v842_v48 = vld [vmem:[#allocation5 + $0x828] sm:$0xff]  ;;  %v855_v50 = vld [vmem:[#allocation5 + $0x890] sm:$0xff]  ;;  %v1295_v54 = vpack.c.bf16 %v840_v44, %v833_v43 }
  0x95   : > { %1553 = vmatprep.subr.bf16.mxu0 %v1261_v35  ;;  %2282 = vmatprep.subr.bf16.mxu1 %v1263_v39  ;;  %v843_v35 = vld [vmem:[#allocation5 + $0x830] sm:$0xff]  ;;  %v1290_v39 = vpack.c.bf16 %v828_v30, %v821_v28  ;;  %v848_v49 = vld [vmem:[#allocation5 + $0x858] sm:$0xff]  ;;  %v850_v52 = vld [vmem:[#allocation5 + $0x868] sm:$0xff] }
  0x96   : > { %v857_v53 = vld [vmem:[#allocation5 + $0x8a0] sm:$0xff]  ;;  %v856_v62 = vld [vmem:[#allocation5 + $0x898] sm:$0xff]  ;;  %v233_v1 = vld [vmem:[%s5900_s26 + $0xf0] sm:$0xff] }
  0x97   : > { %v227_v55 = vld [vmem:[%s5900_s26 + $0xc0] sm:$0xff]  ;;  %v1305_v61 = vpack.c.bf16 %v857_v53, %v850_v52  ;;  %v864_v2 = vld [vmem:[#allocation5 + $0x8d8] sm:$0xff]  ;;  %v871_v3 = vld [vmem:[#allocation5 + $0x910] sm:$0xff] }
  0x98   : > { %1554 = vmatpush1.bf16.msra.mxu0 %v1260_v45  ;;  %2283 = vmatpush1.bf16.msra.mxu1 %v1262_v46  ;;  %v1298_v45 = vpack.c.bf16 %v843_v35, %v836_v34  ;;  %v835_v46 = vld [vmem:[#allocation5 + $0x7f0] sm:$0xff]  ;;  %v849_v60 = vld [vmem:[#allocation5 + $0x860] sm:$0xff]  ;;  %v240_v4 = vld [vmem:[%s5900_s26 + $0x128] sm:$0xff]  ;;  %v5944_v12 = vpack.c.bf16 %v233_v1, %v227_v55 }
  0x99   : > { %1555 = vmatprep.subr.bf16.mxu0 %v1268_v47  ;;  %2284 = vmatprep.subr.bf16.mxu1 %v1270_v51  ;;  %v5932_v47 = vpack.c.bf16 %v221_v37, %v215_v36  ;;  %v5934_v51 = vpack.c.bf16 %v234_v41, %v228_v40  ;;  %v1297_v56 = vpack.c.bf16 %v842_v48, %v835_v46  ;;  %v869_v0 = vld [vmem:[#allocation5 + $0x900] sm:$0xff]  ;;  %v868_v10 = vld [vmem:[#allocation5 + $0x8f8] sm:$0xff]  ;;  %v863_v11 = vld [vmem:[#allocation5 + $0x8d0] sm:$0xff] }
  0x9a   : > { %v1304_v7 = vpack.c.bf16 %v856_v62, %v849_v60  ;;  %v870_v14 = vld [vmem:[#allocation5 + $0x908] sm:$0xff]  ;;  %v876_v15 = vld [vmem:[#allocation5 + $0x938] sm:$0xff]  ;;  %v883_v16 = vld [vmem:[#allocation5 + $0x970] sm:$0xff] }
  0x9b   : > { %v878_v19 = vld [vmem:[#allocation5 + $0x948] sm:$0xff]  ;;  %v239_v23 = vld [vmem:[%s5900_s26 + $0x120] sm:$0xff]  ;;  %v1317_v26 = vpack.c.bf16 %v883_v16, %v876_v15  ;;  %v875_v27 = vld [vmem:[#allocation5 + $0x930] sm:$0xff] }
  0x9c   : > { %1556 = vmatpush1.bf16.msra.mxu0 %v1267_v57  ;;  %2285 = vmatpush1.bf16.msra.mxu1 %v1269_v58  ;;  %v1303_v57 = vpack.c.bf16 %v855_v50, %v848_v49  ;;  %v847_v58 = vld [vmem:[#allocation5 + $0x850] sm:$0xff]  ;;  %v882_v28 = vld [vmem:[#allocation5 + $0x968] sm:$0xff]  ;;  %v884_v31 = vld [vmem:[#allocation5 + $0x978] sm:$0xff] }
  0x9d   : > { %1557 = vmatprep.subr.bf16.mxu0 %v1275_v59  ;;  %2286 = vmatprep.subr.bf16.mxu1 %v1277_v63  ;;  %v854_v59 = vld [vmem:[#allocation5 + $0x888] sm:$0xff]  ;;  %v245_v34 = vld [vmem:[%s5900_s26 + $0x150] sm:$0xff]  ;;  %v892_v35 = vld [vmem:[#allocation5 + $0x9b8] sm:$0xff] }
  0x9e   : > { %v862_v63 = vld [vmem:[#allocation5 + $0x8c8] sm:$0xff]  ;;  %v1302_v6 = vpack.c.bf16 %v854_v59, %v847_v58  ;;  %v899_v36 = vld [vmem:[#allocation5 + $0x9f0] sm:$0xff]  ;;  %v896_v43 = vld [vmem:[#allocation5 + $0x9d8] sm:$0xff] }
  0x9f   : > { %v890_v32 = vld [vmem:[#allocation5 + $0x9a8] sm:$0xff]  ;;  %v891_v44 = vld [vmem:[#allocation5 + $0x9b0] sm:$0xff]  ;;  %v1326_v46 = vpack.c.bf16 %v899_v36, %v892_v35  ;;  %v904_v49 = vld [vmem:[#allocation5 + $0xa18] sm:$0xff] }
  0xa0   : > { %1558 = vmatpush1.bf16.msra.mxu0 %v1274_v5  ;;  %2287 = vmatpush1.bf16.msra.mxu1 %v1276_v8  ;;  %v246_v5 = vld [vmem:[%s5900_s26 + $0x158] sm:$0xff]  ;;  %v1310_v8 = vpack.c.bf16 %v869_v0, %v862_v63  ;;  %v252_v37 = vld [vmem:[%s5900_s26 + $0x188] sm:$0xff]  ;;  %v911_v50 = vld [vmem:[#allocation5 + $0xa50] sm:$0xff] }
  0xa1   : > { %1770 = vmatprep.subr.bf16.mxu0 %v1282_v9  ;;  %2499 = vmatprep.subr.bf16.mxu1 %v1284_v13  ;;  %v861_v9 = vld [vmem:[#allocation5 + $0x8c0] sm:$0xff]  ;;  %v1312_v13 = vpack.c.bf16 %v871_v3, %v864_v2  ;;  %v5946_v18 = vpack.c.bf16 %v246_v5, %v240_v4  ;;  %v898_v48 = vld [vmem:[#allocation5 + $0x9e8] sm:$0xff]  ;;  %v1331_v58 = vpack.c.bf16 %v911_v50, %v904_v49  ;;  %v903_v59 = vld [vmem:[#allocation5 + $0xa10] sm:$0xff] }
  0xa2   : > { %v1309_v22 = vpack.c.bf16 %v868_v10, %v861_v9  ;;  %v906_v53 = vld [vmem:[#allocation5 + $0xa28] sm:$0xff]  ;;  %v912_v63 = vld [vmem:[#allocation5 + $0xa58] sm:$0xff]  ;;  %v925_v1 = vld [vmem:[#allocation5 + $0xac0] sm:$0xff] }
  0xa3   : > { %1560 = vmatmul.mubr.bf16.vlgmr.msra.gmra.mrb[0].mxu0 %v5920_v17  ;;  %2289 = vmatmul.mubr.bf16.vlgmr.msra.gmra.mrb[0].mxu1 %v5920_v17  ;;  %v910_v60 = vld [vmem:[#allocation5 + $0xa48] sm:$0xff]  ;;  %v257_v2 = vld [vmem:[%s5900_s26 + $0x1b0] sm:$0xff]  ;;  %v920_v3 = vld [vmem:[#allocation5 + $0xa98] sm:$0xff] }
  0xa4   : > { %1771 = vmatpush1.bf16.msra.mxu0 %v1281_v20  ;;  %2500 = vmatpush1.bf16.msra.mxu1 %v1283_v24  ;;  %v885_v20 = vld [vmem:[#allocation5 + $0x980] sm:$0xff]  ;;  %v1311_v24 = vpack.c.bf16 %v870_v14, %v863_v11  ;;  %v918_v0 = vld [vmem:[#allocation5 + $0xa88] sm:$0xff]  ;;  %v927_v4 = vld [vmem:[#allocation5 + $0xad0] sm:$0xff] }
  0xa5   : > { %1569 = vmatprep.mubr.bf16.mxu0 %v5922_v25  ;;  %2298 = vmatprep.mubr.bf16.mxu1 %v5922_v25  ;;  %v1319_v30 = vpack.c.bf16 %v885_v20, %v878_v19  ;;  %v264_v5 = vld [vmem:[%s5900_s26 + $0x1e8] sm:$0xff]  ;;  %v1338_v9 = vpack.c.bf16 %v925_v1, %v918_v0  ;;  %v917_v10 = vld [vmem:[#allocation5 + $0xa80] sm:$0xff]  ;;  %v924_v11 = vld [vmem:[#allocation5 + $0xab8] sm:$0xff]  ;;  %v1340_v15 = vpack.c.bf16 %v927_v4, %v920_v3 }
  0xa6   : > { %1772 = vmatprep.subr.bf16.mxu0 %v1289_v29  ;;  %2501 = vmatprep.subr.bf16.mxu1 %v1291_v33  ;;  %v877_v29 = vld [vmem:[#allocation5 + $0x940] sm:$0xff]  ;;  %v926_v16 = vld [vmem:[#allocation5 + $0xac8] sm:$0xff]  ;;  %v932_v19 = vld [vmem:[#allocation5 + $0xaf8] sm:$0xff] }
  0xa7   : > { %v897_v33 = vld [vmem:[#allocation5 + $0x9e0] sm:$0xff]  ;;  %v1318_v40 = vpack.c.bf16 %v884_v31, %v877_v29  ;;  %v939_v20 = vld [vmem:[#allocation5 + $0xb30] sm:$0xff]  ;;  %v938_v31 = vld [vmem:[#allocation5 + $0xb28] sm:$0xff] }
  0xa8   : > { %1773 = vmatpush1.bf16.msra.mxu0 %v1288_v38  ;;  %2502 = vmatpush1.bf16.msra.mxu1 %v1290_v39  ;;  %v258_v38 = vld [vmem:[%s5900_s26 + $0x1b8] sm:$0xff]  ;;  %v1316_v39 = vpack.c.bf16 %v882_v28, %v875_v27  ;;  %v1324_v41 = vpack.c.bf16 %v897_v33, %v890_v32  ;;  %v263_v27 = vld [vmem:[%s5900_s26 + $0x1e0] sm:$0xff]  ;;  %v1345_v29 = vpack.c.bf16 %v939_v20, %v932_v19  ;;  %v946_v35 = vld [vmem:[#allocation5 + $0xb68] sm:$0xff] }
  0xa9   : > { %1774 = vmatprep.subr.bf16.mxu0 %v1296_v42  ;;  %2503 = vmatprep.subr.bf16.mxu1 %v1298_v45  ;;  %v889_v42 = vld [vmem:[#allocation5 + $0x9a0] sm:$0xff]  ;;  %v5956_v45 = vpack.c.bf16 %v245_v34, %v239_v23  ;;  %v5958_v52 = vpack.c.bf16 %v258_v38, %v252_v37  ;;  %v934_v23 = vld [vmem:[#allocation5 + $0xb08] sm:$0xff]  ;;  %v940_v34 = vld [vmem:[#allocation5 + $0xb38] sm:$0xff] }
  0xaa   : > { %v1323_v55 = vpack.c.bf16 %v896_v43, %v889_v42  ;;  %v933_v32 = vld [vmem:[#allocation5 + $0xb00] sm:$0xff]  ;;  %v269_v37 = vld [vmem:[%s5900_s26 + $0x210] sm:$0xff]  ;;  %v948_v38 = vld [vmem:[#allocation5 + $0xb78] sm:$0xff] }
  0xab   : > { %1570 = vmatmul.mubr.bf16.gmra.mrb[4].mxu0 %v5932_v47  ;;  %2299 = vmatmul.mubr.bf16.gmra.mrb[4].mxu1 %v5932_v47  ;;  %v953_v36 = vld [vmem:[#allocation5 + $0xba0] sm:$0xff]  ;;  %v1346_v43 = vpack.c.bf16 %v940_v34, %v933_v32  ;;  %v947_v49 = vld [vmem:[#allocation5 + $0xb70] sm:$0xff]  ;;  %v5980_v50 = vpack.c.bf16 %v269_v37, %v263_v27  ;;  %v966_v1 = vld [vmem:[#allocation5 + $0xc08] sm:$0xff] }
  0xac   : > { %1579 = vmatprep.mubr.bf16.mxu0 %v5934_v51  ;;  %2308 = vmatprep.mubr.bf16.mxu1 %v5934_v51  ;;  %v959_v0 = vld [vmem:[#allocation5 + $0xbd0] sm:$0xff]  ;;  %v968_v4 = vld [vmem:[#allocation5 + $0xc18] sm:$0xff]  ;;  %v973_v19 = vld [vmem:[#allocation5 + $0xc40] sm:$0xff] }
  0xad   : > { %1775 = vmatpush1.bf16.msra.mxu0 %v1295_v54  ;;  %2504 = vmatpush1.bf16.msra.mxu1 %v1297_v56  ;;  %v913_v54 = vld [vmem:[#allocation5 + $0xa60] sm:$0xff]  ;;  %v980_v20 = vld [vmem:[#allocation5 + $0xc78] sm:$0xff]  ;;  %v982_v27 = vld [vmem:[#allocation5 + $0xc88] sm:$0xff] }
  0xae   : > { %1776 = vmatprep.subr.bf16.mxu0 %v1303_v57  ;;  %2505 = vmatprep.subr.bf16.mxu1 %v1305_v61  ;;  %v251_v56 = vld [vmem:[%s5900_s26 + $0x180] sm:$0xff]  ;;  %v1325_v57 = vpack.c.bf16 %v898_v48, %v891_v44  ;;  %v1333_v62 = vpack.c.bf16 %v913_v54, %v906_v53  ;;  %v1352_v44 = vpack.c.bf16 %v953_v36, %v946_v35  ;;  %v952_v48 = vld [vmem:[#allocation5 + $0xb98] sm:$0xff]  ;;  %v954_v54 = vld [vmem:[#allocation5 + $0xba8] sm:$0xff] }
  0xaf   : > { %v905_v61 = vld [vmem:[#allocation5 + $0xa20] sm:$0xff]  ;;  %v5968_v14 = vpack.c.bf16 %v257_v2, %v251_v56  ;;  %v967_v56 = vld [vmem:[#allocation5 + $0xc10] sm:$0xff] }
  0xb0   : > { %v961_v2 = vld [vmem:[#allocation5 + $0xbe0] sm:$0xff]  ;;  %v987_v37 = vld [vmem:[#allocation5 + $0xcb0] sm:$0xff] }
  0xb1   : > { %1777 = vmatpush1.bf16.msra.mxu0 %v1302_v6  ;;  %2506 = vmatpush1.bf16.msra.mxu1 %v1304_v7  ;;  %v270_v6 = vld [vmem:[%s5900_s26 + $0x218] sm:$0xff]  ;;  %v1330_v7 = vpack.c.bf16 %v910_v60, %v903_v59  ;;  %v969_v59 = vld [vmem:[#allocation5 + $0xc20] sm:$0xff] }
  0xb2   : > { %1778 = vmatprep.subr.bf16.mxu0 %v1310_v8  ;;  %2507 = vmatprep.subr.bf16.mxu1 %v1312_v13  ;;  %v1332_v8 = vpack.c.bf16 %v912_v63, %v905_v61  ;;  %v919_v13 = vld [vmem:[#allocation5 + $0xa90] sm:$0xff]  ;;  %v275_v61 = vld [vmem:[%s5900_s26 + $0x240] sm:$0xff] }
  0xb3   : > { %1580 = vmatmul.mubr.bf16.gmra.mrb[8].mxu0 %v5944_v12  ;;  %2309 = vmatmul.mubr.bf16.gmra.mrb[8].mxu1 %v5944_v12  ;;  %v1339_v28 = vpack.c.bf16 %v926_v16, %v919_v13  ;;  %v1358_v13 = vpack.c.bf16 %v966_v1, %v959_v0  ;;  %v997_v32 = vld [vmem:[#allocation5 + $0xd00] sm:$0xff]  ;;  %v1016_v0 = vld [vmem:[#allocation5 + $0xd98] sm:$0xff]  ;;  %v1023_v1 = vld [vmem:[#allocation5 + $0xdd0] sm:$0xff] }
  0xb4   : > { %1589 = vmatprep.mubr.bf16.mxu0 %v5946_v18  ;;  %2318 = vmatprep.mubr.bf16.mxu1 %v5946_v18  ;;  %v287_v34 = vld [vmem:[%s5900_s26 + $0x2a0] sm:$0xff] }
  0xb5   : > { %1779 = vmatpush1.bf16.msra.mxu0 %v1309_v22  ;;  %2508 = vmatpush1.bf16.msra.mxu1 %v1311_v24  ;;  %v5970_v22 = vpack.c.bf16 %v270_v6, %v264_v5  ;;  %v941_v24 = vld [vmem:[#allocation5 + $0xb40] sm:$0xff]  ;;  %v974_v5 = vld [vmem:[#allocation5 + $0xc48] sm:$0xff] }
  0xb6   : > { %1780 = vmatprep.subr.bf16.mxu0 %v1317_v26  ;;  %2509 = vmatprep.subr.bf16.mxu1 %v1319_v30  ;;  %v1337_v26 = vpack.c.bf16 %v924_v11, %v917_v10  ;;  %v931_v30 = vld [vmem:[#allocation5 + $0xaf0] sm:$0xff]  ;;  %v1347_v33 = vpack.c.bf16 %v941_v24, %v934_v23  ;;  %v981_v6 = vld [vmem:[#allocation5 + $0xc80] sm:$0xff]  ;;  %v288_v10 = vld [vmem:[%s5900_s26 + $0x2a8] sm:$0xff] }
  0xb7   : > { %v1344_v42 = vpack.c.bf16 %v938_v31, %v931_v30  ;;  %v294_v11 = vld [vmem:[%s5900_s26 + $0x2d8] sm:$0xff]  ;;  %v1366_v16 = vpack.c.bf16 %v981_v6, %v974_v5  ;;  %v975_v23 = vld [vmem:[#allocation5 + $0xc50] sm:$0xff]  ;;  %v990_v31 = vld [vmem:[#allocation5 + $0xcc8] sm:$0xff] }
  0xb8   : > { %v5994_v30 = vpack.c.bf16 %v294_v11, %v288_v10  ;;  %v1367_v35 = vpack.c.bf16 %v982_v27, %v975_v23  ;;  %v299_v6 = vld [vmem:[%s5900_s26 + $0x300] sm:$0xff]  ;;  %v1022_v10 = vld [vmem:[#allocation5 + $0xdc8] sm:$0xff]  ;;  %v1032_v23 = vld [vmem:[#allocation5 + $0xe18] sm:$0xff] }
  0xb9   : > { %1781 = vmatpush1.bf16.msra.mxu0 %v1316_v39  ;;  %2510 = vmatpush1.bf16.msra.mxu1 %v1318_v40  ;;  %v955_v39 = vld [vmem:[#allocation5 + $0xbb0] sm:$0xff]  ;;  %v276_v40 = vld [vmem:[%s5900_s26 + $0x248] sm:$0xff]  ;;  %v1017_v11 = vld [vmem:[#allocation5 + $0xda0] sm:$0xff] }
  0xba   : > { %1782 = vmatprep.subr.bf16.mxu0 %v1324_v41  ;;  %2511 = vmatprep.subr.bf16.mxu1 %v1326_v46  ;;  %v282_v41 = vld [vmem:[%s5900_s26 + $0x278] sm:$0xff]  ;;  %v945_v46 = vld [vmem:[#allocation5 + $0xb60] sm:$0xff]  ;;  %v1354_v53 = vpack.c.bf16 %v955_v39, %v948_v38  ;;  %v994_v38 = vld [vmem:[#allocation5 + $0xce8] sm:$0xff] }
  0xbb   : > { %1590 = vmatmul.mubr.bf16.gmra.mrb[12].mxu0 %v5956_v45  ;;  %2319 = vmatmul.mubr.bf16.gmra.mrb[12].mxu1 %v5956_v45  ;;  %v1351_v60 = vpack.c.bf16 %v952_v48, %v945_v46  ;;  %v989_v39 = vld [vmem:[#allocation5 + $0xcc0] sm:$0xff]  ;;  %v1004_v46 = vld [vmem:[#allocation5 + $0xd38] sm:$0xff]  ;;  %v1011_v48 = vld [vmem:[#allocation5 + $0xd70] sm:$0xff] }
  0xbc   : > { %1599 = vmatprep.mubr.bf16.mxu0 %v5958_v52  ;;  %2328 = vmatprep.mubr.bf16.mxu1 %v5958_v52  ;;  %v312_v27 = vld [vmem:[%s5900_s26 + $0x368] sm:$0xff] }
  0xbd   : > { %1783 = vmatpush1.bf16.msra.mxu0 %v1323_v55  ;;  %2512 = vmatpush1.bf16.msra.mxu1 %v1325_v57  ;;  %v960_v55 = vld [vmem:[#allocation5 + $0xbd8] sm:$0xff]  ;;  %v5982_v57 = vpack.c.bf16 %v282_v41, %v276_v40  ;;  %v1375_v40 = vpack.c.bf16 %v997_v32, %v990_v31 }
  0xbe   : > { %1784 = vmatprep.subr.bf16.mxu0 %v1331_v58  ;;  %2513 = vmatprep.subr.bf16.mxu1 %v1333_v62  ;;  %v962_v58 = vld [vmem:[#allocation5 + $0xbe8] sm:$0xff]  ;;  %v1353_v62 = vpack.c.bf16 %v954_v54, %v947_v49  ;;  %v1359_v63 = vpack.c.bf16 %v967_v56, %v960_v55  ;;  %v996_v41 = vld [vmem:[#allocation5 + $0xcf8] sm:$0xff]  ;;  %v1372_v54 = vpack.c.bf16 %v994_v38, %v987_v37  ;;  %v317_v37 = vld [vmem:[%s5900_s26 + $0x390] sm:$0xff] }
  0xbf   : > { %v1361_v3 = vpack.c.bf16 %v969_v59, %v962_v58  ;;  %v300_v49 = vld [vmem:[%s5900_s26 + $0x308] sm:$0xff]  ;;  %v1374_v55 = vpack.c.bf16 %v996_v41, %v989_v39  ;;  %v1001_v58 = vld [vmem:[#allocation5 + $0xd20] sm:$0xff]  ;;  %v1008_v59 = vld [vmem:[#allocation5 + $0xd58] sm:$0xff] }
  0xc0   : > { %v1379_v5 = vpack.c.bf16 %v1008_v59, %v1001_v58  ;;  %v324_v38 = vld [vmem:[%s5900_s26 + $0x3c8] sm:$0xff]  ;;  %v330_v39 = vld [vmem:[%s5900_s26 + $0x3f8] sm:$0xff] }
  0xc1   : > { %1785 = vmatpush1.bf16.msra.mxu0 %v1330_v7  ;;  %2514 = vmatpush1.bf16.msra.mxu1 %v1332_v8  ;;  %v281_v7 = vld [vmem:[%s5900_s26 + $0x270] sm:$0xff]  ;;  %v976_v8 = vld [vmem:[#allocation5 + $0xc58] sm:$0xff]  ;;  %v6030_v41 = vpack.c.bf16 %v330_v39, %v324_v38  ;;  %v407_v39 = vld [vmem:[%s5900_s26 + $0x660] sm:$0xff] }
  0xc2   : > { %1786 = vmatprep.subr.bf16.mxu0 %v1338_v9  ;;  %2515 = vmatprep.subr.bf16.mxu1 %v1340_v15  ;;  %v983_v9 = vld [vmem:[#allocation5 + $0xc90] sm:$0xff]  ;;  %v1360_v15 = vpack.c.bf16 %v968_v4, %v961_v2  ;;  %v5992_v24 = vpack.c.bf16 %v281_v7, %v275_v61  ;;  %v1025_v4 = vld [vmem:[#allocation5 + $0xde0] sm:$0xff] }
  0xc3   : > { %1600 = vmatmul.mubr.bf16.gmra.mrb[16].mxu0 %v5968_v14  ;;  %2329 = vmatmul.mubr.bf16.gmra.mrb[16].mxu1 %v5968_v14 }
  0xc4   : > { %1609 = vmatprep.mubr.bf16.mxu0 %v5970_v22  ;;  %2338 = vmatprep.mubr.bf16.mxu1 %v5970_v22 }
  0xc5   : > { %1787 = vmatpush1.bf16.msra.mxu0 %v1337_v26  ;;  %2516 = vmatpush1.bf16.msra.mxu1 %v1339_v28  ;;  %v1368_v26 = vpack.c.bf16 %v983_v9, %v976_v8  ;;  %v988_v28 = vld [vmem:[#allocation5 + $0xcb8] sm:$0xff]  ;;  %v1387_v8 = vpack.c.bf16 %v1023_v1, %v1016_v0  ;;  %v1015_v9 = vld [vmem:[#allocation5 + $0xd90] sm:$0xff] }
  0xc6   : > { %1788 = vmatprep.subr.bf16.mxu0 %v1345_v29  ;;  %2517 = vmatprep.subr.bf16.mxu1 %v1347_v33  ;;  %v995_v29 = vld [vmem:[#allocation5 + $0xcf0] sm:$0xff]  ;;  %v1365_v33 = vpack.c.bf16 %v980_v20, %v973_v19  ;;  %v1037_v19 = vld [vmem:[#allocation5 + $0xe40] sm:$0xff]  ;;  %v366_v0 = vld [vmem:[%s5900_s26 + $0x518] sm:$0xff] }
  0xc7   : > { %v1373_v36 = vpack.c.bf16 %v995_v29, %v988_v28  ;;  %v305_v20 = vld [vmem:[%s5900_s26 + $0x330] sm:$0xff]  ;;  %v318_v28 = vld [vmem:[%s5900_s26 + $0x398] sm:$0xff]  ;;  %v1386_v29 = vpack.c.bf16 %v1022_v10, %v1015_v9  ;;  %v371_v10 = vld [vmem:[%s5900_s26 + $0x540] sm:$0xff] }
  0xc9   : > { %1789 = vmatpush1.bf16.msra.mxu0 %v1344_v42  ;;  %2518 = vmatpush1.bf16.msra.mxu1 %v1346_v43  ;;  %v1002_v42 = vld [vmem:[#allocation5 + $0xd28] sm:$0xff]  ;;  %v1009_v43 = vld [vmem:[#allocation5 + $0xd60] sm:$0xff] }
  0xca   : > { %1790 = vmatprep.subr.bf16.mxu0 %v1352_v44  ;;  %2519 = vmatprep.subr.bf16.mxu1 %v1354_v53  ;;  %v293_v44 = vld [vmem:[%s5900_s26 + $0x2d0] sm:$0xff]  ;;  %v306_v53 = vld [vmem:[%s5900_s26 + $0x338] sm:$0xff]  ;;  %v1380_v56 = vpack.c.bf16 %v1009_v43, %v1002_v42  ;;  %v323_v42 = vld [vmem:[%s5900_s26 + $0x3c0] sm:$0xff] }
  0xcb   : > { %1610 = vmatmul.mubr.bf16.gmra.mrb[20].mxu0 %v5980_v50  ;;  %2339 = vmatmul.mubr.bf16.gmra.mrb[20].mxu1 %v5980_v50  ;;  %v6004_v61 = vpack.c.bf16 %v293_v44, %v287_v34  ;;  %v6006_v2 = vpack.c.bf16 %v306_v53, %v300_v49  ;;  %v329_v43 = vld [vmem:[%s5900_s26 + $0x3f0] sm:$0xff]  ;;  %v336_v44 = vld [vmem:[%s5900_s26 + $0x428] sm:$0xff]  ;;  %v335_v53 = vld [vmem:[%s5900_s26 + $0x420] sm:$0xff] }
  0xcc   : > { %1619 = vmatprep.mubr.bf16.mxu0 %v5982_v57  ;;  %2348 = vmatprep.mubr.bf16.mxu1 %v5982_v57 }
  0xcd   : > { %1791 = vmatpush1.bf16.msra.mxu0 %v1351_v60  ;;  %2520 = vmatpush1.bf16.msra.mxu1 %v1353_v62  ;;  %v1003_v60 = vld [vmem:[#allocation5 + $0xd30] sm:$0xff]  ;;  %v1382_v62 = vpack.c.bf16 %v1011_v48, %v1004_v46  ;;  %v342_v46 = vld [vmem:[%s5900_s26 + $0x458] sm:$0xff]  ;;  %v6040_v48 = vpack.c.bf16 %v329_v43, %v323_v42  ;;  %v420_v43 = vld [vmem:[%s5900_s26 + $0x6c8] sm:$0xff] }
  0xce   : > { %1792 = vmatprep.subr.bf16.mxu0 %v1359_v63  ;;  %2521 = vmatprep.subr.bf16.mxu1 %v1361_v3  ;;  %v1010_v63 = vld [vmem:[#allocation5 + $0xd68] sm:$0xff]  ;;  %v6042_v49 = vpack.c.bf16 %v342_v46, %v336_v44  ;;  %v413_v42 = vld [vmem:[%s5900_s26 + $0x690] sm:$0xff]  ;;  %v426_v44 = vld [vmem:[%s5900_s26 + $0x6f8] sm:$0xff] }
  0xcf   : > { %v1018_v3 = vld [vmem:[#allocation5 + $0xda8] sm:$0xff]  ;;  %v1381_v7 = vpack.c.bf16 %v1010_v63, %v1003_v60  ;;  %v347_v60 = vld [vmem:[%s5900_s26 + $0x480] sm:$0xff]  ;;  %v6124_v46 = vpack.c.bf16 %v413_v42, %v407_v39  ;;  %v218_v42 = vld [vmem:[%s5900_s26 + $0x78] sm:$0xff] }
  0xd0   : > { %v360_v63 = vld [vmem:[%s5900_s26 + $0x4e8] sm:$0xff] }
  0xd1   : > { %1793 = vmatpush1.bf16.msra.mxu0 %v1358_v13  ;;  %2522 = vmatpush1.bf16.msra.mxu1 %v1360_v15  ;;  %v1389_v13 = vpack.c.bf16 %v1025_v4, %v1018_v3  ;;  %v1024_v15 = vld [vmem:[#allocation5 + $0xdd8] sm:$0xff]  ;;  %v6066_v3 = vpack.c.bf16 %v366_v0, %v360_v63  ;;  %v359_v4 = vld [vmem:[%s5900_s26 + $0x4e0] sm:$0xff]  ;;  %7621 = vst [vmem:[#allocation12_spill] sm:$0xff] %v6124_v46  ;;  %v1038_v39 = vld [vmem:[#allocation5 + $0xe48] sm:$0xff] }
  0xd2   : > { %1794 = vmatprep.subr.bf16.mxu0 %v1366_v16  ;;  %2523 = vmatprep.subr.bf16.mxu1 %v1368_v26  ;;  %v1030_v16 = vld [vmem:[#allocation5 + $0xe08] sm:$0xff]  ;;  %v1039_v26 = vld [vmem:[#allocation5 + $0xe50] sm:$0xff]  ;;  %v1388_v31 = vpack.c.bf16 %v1024_v15, %v1017_v11  ;;  %v390_v15 = vld [vmem:[%s5900_s26 + $0x5d8] sm:$0xff] }
  0xd3   : > { %1620 = vmatmul.mubr.bf16.gmra.mrb[24].mxu0 %v5992_v24  ;;  %2349 = vmatmul.mubr.bf16.gmra.mrb[24].mxu1 %v5992_v24  ;;  %v1394_v32 = vpack.c.bf16 %v1037_v19, %v1030_v16  ;;  %v1396_v34 = vpack.c.bf16 %v1039_v26, %v1032_v23  ;;  %v377_v11 = vld [vmem:[%s5900_s26 + $0x570] sm:$0xff]  ;;  %v396_v26 = vld [vmem:[%s5900_s26 + $0x608] sm:$0xff]  ;;  %v431_v0 = vld [vmem:[%s5900_s26 + $0x720] sm:$0xff] }
  0xd4   : > { %1629 = vmatprep.mubr.bf16.mxu0 %v5994_v30  ;;  %2358 = vmatprep.mubr.bf16.mxu1 %v5994_v30  ;;  %v6088_v16 = vpack.c.bf16 %v377_v11, %v371_v10  ;;  %v389_v23 = vld [vmem:[%s5900_s26 + $0x5d0] sm:$0xff]  ;;  %v443_v11 = vld [vmem:[%s5900_s26 + $0x780] sm:$0xff] }
  0xd5   : > { %1795 = vmatpush1.bf16.msra.mxu0 %v1365_v33  ;;  %2524 = vmatpush1.bf16.msra.mxu1 %v1367_v35  ;;  %v6016_v33 = vpack.c.bf16 %v305_v20, %v299_v6  ;;  %v6018_v35 = vpack.c.bf16 %v318_v28, %v312_v27  ;;  %v372_v6 = vld [vmem:[%s5900_s26 + $0x548] sm:$0xff]  ;;  %v383_v20 = vld [vmem:[%s5900_s26 + $0x5a0] sm:$0xff]  ;;  %v402_v27 = vld [vmem:[%s5900_s26 + $0x638] sm:$0xff] }
  0xd6   : > { %1796 = vmatprep.subr.bf16.mxu0 %v1373_v36  ;;  %2525 = vmatprep.subr.bf16.mxu1 %v1375_v40  ;;  %v311_v36 = vld [vmem:[%s5900_s26 + $0x360] sm:$0xff]  ;;  %v6100_v28 = vpack.c.bf16 %v389_v23, %v383_v20  ;;  %v212_v20 = vld [vmem:[%s5900_s26 + $0x48] sm:$0xff] }
  0xd7   : > { %v6028_v40 = vpack.c.bf16 %v317_v37, %v311_v36  ;;  %v414_v36 = vld [vmem:[%s5900_s26 + $0x698] sm:$0xff] }
  0xd9   : > { %1797 = vmatpush1.bf16.msra.mxu0 %v1372_v54  ;;  %2526 = vmatpush1.bf16.msra.mxu1 %v1374_v55  ;;  %v341_v54 = vld [vmem:[%s5900_s26 + $0x450] sm:$0xff]  ;;  %v348_v55 = vld [vmem:[%s5900_s26 + $0x488] sm:$0xff] }
  0xda   : > { %1798 = vmatprep.subr.bf16.mxu0 %v1380_v56  ;;  %2527 = vmatprep.subr.bf16.mxu1 %v1382_v62  ;;  %v354_v56 = vld [vmem:[%s5900_s26 + $0x4b8] sm:$0xff]  ;;  %v6052_v58 = vpack.c.bf16 %v341_v54, %v335_v53  ;;  %v353_v62 = vld [vmem:[%s5900_s26 + $0x4b0] sm:$0xff]  ;;  %v6126_v53 = vpack.c.bf16 %v426_v44, %v420_v43  ;;  %v419_v54 = vld [vmem:[%s5900_s26 + $0x6c0] sm:$0xff] }
  0xdb   : > { %1630 = vmatmul.mubr.bf16.gmra.mrb[28].mxu0 %v6004_v61  ;;  %2359 = vmatmul.mubr.bf16.gmra.mrb[28].mxu1 %v6004_v61  ;;  %v6054_v59 = vpack.c.bf16 %v354_v56, %v348_v55  ;;  %v6064_v1 = vpack.c.bf16 %v353_v62, %v347_v60  ;;  %v425_v55 = vld [vmem:[%s5900_s26 + $0x6f0] sm:$0xff]  ;;  %v432_v56 = vld [vmem:[%s5900_s26 + $0x728] sm:$0xff]  ;;  %v438_v60 = vld [vmem:[%s5900_s26 + $0x758] sm:$0xff] }
  0xdc   : > { %1639 = vmatprep.mubr.bf16.mxu0 %v6006_v2  ;;  %2368 = vmatprep.mubr.bf16.mxu1 %v6006_v2  ;;  %7622 = vst [vmem:[#allocation13_spill] sm:$0xff] %v6126_v53  ;;  %v6136_v62 = vpack.c.bf16 %v425_v55, %v419_v54  ;;  %v6138_v63 = vpack.c.bf16 %v438_v60, %v432_v56  ;;  %v224_v43 = vld [vmem:[%s5900_s26 + $0xa8] sm:$0xff]  ;;  %v1044_v54 = vld [vmem:[#allocation5 + $0xe78] sm:$0xff]  ;;  %v1051_v55 = vld [vmem:[#allocation5 + $0xeb0] sm:$0xff] }
  0xdd   : > { %1799 = vmatpush1.bf16.msra.mxu0 %v1379_v5  ;;  %2528 = vmatpush1.bf16.msra.mxu1 %v1381_v7  ;;  %v365_v5 = vld [vmem:[%s5900_s26 + $0x510] sm:$0xff]  ;;  %v378_v7 = vld [vmem:[%s5900_s26 + $0x578] sm:$0xff]  ;;  %v1046_v60 = vld [vmem:[#allocation5 + $0xe88] sm:$0xff] }
  0xde   : > { %1800 = vmatprep.subr.bf16.mxu0 %v1387_v8  ;;  %2529 = vmatprep.subr.bf16.mxu1 %v1389_v13  ;;  %v6076_v8 = vpack.c.bf16 %v365_v5, %v359_v4  ;;  %v6078_v9 = vpack.c.bf16 %v378_v7, %v372_v6  ;;  %v384_v13 = vld [vmem:[%s5900_s26 + $0x5a8] sm:$0xff]  ;;  %7623 = vst [vmem:[#allocation14_spill] sm:$0xff] %v6136_v62  ;;  %7624 = vst [vmem:[#allocation15_spill] sm:$0xff] %v6138_v63  ;;  %v437_v4 = vld [vmem:[%s5900_s26 + $0x750] sm:$0xff] }
  0xdf   : > { %v6090_v19 = vpack.c.bf16 %v390_v15, %v384_v13  ;;  %v444_v5 = vld [vmem:[%s5900_s26 + $0x788] sm:$0xff]  ;;  %v450_v6 = vld [vmem:[%s5900_s26 + $0x7b8] sm:$0xff]  ;;  %v6148_v7 = vpack.c.bf16 %v437_v4, %v431_v0  ;;  %v449_v13 = vld [vmem:[%s5900_s26 + $0x7b0] sm:$0xff] }
  0xe0   : > { %v6150_v10 = vpack.c.bf16 %v450_v6, %v444_v5  ;;  %v206_v15 = vld [vmem:[%s5900_s26 + $0x18] sm:$0xff]  ;;  %v6160_v23 = vpack.c.bf16 %v449_v13, %v443_v11  ;;  %v1053_v0 = vld [vmem:[#allocation5 + $0xec0] sm:$0xff]  ;;  %v6174_v5 = vpack.c.bf16 %v224_v43, %v218_v42  ;;  %v1043_v6 = vld [vmem:[#allocation5 + $0xe70] sm:$0xff] }
  0xe1   : > { %1801 = vmatpush1.bf16.msra.mxu0 %v1386_v29  ;;  %2530 = vmatpush1.bf16.msra.mxu1 %v1388_v31  ;;  %v6102_v29 = vpack.c.bf16 %v402_v27, %v396_v26  ;;  %v395_v31 = vld [vmem:[%s5900_s26 + $0x600] sm:$0xff]  ;;  %7625 = vst [vmem:[#allocation16_spill] sm:$0xff] %v6148_v7  ;;  %v6162_v26 = vpack.c.bf16 %v212_v20, %v206_v15  ;;  %v205_v27 = vld [vmem:[%s5900_s26 + $0x10] sm:$0xff]  ;;  %v1050_v11 = vld [vmem:[#allocation5 + $0xea8] sm:$0xff] }
  0xe2   : > { %2013 = vmatprep.subr.bf16.mxu0 %v1394_v32  ;;  %2742 = vmatprep.subr.bf16.mxu1 %v1396_v34  ;;  %v401_v32 = vld [vmem:[%s5900_s26 + $0x630] sm:$0xff]  ;;  %v408_v34 = vld [vmem:[%s5900_s26 + $0x668] sm:$0xff]  ;;  %7626 = vst [vmem:[#allocation17_spill] sm:$0xff] %v6150_v10  ;;  %7627 = vst [vmem:[#allocation18_spill] sm:$0xff] %v6160_v23  ;;  %v1401_v15 = vpack.c.bf16 %v1051_v55, %v1044_v54  ;;  %v1400_v42 = vpack.c.bf16 %v1050_v11, %v1043_v6 }
  0xe3   : > { %1640 = vmatmul.mubr.bf16.gmra.mrb[32].mxu0 %v6016_v33  ;;  %2369 = vmatmul.mubr.bf16.gmra.mrb[32].mxu1 %v6016_v33  ;;  %v6112_v37 = vpack.c.bf16 %v401_v32, %v395_v31  ;;  %v6114_v38 = vpack.c.bf16 %v414_v36, %v408_v34  ;;  %7628 = vst [vmem:[#allocation19_spill] sm:$0xff] %v6162_v26  ;;  %v211_v31 = vld [vmem:[%s5900_s26 + $0x40] sm:$0xff]  ;;  %v1036_v34 = vld [vmem:[#allocation5 + $0xe38] sm:$0xff]  ;;  %v1031_v36 = vld [vmem:[#allocation5 + $0xe10] sm:$0xff] }
  0xe4   : > { %1649 = vmatprep.mubr.bf16.mxu0 %v6018_v35  ;;  %2378 = vmatprep.mubr.bf16.mxu1 %v6018_v35  ;;  %v1029_v32 = vld [vmem:[#allocation5 + $0xe00] sm:$0xff]  ;;  %v6172_v44 = vpack.c.bf16 %v211_v31, %v205_v27  ;;  %v1395_v4 = vpack.c.bf16 %v1038_v39, %v1031_v36  ;;  %7630 = vst [vmem:[#allocation21_spill] sm:$0xff] %v6174_v5  ;;  %v1052_v20 = vld [vmem:[#allocation5 + $0xeb8] sm:$0xff]  ;;  %v217_v36 = vld [vmem:[%s5900_s26 + $0x70] sm:$0xff] }
  0xe5   : > { %7620 = vst [vmem:[#allocation11_spill] sm:$0xff] %v6114_v38  ;;  %v1393_v56 = vpack.c.bf16 %v1036_v34, %v1029_v32  ;;  %v1045_v13 = vld [vmem:[#allocation5 + $0xe80] sm:$0xff]  ;;  %v1403_v31 = vpack.c.bf16 %v1053_v0, %v1046_v60  ;;  %v1060_v32 = vld [vmem:[#allocation5 + $0xef8] sm:$0xff]  ;;  %v1067_v34 = vld [vmem:[#allocation5 + $0xf30] sm:$0xff] }
  0xe6   : > { %7629 = vst [vmem:[#allocation20_spill] sm:$0xff] %v6172_v44  ;;  %v1065_v27 = vld [vmem:[#allocation5 + $0xf20] sm:$0xff]  ;;  %v230_v43 = vld [vmem:[%s5900_s26 + $0xd8] sm:$0xff]  ;;  %v236_v54 = vld [vmem:[%s5900_s26 + $0x108] sm:$0xff]  ;;  %v1402_v55 = vpack.c.bf16 %v1052_v20, %v1045_v13  ;;  %v1410_v0 = vpack.c.bf16 %v1067_v34, %v1060_v32 }
  0xe7   : > { %v223_v39 = vld [vmem:[%s5900_s26 + $0xa0] sm:$0xff]  ;;  %v1064_v60 = vld [vmem:[#allocation5 + $0xf18] sm:$0xff]  ;;  %v6186_v11 = vpack.c.bf16 %v236_v54, %v230_v43  ;;  %v1071_v32 = vld [vmem:[#allocation5 + $0xf50] sm:$0xff] }
  0xe8   : > { %v1072_v6 = vld [vmem:[#allocation5 + $0xf58] sm:$0xff]  ;;  %v1081_v13 = vld [vmem:[#allocation5 + $0xfa0] sm:$0xff]  ;;  %v1095_v54 = vld [vmem:[#allocation5 + $0x1010] sm:$0xff] }
  0xe9   : > { %7632 = vst [vmem:[#allocation23_spill] sm:$0xff] %v6186_v11  ;;  %v1073_v34 = vld [vmem:[#allocation5 + $0xf60] sm:$0xff] }
  0xea   : > { %v1093_v43 = vld [vmem:[#allocation5 + $0x1000] sm:$0xff] }
  0xeb   : > { %1650 = vmatmul.mubr.bf16.gmra.mrb[36].mxu0 %v6028_v40  ;;  %2379 = vmatmul.mubr.bf16.gmra.mrb[36].mxu1 %v6028_v40 }
  0xec   : > { %1659 = vmatprep.mubr.bf16.mxu0 %v6030_v41  ;;  %2388 = vmatprep.mubr.bf16.mxu1 %v6030_v41 }
  0xf3   : > { %1660 = vmatmul.mubr.bf16.gmra.mrb[40].mxu0 %v6040_v48  ;;  %2389 = vmatmul.mubr.bf16.gmra.mrb[40].mxu1 %v6040_v48 }
  0xf4   : > { %1669 = vmatprep.mubr.bf16.mxu0 %v6042_v49  ;;  %2398 = vmatprep.mubr.bf16.mxu1 %v6042_v49 }
  0xfb   : > { %1670 = vmatmul.mubr.bf16.gmra.mrb[44].mxu0 %v6052_v58  ;;  %2399 = vmatmul.mubr.bf16.gmra.mrb[44].mxu1 %v6052_v58 }
  0xfc   : > { %1679 = vmatprep.mubr.bf16.mxu0 %v6054_v59  ;;  %2408 = vmatprep.mubr.bf16.mxu1 %v6054_v59 }
 0x103   : > { %1680 = vmatmul.mubr.bf16.gmra.mrb[48].mxu0 %v6064_v1  ;;  %2409 = vmatmul.mubr.bf16.gmra.mrb[48].mxu1 %v6064_v1 }
 0x104   : > { %1689 = vmatprep.mubr.bf16.mxu0 %v6066_v3  ;;  %2418 = vmatprep.mubr.bf16.mxu1 %v6066_v3 }
 0x10b   : > { %1690 = vmatmul.mubr.bf16.gmra.mrb[52].mxu0 %v6076_v8  ;;  %2419 = vmatmul.mubr.bf16.gmra.mrb[52].mxu1 %v6076_v8 }
 0x10c   : > { %1699 = vmatprep.mubr.bf16.mxu0 %v6078_v9  ;;  %2428 = vmatprep.mubr.bf16.mxu1 %v6078_v9 }
 0x113   : > { %1700 = vmatmul.mubr.bf16.gmra.mrb[56].mxu0 %v6088_v16  ;;  %2429 = vmatmul.mubr.bf16.gmra.mrb[56].mxu1 %v6088_v16 }
 0x114   : > { %1709 = vmatprep.mubr.bf16.mxu0 %v6090_v19  ;;  %2438 = vmatprep.mubr.bf16.mxu1 %v6090_v19 }
 0x11b   : > { %1710 = vmatmul.mubr.bf16.gmra.mrb[60].mxu0 %v6100_v28  ;;  %2439 = vmatmul.mubr.bf16.gmra.mrb[60].mxu1 %v6100_v28 }
 0x11c   : > { %1719 = vmatprep.mubr.bf16.mxu0 %v6102_v29  ;;  %2448 = vmatprep.mubr.bf16.mxu1 %v6102_v29 }
 0x123   : > { %1720 = vmatmul.mubr.bf16.gmra.mrb[64].mxu0 %v6112_v37  ;;  %2449 = vmatmul.mubr.bf16.gmra.mrb[64].mxu1 %v6112_v37 }
 0x124   : > { %1729 = vmatprep.mubr.bf16.mxu0 %v6114_v38  ;;  %2458 = vmatprep.mubr.bf16.mxu1 %v6114_v38  ;;  %v1165_v38 = vld [vmem:[#allocation5 + $0x1240] sm:$0xff] }
 0x12b   : > { %1730 = vmatmul.mubr.bf16.gmra.mrb[68].mxu0 %v6124_v46  ;;  %2459 = vmatmul.mubr.bf16.gmra.mrb[68].mxu1 %v6124_v46  ;;  %v1102_v46 = vld [vmem:[#allocation5 + $0x1048] sm:$0xff] }
 0x12c   : > { %1739 = vmatprep.mubr.bf16.mxu0 %v6126_v53  ;;  %2468 = vmatprep.mubr.bf16.mxu1 %v6126_v53  ;;  %v1107_v53 = vld [vmem:[#allocation5 + $0x1070] sm:$0xff] }
 0x133   : > { %1740 = vmatmul.mubr.bf16.gmra.mrb[72].mxu0 %v6136_v62  ;;  %2469 = vmatmul.mubr.bf16.gmra.mrb[72].mxu1 %v6136_v62  ;;  %v1100_v62 = vld [vmem:[#allocation5 + $0x1038] sm:$0xff] }
 0x134   : > { %1749 = vmatprep.mubr.bf16.mxu0 %v6138_v63  ;;  %2478 = vmatprep.mubr.bf16.mxu1 %v6138_v63  ;;  %v1074_v63 = vld [vmem:[#allocation5 + $0xf68] sm:$0xff] }
 0x13b   : > { %1750 = vmatmul.mubr.bf16.gmra.mrb[76].mxu0 %v6148_v7  ;;  %2479 = vmatmul.mubr.bf16.gmra.mrb[76].mxu1 %v6148_v7  ;;  %v1059_v7 = vld [vmem:[#allocation5 + $0xef0] sm:$0xff] }
 0x13c   : > { %1759 = vmatprep.mubr.bf16.mxu0 %v6150_v10  ;;  %2488 = vmatprep.mubr.bf16.mxu1 %v6150_v10  ;;  %v1057_v10 = vld [vmem:[#allocation5 + $0xee0] sm:$0xff] }
 0x143   : > { %1760 = vmatmul.mubr.bf16.gmra.mrb[80].mxu0 %v6160_v23  ;;  %2489 = vmatmul.mubr.bf16.gmra.mrb[80].mxu1 %v6160_v23 }
 0x144   : > { %1802 = vmatprep.mubr.bf16.mxu0 %v6162_v26  ;;  %2531 = vmatprep.mubr.bf16.mxu1 %v6162_v26  ;;  %v1058_v26 = vld [vmem:[#allocation5 + $0xee8] sm:$0xff] }
 0x145   : > { %v1408_v23 = vpack.c.bf16 %v1065_v27, %v1058_v26  ;;  %v1407_v26 = vpack.c.bf16 %v1064_v60, %v1057_v10  ;;  %v235_v10 = vld [vmem:[%s5900_s26 + $0x100] sm:$0xff] }
 0x14b   : > { %1803 = vmatmul.mubr.bf16.vlgmr.msra.gmra.mrb[0].mxu0 %v6172_v44  ;;  %2532 = vmatmul.mubr.bf16.vlgmr.msra.gmra.mrb[0].mxu1 %v6172_v44  ;;  %v6184_v44 = vpack.c.bf16 %v223_v39, %v217_v36  ;;  %v1417_v36 = vpack.c.bf16 %v1081_v13, %v1074_v63  ;;  %v1080_v39 = vld [vmem:[#allocation5 + $0xf98] sm:$0xff] }
 0x14c   : > { %2014 = vmatpush1.bf16.msra.mxu0 %v1393_v56  ;;  %2743 = vmatpush1.bf16.msra.mxu1 %v1395_v4  ;;  %v1066_v56 = vld [vmem:[#allocation5 + $0xf28] sm:$0xff]  ;;  %v1079_v4 = vld [vmem:[#allocation5 + $0xf90] sm:$0xff] }
 0x14d   : > { %1812 = vmatprep.mubr.bf16.mxu0 %v6174_v5  ;;  %2541 = vmatprep.mubr.bf16.mxu1 %v6174_v5  ;;  %7631 = vst [vmem:[#allocation22_spill] sm:$0xff] %v6184_v44  ;;  %v1409_v20 = vpack.c.bf16 %v1066_v56, %v1059_v7  ;;  %v1415_v27 = vpack.c.bf16 %v1079_v4, %v1072_v6  ;;  %v242_v7 = vld [vmem:[%s5900_s26 + $0x138] sm:$0xff]  ;;  %v1085_v56 = vld [vmem:[#allocation5 + $0xfc0] sm:$0xff]  ;;  %v1087_v4 = vld [vmem:[#allocation5 + $0xfd0] sm:$0xff] }
 0x14e   : > { %2015 = vmatprep.subr.bf16.mxu0 %v1401_v15  ;;  %2744 = vmatprep.subr.bf16.mxu1 %v1403_v31  ;;  %v229_v15 = vld [vmem:[%s5900_s26 + $0xd0] sm:$0xff]  ;;  %v1078_v31 = vld [vmem:[#allocation5 + $0xf88] sm:$0xff]  ;;  %v1092_v6 = vld [vmem:[#allocation5 + $0xff8] sm:$0xff] }
 0x14f   : > { %v1414_v60 = vpack.c.bf16 %v1078_v31, %v1071_v32  ;;  %v6196_v13 = vpack.c.bf16 %v235_v10, %v229_v15  ;;  %v1094_v5 = vld [vmem:[#allocation5 + $0x1008] sm:$0xff]  ;;  %v1429_v31 = vpack.c.bf16 %v1107_v53, %v1100_v62  ;;  %v1099_v15 = vld [vmem:[#allocation5 + $0x1030] sm:$0xff]  ;;  %v1121_v10 = vld [vmem:[#allocation5 + $0x10e0] sm:$0xff] }
 0x150   : > { %2016 = vmatpush1.bf16.msra.mxu0 %v1400_v42  ;;  %2745 = vmatpush1.bf16.msra.mxu1 %v1402_v55  ;;  %v1086_v42 = vld [vmem:[#allocation5 + $0xfc8] sm:$0xff]  ;;  %v1423_v32 = vpack.c.bf16 %v1094_v5, %v1087_v4  ;;  %v1123_v5 = vld [vmem:[#allocation5 + $0x10f0] sm:$0xff]  ;;  %v254_v53 = vld [vmem:[%s5900_s26 + $0x198] sm:$0xff] }
 0x151   : > { %2017 = vmatprep.subr.bf16.mxu0 %v1408_v23  ;;  %2746 = vmatprep.subr.bf16.mxu1 %v1410_v0  ;;  %v1088_v23 = vld [vmem:[#allocation5 + $0xfd8] sm:$0xff]  ;;  %v248_v55 = vld [vmem:[%s5900_s26 + $0x168] sm:$0xff]  ;;  %v1416_v0 = vpack.c.bf16 %v1080_v39, %v1073_v34  ;;  %v1422_v63 = vpack.c.bf16 %v1093_v43, %v1086_v42  ;;  %7633 = vst [vmem:[#allocation24_spill] sm:$0xff] %v6196_v13 }
 0x152   : > { %v1106_v34 = vld [vmem:[#allocation5 + $0x1068] sm:$0xff]  ;;  %v1108_v42 = vld [vmem:[#allocation5 + $0x1078] sm:$0xff] }
 0x153   : > { %1813 = vmatmul.mubr.bf16.gmra.mrb[4].mxu0 %v6184_v44  ;;  %2542 = vmatmul.mubr.bf16.gmra.mrb[4].mxu1 %v6184_v44  ;;  %v1424_v44 = vpack.c.bf16 %v1095_v54, %v1088_v23  ;;  %v1114_v43 = vld [vmem:[#allocation5 + $0x10a8] sm:$0xff]  ;;  %v247_v23 = vld [vmem:[%s5900_s26 + $0x160] sm:$0xff]  ;;  %v1116_v54 = vld [vmem:[#allocation5 + $0x10b8] sm:$0xff] }
 0x154   : > { %1822 = vmatprep.mubr.bf16.mxu0 %v6186_v11  ;;  %2551 = vmatprep.mubr.bf16.mxu1 %v6186_v11  ;;  %v6198_v11 = vpack.c.bf16 %v248_v55, %v242_v7  ;;  %v260_v62 = vld [vmem:[%s5900_s26 + $0x1c8] sm:$0xff]  ;;  %v1428_v7 = vpack.c.bf16 %v1106_v34, %v1099_v15  ;;  %v1113_v55 = vld [vmem:[#allocation5 + $0x10a0] sm:$0xff]  ;;  %v1128_v4 = vld [vmem:[#allocation5 + $0x1118] sm:$0xff] }
 0x155   : > { %2018 = vmatpush1.bf16.msra.mxu0 %v1407_v26  ;;  %2747 = vmatpush1.bf16.msra.mxu1 %v1409_v20  ;;  %v1109_v26 = vld [vmem:[#allocation5 + $0x1080] sm:$0xff]  ;;  %v1421_v20 = vpack.c.bf16 %v1092_v6, %v1085_v56  ;;  %v1438_v56 = vpack.c.bf16 %v1123_v5, %v1116_v54  ;;  %v1122_v6 = vld [vmem:[#allocation5 + $0x10e8] sm:$0xff]  ;;  %v1144_v5 = vld [vmem:[#allocation5 + $0x1198] sm:$0xff] }
 0x156   : > { %2019 = vmatprep.subr.bf16.mxu0 %v1415_v27  ;;  %2748 = vmatprep.subr.bf16.mxu1 %v1417_v36  ;;  %7634 = vst [vmem:[#allocation25_spill] sm:$0xff] %v6198_v11  ;;  %v241_v27 = vld [vmem:[%s5900_s26 + $0x130] sm:$0xff]  ;;  %v1101_v36 = vld [vmem:[#allocation5 + $0x1040] sm:$0xff]  ;;  %v1431_v39 = vpack.c.bf16 %v1109_v26, %v1102_v46  ;;  %v1436_v46 = vpack.c.bf16 %v1121_v10, %v1114_v43  ;;  %v1136_v43 = vld [vmem:[#allocation5 + $0x1158] sm:$0xff] }
 0x157   : > { %v1135_v26 = vld [vmem:[#allocation5 + $0x1150] sm:$0xff]  ;;  %v1142_v10 = vld [vmem:[#allocation5 + $0x1188] sm:$0xff]  ;;  %v259_v54 = vld [vmem:[%s5900_s26 + $0x1c0] sm:$0xff] }
 0x158   : > { %v1443_v34 = vpack.c.bf16 %v1135_v26, %v1128_v4  ;;  %v1150_v4 = vld [vmem:[#allocation5 + $0x11c8] sm:$0xff]  ;;  %v1156_v26 = vld [vmem:[#allocation5 + $0x11f8] sm:$0xff] }
 0x159   : > { %2020 = vmatpush1.bf16.msra.mxu0 %v1414_v60  ;;  %2749 = vmatpush1.bf16.msra.mxu1 %v1416_v0  ;;  %v1120_v60 = vld [vmem:[#allocation5 + $0x10d8] sm:$0xff]  ;;  %v1115_v0 = vld [vmem:[#allocation5 + $0x10b0] sm:$0xff] }
 0x15a   : > { %2021 = vmatprep.subr.bf16.mxu0 %v1422_v63  ;;  %2750 = vmatprep.subr.bf16.mxu1 %v1424_v44  ;;  %v1430_v44 = vpack.c.bf16 %v1108_v42, %v1101_v36  ;;  %v6208_v63 = vpack.c.bf16 %v247_v23, %v241_v27  ;;  %v1437_v15 = vpack.c.bf16 %v1122_v6, %v1115_v0  ;;  %v1127_v27 = vld [vmem:[#allocation5 + $0x1110] sm:$0xff]  ;;  %v1134_v36 = vld [vmem:[#allocation5 + $0x1148] sm:$0xff]  ;;  %v1149_v23 = vld [vmem:[#allocation5 + $0x11c0] sm:$0xff] }
 0x15b   : > { %1823 = vmatmul.mubr.bf16.gmra.mrb[8].mxu0 %v6196_v13  ;;  %2552 = vmatmul.mubr.bf16.gmra.mrb[8].mxu1 %v6196_v13  ;;  %v1130_v13 = vld [vmem:[#allocation5 + $0x1128] sm:$0xff]  ;;  %v1143_v0 = vld [vmem:[#allocation5 + $0x1190] sm:$0xff] }
 0x15c   : > { %1832 = vmatprep.mubr.bf16.mxu0 %v6198_v11  ;;  %2561 = vmatprep.mubr.bf16.mxu1 %v6198_v11  ;;  %7635 = vst [vmem:[#allocation26_spill] sm:$0xff] %v6208_v63  ;;  %v6210_v11 = vpack.c.bf16 %v260_v62, %v254_v53  ;;  %v1151_v53 = vld [vmem:[#allocation5 + $0x11d0] sm:$0xff]  ;;  %v266_v62 = vld [vmem:[%s5900_s26 + $0x1f8] sm:$0xff] }
 0x15d   : > { %2022 = vmatpush1.bf16.msra.mxu0 %v1421_v20  ;;  %2751 = vmatpush1.bf16.msra.mxu1 %v1423_v32  ;;  %v1137_v20 = vld [vmem:[#allocation5 + $0x1160] sm:$0xff]  ;;  %v1435_v32 = vpack.c.bf16 %v1120_v60, %v1113_v55  ;;  %v1148_v60 = vld [vmem:[#allocation5 + $0x11b8] sm:$0xff]  ;;  %v1452_v6 = vpack.c.bf16 %v1151_v53, %v1144_v5 }
 0x15e   : > { %2023 = vmatprep.subr.bf16.mxu0 %v1429_v31  ;;  %2752 = vmatprep.subr.bf16.mxu1 %v1431_v39  ;;  %7636 = vst [vmem:[#allocation27_spill] sm:$0xff] %v6210_v11  ;;  %v253_v31 = vld [vmem:[%s5900_s26 + $0x190] sm:$0xff]  ;;  %v1129_v39 = vld [vmem:[#allocation5 + $0x1120] sm:$0xff]  ;;  %v1445_v42 = vpack.c.bf16 %v1137_v20, %v1130_v13  ;;  %v1450_v13 = vpack.c.bf16 %v1149_v23, %v1142_v10  ;;  %v278_v23 = vld [vmem:[%s5900_s26 + $0x258] sm:$0xff] }
 0x15f   : > { %v1141_v55 = vld [vmem:[#allocation5 + $0x1180] sm:$0xff]  ;;  %v1163_v20 = vld [vmem:[#allocation5 + $0x1230] sm:$0xff] }
 0x160   : > { %v271_v10 = vld [vmem:[%s5900_s26 + $0x220] sm:$0xff] }
 0x161   : > { %2024 = vmatpush1.bf16.msra.mxu0 %v1428_v7  ;;  %2753 = vmatpush1.bf16.msra.mxu1 %v1430_v44  ;;  %v272_v7 = vld [vmem:[%s5900_s26 + $0x228] sm:$0xff]  ;;  %v1442_v44 = vpack.c.bf16 %v1134_v36, %v1127_v27 }
 0x162   : > { %2025 = vmatprep.subr.bf16.mxu0 %v1436_v46  ;;  %2754 = vmatprep.subr.bf16.mxu1 %v1438_v56  ;;  %v1444_v46 = vpack.c.bf16 %v1136_v43, %v1129_v39  ;;  %v6220_v56 = vpack.c.bf16 %v259_v54, %v253_v31  ;;  %v1457_v31 = vpack.c.bf16 %v1163_v20, %v1156_v26  ;;  %v1162_v27 = vld [vmem:[#allocation5 + $0x1228] sm:$0xff]  ;;  %v1157_v39 = vld [vmem:[#allocation5 + $0x1200] sm:$0xff]  ;;  %v265_v43 = vld [vmem:[%s5900_s26 + $0x1f0] sm:$0xff] }
 0x163   : > { %1833 = vmatmul.mubr.bf16.gmra.mrb[12].mxu0 %v6208_v63  ;;  %2562 = vmatmul.mubr.bf16.gmra.mrb[12].mxu1 %v6208_v63  ;;  %v6222_v63 = vpack.c.bf16 %v272_v7, %v266_v62  ;;  %v284_v54 = vld [vmem:[%s5900_s26 + $0x288] sm:$0xff]  ;;  %v277_v62 = vld [vmem:[%s5900_s26 + $0x250] sm:$0xff]  ;;  %v283_v7 = vld [vmem:[%s5900_s26 + $0x280] sm:$0xff] }
 0x164   : > { %1842 = vmatprep.mubr.bf16.mxu0 %v6210_v11  ;;  %2571 = vmatprep.mubr.bf16.mxu1 %v6210_v11  ;;  %v1158_v11 = vld [vmem:[#allocation5 + $0x1208] sm:$0xff]  ;;  %v6234_v53 = vpack.c.bf16 %v284_v54, %v278_v23  ;;  %v289_v26 = vld [vmem:[%s5900_s26 + $0x2b0] sm:$0xff]  ;;  %v295_v20 = vld [vmem:[%s5900_s26 + $0x2e0] sm:$0xff] }
 0x165   : > { %2026 = vmatpush1.bf16.msra.mxu0 %v1435_v32  ;;  %2755 = vmatpush1.bf16.msra.mxu1 %v1437_v15  ;;  %v1449_v32 = vpack.c.bf16 %v1148_v60, %v1141_v55  ;;  %v1451_v15 = vpack.c.bf16 %v1150_v4, %v1143_v0  ;;  %v1459_v36 = vpack.c.bf16 %v1165_v38, %v1158_v11  ;;  %v296_v55 = vld [vmem:[%s5900_s26 + $0x2e8] sm:$0xff]  ;;  %v7480_v0 = vmov 0   ;;  %v313_v23 = vld [vmem:[%s5900_s26 + $0x370] sm:$0xff]  ;;  %v319_v54 = vld [vmem:[%s5900_s26 + $0x3a0] sm:$0xff] }
 0x166   : > { %2027 = vmatprep.subr.bf16.mxu0 %v1443_v34  ;;  %2756 = vmatprep.subr.bf16.mxu1 %v1445_v42  ;;  %v1155_v34 = vld [vmem:[#allocation5 + $0x11f0] sm:$0xff]  ;;  %v1164_v42 = vld [vmem:[#allocation5 + $0x1238] sm:$0xff]  ;;  %v6232_v11 = vpack.c.bf16 %v271_v10, %v265_v43 }
 0x167   : > { %v1456_v5 = vpack.c.bf16 %v1162_v27, %v1155_v34  ;;  %v1458_v38 = vpack.c.bf16 %v1164_v42, %v1157_v39  ;;  %v301_v27 = vld [vmem:[%s5900_s26 + $0x310] sm:$0xff]  ;;  %v314_v39 = vld [vmem:[%s5900_s26 + $0x378] sm:$0xff]  ;;  %v320_v42 = vld [vmem:[%s5900_s26 + $0x3a8] sm:$0xff] }
 0x168   : > { %v6271_v10 = vpack.c.bf16 %v320_v42, %v314_v39  ;;  %v349_v42 = vld [vmem:[%s5900_s26 + $0x490] sm:$0xff] }
 0x169   : > { %2028 = vmatpush1.bf16.msra.mxu0 %v1442_v44  ;;  %2757 = vmatpush1.bf16.msra.mxu1 %v1444_v46  ;;  %v586_v44 = vld [vmem:[#allocation5 + $0x28] sm:$0xff]  ;;  %v593_v46 = vld [vmem:[#allocation5 + $0x60] sm:$0xff] }
 0x16a   : > { %2029 = vmatprep.subr.bf16.mxu0 %v1450_v13  ;;  %2758 = vmatprep.subr.bf16.mxu1 %v1452_v6  ;;  %v290_v13 = vld [vmem:[%s5900_s26 + $0x2b8] sm:$0xff]  ;;  %v1174_v60 = vpack.c.bf16 %v593_v46, %v586_v44  ;;  %v6245_v6 = vpack.c.bf16 %v283_v7, %v277_v62  ;;  %7642 = vst [vmem:[#allocation33_spill] sm:$0xff] %v6271_v10  ;;  %v325_v44 = vld [vmem:[%s5900_s26 + $0x3d0] sm:$0xff]  ;;  %v331_v46 = vld [vmem:[%s5900_s26 + $0x400] sm:$0xff] }
 0x16b   : > { %1843 = vmatmul.mubr.bf16.gmra.mrb[16].mxu0 %v6220_v56  ;;  %2572 = vmatmul.mubr.bf16.gmra.mrb[16].mxu1 %v6220_v56  ;;  %v6247_v4 = vpack.c.bf16 %v296_v55, %v290_v13  ;;  %v6281_v62 = vpack.c.bf16 %v319_v54, %v313_v23  ;;  %v338_v13 = vld [vmem:[%s5900_s26 + $0x438] sm:$0xff]  ;;  %v344_v55 = vld [vmem:[%s5900_s26 + $0x468] sm:$0xff]  ;;  %v355_v23 = vld [vmem:[%s5900_s26 + $0x4c0] sm:$0xff] }
 0x16c   : > { %1852 = vmatprep.mubr.bf16.mxu0 %v6222_v63  ;;  %2581 = vmatprep.mubr.bf16.mxu1 %v6222_v63  ;;  %7637 = vst [vmem:[#allocation28_spill] sm:$0xff] %v6245_v6  ;;  %v362_v54 = vld [vmem:[%s5900_s26 + $0x4f8] sm:$0xff] }
 0x16d   : > { %2030 = vmatpush1.bf16.msra.mxu0 %v1449_v32  ;;  %2759 = vmatpush1.bf16.msra.mxu1 %v1451_v15  ;;  %7638 = vst [vmem:[#allocation29_spill] sm:$0xff] %v6247_v4  ;;  %v302_v32 = vld [vmem:[%s5900_s26 + $0x318] sm:$0xff]  ;;  %v308_v15 = vld [vmem:[%s5900_s26 + $0x348] sm:$0xff]  ;;  %7643 = vst [vmem:[#allocation34_spill] sm:$0xff] %v6281_v62 }
 0x16e   : > { %2031 = vmatprep.subr.bf16.mxu0 %v1457_v31  ;;  %2760 = vmatprep.subr.bf16.mxu1 %v1459_v36  ;;  %v6257_v31 = vpack.c.bf16 %v295_v20, %v289_v26  ;;  %v6259_v34 = vpack.c.bf16 %v308_v15, %v302_v32  ;;  %v307_v36 = vld [vmem:[%s5900_s26 + $0x340] sm:$0xff]  ;;  %v6295_v26 = vpack.c.bf16 %v344_v55, %v338_v13  ;;  %v337_v20 = vld [vmem:[%s5900_s26 + $0x430] sm:$0xff]  ;;  %v350_v15 = vld [vmem:[%s5900_s26 + $0x498] sm:$0xff] }
 0x16f   : > { %v6269_v43 = vpack.c.bf16 %v307_v36, %v301_v27  ;;  %v343_v32 = vld [vmem:[%s5900_s26 + $0x460] sm:$0xff]  ;;  %v356_v27 = vld [vmem:[%s5900_s26 + $0x4c8] sm:$0xff]  ;;  %v374_v55 = vld [vmem:[%s5900_s26 + $0x558] sm:$0xff] }
 0x170   : > { %7639 = vst [vmem:[#allocation30_spill] sm:$0xff] %v6257_v31  ;;  %7640 = vst [vmem:[#allocation31_spill] sm:$0xff] %v6259_v34  ;;  %v6305_v36 = vpack.c.bf16 %v343_v32, %v337_v20  ;;  %v6307_v39 = vpack.c.bf16 %v356_v27, %v350_v15  ;;  %v367_v13 = vld [vmem:[%s5900_s26 + $0x520] sm:$0xff]  ;;  %v380_v20 = vld [vmem:[%s5900_s26 + $0x588] sm:$0xff] }
 0x171   : > { %2032 = vmatpush1.bf16.msra.mxu0 %v1456_v5  ;;  %2761 = vmatpush1.bf16.msra.mxu1 %v1458_v38  ;;  %7641 = vst [vmem:[#allocation32_spill] sm:$0xff] %v6269_v43  ;;  %v326_v5 = vld [vmem:[%s5900_s26 + $0x3d8] sm:$0xff]  ;;  %v332_v38 = vld [vmem:[%s5900_s26 + $0x408] sm:$0xff]  ;;  %7646 = vst [vmem:[#allocation37_spill] sm:$0xff] %v6295_v26  ;;  %v6331_v15 = vpack.c.bf16 %v380_v20, %v374_v55 }
 0x172   : > { %3714 = vmatprep.subr.bf16.mxu1 %v7480_v0  ;;  %2985 = vmatprep.subr.bf16.mxu0 %v1174_v60  ;;  %v6283_v7 = vpack.c.bf16 %v332_v38, %v326_v5  ;;  %v6293_v60 = vpack.c.bf16 %v331_v46, %v325_v44  ;;  %7647 = vst [vmem:[#allocation38_spill] sm:$0xff] %v6305_v36  ;;  %7648 = vst [vmem:[#allocation39_spill] sm:$0xff] %v6307_v39  ;;  %v368_v5 = vld [vmem:[%s5900_s26 + $0x528] sm:$0xff]  ;;  %v361_v46 = vld [vmem:[%s5900_s26 + $0x4f0] sm:$0xff] }
 0x173   : > { %1853 = vmatmul.mubr.bf16.gmra.mrb[20].mxu0 %v6232_v11  ;;  %2582 = vmatmul.mubr.bf16.gmra.mrb[20].mxu1 %v6232_v11  ;;  %v6317_v38 = vpack.c.bf16 %v355_v23, %v349_v42  ;;  %v6319_v44 = vpack.c.bf16 %v368_v5, %v362_v54  ;;  %v6329_v32 = vpack.c.bf16 %v367_v13, %v361_v46  ;;  %v373_v27 = vld [vmem:[%s5900_s26 + $0x550] sm:$0xff]  ;;  %v379_v42 = vld [vmem:[%s5900_s26 + $0x580] sm:$0xff]  ;;  %v386_v23 = vld [vmem:[%s5900_s26 + $0x5b8] sm:$0xff] }
 0x174   : > { %1862 = vmatprep.mubr.bf16.mxu0 %v6234_v53  ;;  %2591 = vmatprep.mubr.bf16.mxu1 %v6234_v53  ;;  %7644 = vst [vmem:[#allocation35_spill] sm:$0xff] %v6283_v7  ;;  %7645 = vst [vmem:[#allocation36_spill] sm:$0xff] %v6293_v60  ;;  %v392_v54 = vld [vmem:[%s5900_s26 + $0x5e8] sm:$0xff]  ;;  %v6341_v5 = vpack.c.bf16 %v379_v42, %v373_v27  ;;  %v385_v13 = vld [vmem:[%s5900_s26 + $0x5b0] sm:$0xff] }
 0x175   : > { %7649 = vst [vmem:[#allocation40_spill] sm:$0xff] %v6317_v38  ;;  %7650 = vst [vmem:[#allocation41_spill] sm:$0xff] %v6319_v44  ;;  %v6343_v46 = vpack.c.bf16 %v392_v54, %v386_v23  ;;  %v391_v55 = vld [vmem:[%s5900_s26 + $0x5e0] sm:$0xff]  ;;  %v398_v20 = vld [vmem:[%s5900_s26 + $0x618] sm:$0xff] }
 0x176   : > { %7651 = vst [vmem:[#allocation42_spill] sm:$0xff] %v6329_v32  ;;  %7652 = vst [vmem:[#allocation43_spill] sm:$0xff] %v6331_v15  ;;  %v404_v0 = vld [vmem:[%s5900_s26 + $0x648] sm:$0xff]  ;;  %v6353_v27 = vpack.c.bf16 %v391_v55, %v385_v13  ;;  %v397_v23 = vld [vmem:[%s5900_s26 + $0x610] sm:$0xff] }
 0x177   : > { %7653 = vst [vmem:[#allocation44_spill] sm:$0xff] %v6341_v5  ;;  %7654 = vst [vmem:[#allocation45_spill] sm:$0xff] %v6343_v46  ;;  %v6355_v42 = vpack.c.bf16 %v404_v0, %v398_v20  ;;  %v403_v54 = vld [vmem:[%s5900_s26 + $0x640] sm:$0xff]  ;;  %v409_v55 = vld [vmem:[%s5900_s26 + $0x670] sm:$0xff] }
 0x178   : > { %7655 = vst [vmem:[#allocation46_spill] sm:$0xff] %v6353_v27  ;;  %v6365_v13 = vpack.c.bf16 %v403_v54, %v397_v23  ;;  %v415_v20 = vld [vmem:[%s5900_s26 + $0x6a0] sm:$0xff] }
 0x179   : > { %7656 = vst [vmem:[#allocation47_spill] sm:$0xff] %v6355_v42  ;;  %v6377_v23 = vpack.c.bf16 %v415_v20, %v409_v55  ;;  %v427_v54 = vld [vmem:[%s5900_s26 + $0x700] sm:$0xff] }
 0x17a   : > { %7657 = vst [vmem:[#allocation48_spill] sm:$0xff] %v6365_v13  ;;  %v439_v20 = vld [vmem:[%s5900_s26 + $0x760] sm:$0xff] }
 0x17b   : > { %1863 = vmatmul.mubr.bf16.gmra.mrb[24].mxu0 %v6245_v6  ;;  %2592 = vmatmul.mubr.bf16.gmra.mrb[24].mxu1 %v6245_v6  ;;  %7659 = vst [vmem:[#allocation50_spill] sm:$0xff] %v6377_v23 }
 0x17c   : > { %1872 = vmatprep.mubr.bf16.mxu0 %v6247_v4  ;;  %2601 = vmatprep.mubr.bf16.mxu1 %v6247_v4  ;;  %v663_v4 = vld [vmem:[#allocation5 + $0x290] sm:$0xff] }
 0x183   : > { %1873 = vmatmul.mubr.bf16.gmra.mrb[28].mxu0 %v6257_v31  ;;  %2602 = vmatmul.mubr.bf16.gmra.mrb[28].mxu1 %v6257_v31  ;;  %v656_v31 = vld [vmem:[#allocation5 + $0x258] sm:$0xff] }
 0x184   : > { %1882 = vmatprep.mubr.bf16.mxu0 %v6259_v34  ;;  %2611 = vmatprep.mubr.bf16.mxu1 %v6259_v34  ;;  %v650_v34 = vld [vmem:[#allocation5 + $0x228] sm:$0xff] }
 0x18b   : > { %1883 = vmatmul.mubr.bf16.gmra.mrb[32].mxu0 %v6269_v43  ;;  %2612 = vmatmul.mubr.bf16.gmra.mrb[32].mxu1 %v6269_v43 }
 0x18c   : > { %1892 = vmatprep.mubr.bf16.mxu0 %v6271_v10  ;;  %2621 = vmatprep.mubr.bf16.mxu1 %v6271_v10  ;;  %v621_v10 = vld [vmem:[#allocation5 + $0x140] sm:$0xff] }
 0x193   : > { %1893 = vmatmul.mubr.bf16.gmra.mrb[36].mxu0 %v6281_v62  ;;  %2622 = vmatmul.mubr.bf16.gmra.mrb[36].mxu1 %v6281_v62  ;;  %v614_v62 = vld [vmem:[#allocation5 + $0x108] sm:$0xff] }
 0x194   : > { %1902 = vmatprep.mubr.bf16.mxu0 %v6283_v7  ;;  %2631 = vmatprep.mubr.bf16.mxu1 %v6283_v7  ;;  %v608_v7 = vld [vmem:[#allocation5 + $0xd8] sm:$0xff] }
 0x19b   : > { %1903 = vmatmul.mubr.bf16.gmra.mrb[40].mxu0 %v6293_v60  ;;  %2632 = vmatmul.mubr.bf16.gmra.mrb[40].mxu1 %v6293_v60 }
 0x19c   : > { %1912 = vmatprep.mubr.bf16.mxu0 %v6295_v26  ;;  %2641 = vmatprep.mubr.bf16.mxu1 %v6295_v26  ;;  %v606_v26 = vld [vmem:[#allocation5 + $0xc8] sm:$0xff] }
 0x1a3   : > { %1913 = vmatmul.mubr.bf16.gmra.mrb[44].mxu0 %v6305_v36  ;;  %2642 = vmatmul.mubr.bf16.gmra.mrb[44].mxu1 %v6305_v36  ;;  %v599_v36 = vld [vmem:[#allocation5 + $0x90] sm:$0xff] }
 0x1a4   : > { %1922 = vmatprep.mubr.bf16.mxu0 %v6307_v39  ;;  %2651 = vmatprep.mubr.bf16.mxu1 %v6307_v39 }
 0x1ab   : > { %1923 = vmatmul.mubr.bf16.gmra.mrb[48].mxu0 %v6317_v38  ;;  %2652 = vmatmul.mubr.bf16.gmra.mrb[48].mxu1 %v6317_v38 }
 0x1ac   : > { %1932 = vmatprep.mubr.bf16.mxu0 %v6319_v44  ;;  %2661 = vmatprep.mubr.bf16.mxu1 %v6319_v44 }
 0x1b3   : > { %1933 = vmatmul.mubr.bf16.gmra.mrb[52].mxu0 %v6329_v32  ;;  %2662 = vmatmul.mubr.bf16.gmra.mrb[52].mxu1 %v6329_v32  ;;  %v600_v32 = vld [vmem:[#allocation5 + $0x98] sm:$0xff] }
 0x1b4   : > { %1942 = vmatprep.mubr.bf16.mxu0 %v6331_v15  ;;  %2671 = vmatprep.mubr.bf16.mxu1 %v6331_v15 }
 0x1bb   : > { %1943 = vmatmul.mubr.bf16.gmra.mrb[56].mxu0 %v6341_v5  ;;  %2672 = vmatmul.mubr.bf16.gmra.mrb[56].mxu1 %v6341_v5  ;;  %v416_v5 = vld [vmem:[%s5900_s26 + $0x6a8] sm:$0xff] }
 0x1bc   : > { %1952 = vmatprep.mubr.bf16.mxu0 %v6343_v46  ;;  %2681 = vmatprep.mubr.bf16.mxu1 %v6343_v46  ;;  %v410_v46 = vld [vmem:[%s5900_s26 + $0x678] sm:$0xff] }
 0x1bd   : > { %v6367_v0 = vpack.c.bf16 %v416_v5, %v410_v46  ;;  %v421_v46 = vld [vmem:[%s5900_s26 + $0x6d0] sm:$0xff] }
 0x1be   : > { %v6389_v55 = vpack.c.bf16 %v427_v54, %v421_v46  ;;  %v208_v54 = vld [vmem:[%s5900_s26 + $0x28] sm:$0xff] }
 0x1bf   : > { %7658 = vst [vmem:[#allocation49_spill] sm:$0xff] %v6367_v0 }
 0x1c0   : > { %7661 = vst [vmem:[#allocation52_spill] sm:$0xff] %v6389_v55 }
 0x1c3   : > { %1953 = vmatmul.mubr.bf16.gmra.mrb[60].mxu0 %v6353_v27  ;;  %2682 = vmatmul.mubr.bf16.gmra.mrb[60].mxu1 %v6353_v27  ;;  %v428_v27 = vld [vmem:[%s5900_s26 + $0x708] sm:$0xff] }
 0x1c4   : > { %1962 = vmatprep.mubr.bf16.mxu0 %v6355_v42  ;;  %2691 = vmatprep.mubr.bf16.mxu1 %v6355_v42  ;;  %v422_v42 = vld [vmem:[%s5900_s26 + $0x6d8] sm:$0xff] }
 0x1c5   : > { %v6379_v5 = vpack.c.bf16 %v428_v27, %v422_v42  ;;  %v433_v42 = vld [vmem:[%s5900_s26 + $0x730] sm:$0xff] }
 0x1c6   : > { %v6401_v15 = vpack.c.bf16 %v439_v20, %v433_v42 }
 0x1c7   : > { %7660 = vst [vmem:[#allocation51_spill] sm:$0xff] %v6379_v5 }
 0x1c8   : > { %7663 = vst [vmem:[#allocation54_spill] sm:$0xff] %v6401_v15 }
 0x1cb   : > { %1963 = vmatmul.mubr.bf16.gmra.mrb[64].mxu0 %v6365_v13  ;;  %2692 = vmatmul.mubr.bf16.gmra.mrb[64].mxu1 %v6365_v13  ;;  %v440_v13 = vld [vmem:[%s5900_s26 + $0x768] sm:$0xff] }
 0x1cc   : > { %1972 = vmatprep.mubr.bf16.mxu0 %v6367_v0  ;;  %2701 = vmatprep.mubr.bf16.mxu1 %v6367_v0  ;;  %v434_v0 = vld [vmem:[%s5900_s26 + $0x738] sm:$0xff] }
 0x1cd   : > { %v6391_v27 = vpack.c.bf16 %v440_v13, %v434_v0  ;;  %v445_v13 = vld [vmem:[%s5900_s26 + $0x790] sm:$0xff]  ;;  %v451_v0 = vld [vmem:[%s5900_s26 + $0x7c0] sm:$0xff] }
 0x1ce   : > { %v6413_v42 = vpack.c.bf16 %v451_v0, %v445_v13  ;;  %v594_v13 = vld [vmem:[#allocation5 + $0x68] sm:$0xff] }
 0x1cf   : > { %7662 = vst [vmem:[#allocation53_spill] sm:$0xff] %v6391_v27  ;;  %v220_v0 = vld [vmem:[%s5900_s26 + $0x88] sm:$0xff] }
 0x1d0   : > { %7665 = vst [vmem:[#allocation56_spill] sm:$0xff] %v6413_v42 }
 0x1d3   : > { %1973 = vmatmul.mubr.bf16.gmra.mrb[68].mxu0 %v6377_v23  ;;  %2702 = vmatmul.mubr.bf16.gmra.mrb[68].mxu1 %v6377_v23  ;;  %v452_v23 = vld [vmem:[%s5900_s26 + $0x7c8] sm:$0xff] }
 0x1d4   : > { %1982 = vmatprep.mubr.bf16.mxu0 %v6379_v5  ;;  %2711 = vmatprep.mubr.bf16.mxu1 %v6379_v5  ;;  %v446_v5 = vld [vmem:[%s5900_s26 + $0x798] sm:$0xff] }
 0x1d5   : > { %v6403_v46 = vpack.c.bf16 %v452_v23, %v446_v5  ;;  %v207_v23 = vld [vmem:[%s5900_s26 + $0x20] sm:$0xff]  ;;  %v213_v5 = vld [vmem:[%s5900_s26 + $0x50] sm:$0xff] }
 0x1d7   : > { %7664 = vst [vmem:[#allocation55_spill] sm:$0xff] %v6403_v46 }
 0x1db   : > { %1983 = vmatmul.mubr.bf16.gmra.mrb[72].mxu0 %v6389_v55  ;;  %2712 = vmatmul.mubr.bf16.gmra.mrb[72].mxu1 %v6389_v55  ;;  %v587_v55 = vld [vmem:[#allocation5 + $0x30] sm:$0xff] }
 0x1dc   : > { %1992 = vmatprep.mubr.bf16.mxu0 %v6391_v27  ;;  %2721 = vmatprep.mubr.bf16.mxu1 %v6391_v27  ;;  %v214_v27 = vld [vmem:[%s5900_s26 + $0x58] sm:$0xff]  ;;  %v1175_v38 = vpack.c.bf16 %v594_v13, %v587_v55 }
 0x1dd   : > { %v6415_v20 = vpack.c.bf16 %v214_v27, %v208_v54  ;;  %v226_v27 = vld [vmem:[%s5900_s26 + $0xb8] sm:$0xff]  ;;  %v6427_v54 = vpack.c.bf16 %v213_v5, %v207_v23  ;;  %v219_v23 = vld [vmem:[%s5900_s26 + $0x80] sm:$0xff]  ;;  %v225_v5 = vld [vmem:[%s5900_s26 + $0xb0] sm:$0xff] }
 0x1de   : > { %v6429_v39 = vpack.c.bf16 %v226_v27, %v220_v0  ;;  %v238_v13 = vld [vmem:[%s5900_s26 + $0x118] sm:$0xff]  ;;  %v1188_v0 = vpack.c.bf16 %v621_v10, %v614_v62  ;;  %v615_v27 = vld [vmem:[#allocation5 + $0x110] sm:$0xff] }
 0x1df   : > { %7666 = vst [vmem:[#allocation57_spill] sm:$0xff] %v6415_v20  ;;  %7667 = vst [vmem:[#allocation58_spill] sm:$0xff] %v6427_v54 }
 0x1e0   : > { %7668 = vst [vmem:[#allocation59_spill] sm:$0xff] %v6429_v39 }
 0x1e3   : > { %1993 = vmatmul.mubr.bf16.gmra.mrb[76].mxu0 %v6401_v15  ;;  %2722 = vmatmul.mubr.bf16.gmra.mrb[76].mxu1 %v6401_v15  ;;  %v592_v15 = vld [vmem:[#allocation5 + $0x58] sm:$0xff] }
 0x1e4   : > { %2002 = vmatprep.mubr.bf16.mxu0 %v6403_v46  ;;  %2731 = vmatprep.mubr.bf16.mxu1 %v6403_v46  ;;  %v585_v46 = vld [vmem:[#allocation5 + $0x20] sm:$0xff] }
 0x1e5   : > { %v1173_v44 = vpack.c.bf16 %v592_v15, %v585_v46  ;;  %v1180_v15 = vpack.c.bf16 %v606_v26, %v599_v36  ;;  %v232_v46 = vld [vmem:[%s5900_s26 + $0xe8] sm:$0xff]  ;;  %v628_v36 = vld [vmem:[#allocation5 + $0x178] sm:$0xff] }
 0x1e6   : > { %v622_v26 = vld [vmem:[#allocation5 + $0x148] sm:$0xff]  ;;  %v6444_v43 = vpack.c.bf16 %v238_v13, %v232_v46  ;;  %v649_v46 = vld [vmem:[#allocation5 + $0x220] sm:$0xff]  ;;  %v237_v13 = vld [vmem:[%s5900_s26 + $0x110] sm:$0xff] }
 0x1e7   : > { %v1189_v62 = vpack.c.bf16 %v622_v26, %v615_v27 }
 0x1e8   : > { %7671 = vst [vmem:[#allocation61_spill] sm:$0xff] %v6444_v43 }
 0x1eb   : > { %2003 = vmatmul.mubr.bf16.gmra.mrb[80].mxu0 %v6413_v42  ;;  %2732 = vmatmul.mubr.bf16.gmra.mrb[80].mxu1 %v6413_v42  ;;  %v607_v42 = vld [vmem:[#allocation5 + $0xd0] sm:$0xff] }
 0x1ec   : > { %4733 = vmatprep.mubr.msk.bf16.mxu0 %vm1463_vm0, %v6415_v20  ;;  %4754 = vmatprep.mubr.msk.bf16.mxu1 %vm1463_vm0, %v6415_v20  ;;  %v601_v20 = vld [vmem:[#allocation5 + $0xa0] sm:$0xff]  ;;  %v1181_v60 = vpack.c.bf16 %v607_v42, %v600_v32  ;;  %v620_v42 = vld [vmem:[#allocation5 + $0x138] sm:$0xff] }
 0x1ed   : > { %v1182_v55 = vpack.c.bf16 %v608_v7, %v601_v20  ;;  %v613_v32 = vld [vmem:[#allocation5 + $0x100] sm:$0xff]  ;;  %v634_v20 = vld [vmem:[#allocation5 + $0x1a8] sm:$0xff] }
 0x1ee   : > { %v1187_v10 = vpack.c.bf16 %v620_v42, %v613_v32  ;;  %v250_v32 = vld [vmem:[%s5900_s26 + $0x178] sm:$0xff] }
 0x1f3   : > { %2046 = vmatmul.mubr.bf16.vlgmr.msra.gmra.mrb[0].mxu0 %v6427_v54  ;;  %2775 = vmatmul.mubr.bf16.vlgmr.msra.gmra.mrb[0].mxu1 %v6427_v54  ;;  %v6441_v54 = vpack.c.bf16 %v225_v5, %v219_v23  ;;  %v629_v23 = vld [vmem:[#allocation5 + $0x180] sm:$0xff]  ;;  %v636_v5 = vld [vmem:[#allocation5 + $0x1b8] sm:$0xff] }
 0x1f4   : > { %2986 = vmatpush1.bf16.msra.mxu0 %v1173_v44  ;;  %3715 = vmatpush1.bf16.msra.mxu1 %v1175_v38  ;;  %v7670_v44 = vmov 0   ;;  %v635_v38 = vld [vmem:[#allocation5 + $0x1b0] sm:$0xff]  ;;  %v1196_v27 = vpack.c.bf16 %v636_v5, %v629_v23  ;;  %v657_v23 = vld [vmem:[#allocation5 + $0x260] sm:$0xff]  ;;  %v664_v5 = vld [vmem:[#allocation5 + $0x298] sm:$0xff] }
 0x1f5   : > { %4734 = vmatprep.mubr.msk.bf16.mxu0 %vm1463_vm0, %v6429_v39  ;;  %4755 = vmatprep.mubr.msk.bf16.mxu1 %vm1463_vm0, %v6429_v39  ;;  %7669 = vst [vmem:[#allocation60_spill] sm:$0xff] %v6441_v54  ;;  %v1195_v7 = vpack.c.bf16 %v635_v38, %v628_v36  ;;  %v641_v36 = vld [vmem:[#allocation5 + $0x1e0] sm:$0xff]  ;;  %v648_v38 = vld [vmem:[#allocation5 + $0x218] sm:$0xff]  ;;  %v643_v39 = vld [vmem:[#allocation5 + $0x1f0] sm:$0xff] }
 0x1f6   : > { %2987 = vmatprep.subr.bf16.mxu0 %v1181_v60  ;;  %3716 = vmatprep.subr.bf16.mxu1 %v7670_v44  ;;  %v627_v60 = vld [vmem:[#allocation5 + $0x170] sm:$0xff] }
 0x1f7   : > { %v1194_v42 = vpack.c.bf16 %v634_v20, %v627_v60  ;;  %v655_v60 = vld [vmem:[#allocation5 + $0x250] sm:$0xff]  ;;  %v662_v20 = vld [vmem:[#allocation5 + $0x288] sm:$0xff] }
 0x1f8   : > { %2988 = vmatpush1.bf16.msra.mxu0 %v1180_v15  ;;  %3717 = vmatpush1.bf16.msra.mxu1 %v1182_v55  ;;  %v642_v15 = vld [vmem:[#allocation5 + $0x1e8] sm:$0xff]  ;;  %v231_v55 = vld [vmem:[%s5900_s26 + $0xe0] sm:$0xff] }
 0x1f9   : > { %2989 = vmatprep.subr.bf16.mxu0 %v1188_v0  ;;  %3718 = vmatprep.subr.bf16.mxu1 %v7670_v44  ;;  %v244_v0 = vld [vmem:[%s5900_s26 + $0x148] sm:$0xff]  ;;  %v1202_v26 = vpack.c.bf16 %v649_v46, %v642_v15  ;;  %v677_v46 = vld [vmem:[#allocation5 + $0x300] sm:$0xff] }
 0x1fa   : > { %v6460_v6 = vpack.c.bf16 %v250_v32, %v244_v0  ;;  %v670_v15 = vld [vmem:[#allocation5 + $0x2c8] sm:$0xff]  ;;  %v669_v32 = vld [vmem:[#allocation5 + $0x2c0] sm:$0xff] }
 0x1fb   : > { %2056 = vmatmul.mubr.bf16.gmra.mrb[4].mxu0 %v6441_v54  ;;  %2785 = vmatmul.mubr.bf16.gmra.mrb[4].mxu1 %v6441_v54  ;;  %v6457_v54 = vpack.c.bf16 %v237_v13, %v231_v55  ;;  %v243_v55 = vld [vmem:[%s5900_s26 + $0x140] sm:$0xff]  ;;  %v249_v13 = vld [vmem:[%s5900_s26 + $0x170] sm:$0xff]  ;;  %v1216_v0 = vpack.c.bf16 %v677_v46, %v670_v15  ;;  %v698_v15 = vld [vmem:[#allocation5 + $0x3a8] sm:$0xff] }
 0x1fc   : > { %4735 = vmatprep.mubr.msk.bf16.mxu0 %vm1463_vm0, %v6444_v43  ;;  %4756 = vmatprep.mubr.msk.bf16.mxu1 %vm1463_vm0, %v6444_v43  ;;  %7673 = vst [vmem:[#allocation63_spill] sm:$0xff] %v6460_v6  ;;  %v705_v46 = vld [vmem:[#allocation5 + $0x3e0] sm:$0xff] }
 0x1fd   : > { %2990 = vmatpush1.bf16.msra.mxu0 %v1187_v10  ;;  %3719 = vmatpush1.bf16.msra.mxu1 %v1189_v62  ;;  %7672 = vst [vmem:[#allocation62_spill] sm:$0xff] %v6457_v54  ;;  %v1201_v10 = vpack.c.bf16 %v648_v38, %v641_v36  ;;  %v1203_v62 = vpack.c.bf16 %v650_v34, %v643_v39  ;;  %v678_v36 = vld [vmem:[#allocation5 + $0x308] sm:$0xff]  ;;  %v684_v38 = vld [vmem:[#allocation5 + $0x338] sm:$0xff] }
 0x1fe   : > { %2991 = vmatprep.subr.bf16.mxu0 %v1195_v7  ;;  %3720 = vmatprep.subr.bf16.mxu1 %v7670_v44  ;;  %v1209_v7 = vpack.c.bf16 %v663_v4, %v656_v31  ;;  %v256_v4 = vld [vmem:[%s5900_s26 + $0x1a8] sm:$0xff]  ;;  %v262_v31 = vld [vmem:[%s5900_s26 + $0x1d8] sm:$0xff]  ;;  %v1208_v34 = vpack.c.bf16 %v662_v20, %v655_v60  ;;  %v1210_v39 = vpack.c.bf16 %v664_v5, %v657_v23  ;;  %v683_v60 = vld [vmem:[#allocation5 + $0x330] sm:$0xff] }
 0x1ff   : > { %v6476_v43 = vpack.c.bf16 %v262_v31, %v256_v4  ;;  %v690_v20 = vld [vmem:[#allocation5 + $0x368] sm:$0xff]  ;;  %v685_v23 = vld [vmem:[#allocation5 + $0x340] sm:$0xff]  ;;  %v692_v5 = vld [vmem:[#allocation5 + $0x378] sm:$0xff] }
 0x200   : > { %v274_v4 = vld [vmem:[%s5900_s26 + $0x238] sm:$0xff]  ;;  %v1222_v31 = vpack.c.bf16 %v690_v20, %v683_v60  ;;  %v711_v60 = vld [vmem:[#allocation5 + $0x410] sm:$0xff]  ;;  %v718_v20 = vld [vmem:[#allocation5 + $0x448] sm:$0xff] }
 0x201   : > { %2992 = vmatpush1.bf16.msra.mxu0 %v1194_v42  ;;  %3721 = vmatpush1.bf16.msra.mxu1 %v1196_v27  ;;  %v676_v42 = vld [vmem:[#allocation5 + $0x2f8] sm:$0xff]  ;;  %v671_v27 = vld [vmem:[#allocation5 + $0x2d0] sm:$0xff]  ;;  %7675 = vst [vmem:[#allocation65_spill] sm:$0xff] %v6476_v43 }
 0x202   : > { %2993 = vmatprep.subr.bf16.mxu0 %v1202_v26  ;;  %3722 = vmatprep.subr.bf16.mxu1 %v7670_v44  ;;  %v6473_v26 = vpack.c.bf16 %v249_v13, %v243_v55  ;;  %v255_v55 = vld [vmem:[%s5900_s26 + $0x1a0] sm:$0xff]  ;;  %v261_v13 = vld [vmem:[%s5900_s26 + $0x1d0] sm:$0xff] }
 0x203   : > { %2066 = vmatmul.mubr.bf16.gmra.mrb[8].mxu0 %v6457_v54  ;;  %2795 = vmatmul.mubr.bf16.gmra.mrb[8].mxu1 %v6457_v54  ;;  %v691_v54 = vld [vmem:[#allocation5 + $0x370] sm:$0xff] }
 0x204   : > { %4736 = vmatprep.mubr.msk.bf16.mxu0 %vm1463_vm0, %v6460_v6  ;;  %4757 = vmatprep.mubr.msk.bf16.mxu1 %vm1463_vm0, %v6460_v6  ;;  %7674 = vst [vmem:[#allocation64_spill] sm:$0xff] %v6473_v26 }
 0x205   : > { %2994 = vmatpush1.bf16.msra.mxu0 %v1201_v10  ;;  %3723 = vmatpush1.bf16.msra.mxu1 %v1203_v62  ;;  %v1215_v10 = vpack.c.bf16 %v676_v42, %v669_v32  ;;  %v1217_v62 = vpack.c.bf16 %v678_v36, %v671_v27  ;;  %v704_v32 = vld [vmem:[#allocation5 + $0x3d8] sm:$0xff]  ;;  %v699_v42 = vld [vmem:[#allocation5 + $0x3b0] sm:$0xff]  ;;  %v6489_v27 = vpack.c.bf16 %v261_v13, %v255_v55  ;;  %v706_v36 = vld [vmem:[#allocation5 + $0x3e8] sm:$0xff] }
 0x206   : > { %2995 = vmatprep.subr.bf16.mxu0 %v1209_v7  ;;  %3724 = vmatprep.subr.bf16.mxu1 %v7670_v44  ;;  %v1223_v7 = vpack.c.bf16 %v691_v54, %v684_v38  ;;  %v268_v54 = vld [vmem:[%s5900_s26 + $0x208] sm:$0xff]  ;;  %v712_v38 = vld [vmem:[#allocation5 + $0x418] sm:$0xff]  ;;  %v267_v55 = vld [vmem:[%s5900_s26 + $0x200] sm:$0xff] }
 0x207   : > { %7676 = vst [vmem:[#allocation66_spill] sm:$0xff] %v6489_v27  ;;  %v6492_v6 = vpack.c.bf16 %v274_v4, %v268_v54  ;;  %v273_v13 = vld [vmem:[%s5900_s26 + $0x230] sm:$0xff]  ;;  %v286_v54 = vld [vmem:[%s5900_s26 + $0x298] sm:$0xff]  ;;  %v1236_v4 = vpack.c.bf16 %v718_v20, %v711_v60  ;;  %v746_v20 = vld [vmem:[#allocation5 + $0x528] sm:$0xff] }
 0x208   : > { %v739_v60 = vld [vmem:[#allocation5 + $0x4f0] sm:$0xff] }
 0x209   : > { %2996 = vmatpush1.bf16.msra.mxu0 %v1208_v34  ;;  %3725 = vmatpush1.bf16.msra.mxu1 %v1210_v39  ;;  %v1224_v34 = vpack.c.bf16 %v692_v5, %v685_v23  ;;  %v1230_v39 = vpack.c.bf16 %v705_v46, %v698_v15  ;;  %7677 = vst [vmem:[#allocation67_spill] sm:$0xff] %v6492_v6  ;;  %v713_v23 = vld [vmem:[#allocation5 + $0x420] sm:$0xff]  ;;  %v720_v5 = vld [vmem:[#allocation5 + $0x458] sm:$0xff]  ;;  %v726_v15 = vld [vmem:[#allocation5 + $0x488] sm:$0xff] }
 0x20a   : > { %2997 = vmatprep.subr.bf16.mxu0 %v1216_v0  ;;  %3726 = vmatprep.subr.bf16.mxu1 %v7670_v44  ;;  %v697_v0 = vld [vmem:[#allocation5 + $0x3a0] sm:$0xff] }
 0x20b   : > { %2076 = vmatmul.mubr.bf16.gmra.mrb[12].mxu0 %v6473_v26  ;;  %2805 = vmatmul.mubr.bf16.gmra.mrb[12].mxu1 %v6473_v26  ;;  %v719_v26 = vld [vmem:[#allocation5 + $0x450] sm:$0xff]  ;;  %v733_v46 = vld [vmem:[#allocation5 + $0x4c0] sm:$0xff] }
 0x20c   : > { %4737 = vmatprep.mubr.msk.bf16.mxu0 %vm1463_vm0, %v6476_v43  ;;  %4758 = vmatprep.mubr.msk.bf16.mxu1 %vm1463_vm0, %v6476_v43 }
 0x20d   : > { %2998 = vmatpush1.bf16.msra.mxu0 %v1215_v10  ;;  %3727 = vmatpush1.bf16.msra.mxu1 %v1217_v62  ;;  %v1229_v10 = vpack.c.bf16 %v704_v32, %v697_v0  ;;  %v1231_v62 = vpack.c.bf16 %v706_v36, %v699_v42  ;;  %v732_v0 = vld [vmem:[#allocation5 + $0x4b8] sm:$0xff]  ;;  %v727_v32 = vld [vmem:[#allocation5 + $0x490] sm:$0xff]  ;;  %v6505_v42 = vpack.c.bf16 %v273_v13, %v267_v55  ;;  %v734_v36 = vld [vmem:[#allocation5 + $0x4c8] sm:$0xff] }
 0x20e   : > { %2999 = vmatprep.subr.bf16.mxu0 %v1223_v7  ;;  %3728 = vmatprep.subr.bf16.mxu1 %v7670_v44  ;;  %v1237_v7 = vpack.c.bf16 %v719_v26, %v712_v38  ;;  %v280_v26 = vld [vmem:[%s5900_s26 + $0x268] sm:$0xff]  ;;  %v740_v38 = vld [vmem:[#allocation5 + $0x4f8] sm:$0xff]  ;;  %v279_v55 = vld [vmem:[%s5900_s26 + $0x260] sm:$0xff] }
 0x20f   : > { %7678 = vst [vmem:[#allocation68_spill] sm:$0xff] %v6505_v42  ;;  %v6508_v43 = vpack.c.bf16 %v286_v54, %v280_v26  ;;  %v285_v13 = vld [vmem:[%s5900_s26 + $0x290] sm:$0xff]  ;;  %v298_v26 = vld [vmem:[%s5900_s26 + $0x2f8] sm:$0xff]  ;;  %v1250_v54 = vpack.c.bf16 %v746_v20, %v739_v60  ;;  %v774_v20 = vld [vmem:[#allocation5 + $0x608] sm:$0xff] }
 0x210   : > { %v767_v60 = vld [vmem:[#allocation5 + $0x5d0] sm:$0xff] }
 0x211   : > { %3000 = vmatpush1.bf16.msra.mxu0 %v1222_v31  ;;  %3729 = vmatpush1.bf16.msra.mxu1 %v1224_v34  ;;  %v1238_v31 = vpack.c.bf16 %v720_v5, %v713_v23  ;;  %v1244_v34 = vpack.c.bf16 %v733_v46, %v726_v15  ;;  %7679 = vst [vmem:[#allocation69_spill] sm:$0xff] %v6508_v43  ;;  %v741_v23 = vld [vmem:[#allocation5 + $0x500] sm:$0xff]  ;;  %v748_v5 = vld [vmem:[#allocation5 + $0x538] sm:$0xff]  ;;  %v754_v15 = vld [vmem:[#allocation5 + $0x568] sm:$0xff] }
 0x212   : > { %3001 = vmatprep.subr.bf16.mxu0 %v1230_v39  ;;  %3730 = vmatprep.subr.bf16.mxu1 %v7670_v44  ;;  %v725_v39 = vld [vmem:[#allocation5 + $0x480] sm:$0xff] }
 0x213   : > { %2086 = vmatmul.mubr.bf16.gmra.mrb[16].mxu0 %v6489_v27  ;;  %2815 = vmatmul.mubr.bf16.gmra.mrb[16].mxu1 %v6489_v27  ;;  %v747_v27 = vld [vmem:[#allocation5 + $0x530] sm:$0xff]  ;;  %v761_v46 = vld [vmem:[#allocation5 + $0x5a0] sm:$0xff] }
 0x214   : > { %4738 = vmatprep.mubr.msk.bf16.mxu0 %vm1463_vm0, %v6492_v6  ;;  %4759 = vmatprep.mubr.msk.bf16.mxu1 %vm1463_vm0, %v6492_v6 }
 0x215   : > { %3002 = vmatpush1.bf16.msra.mxu0 %v1229_v10  ;;  %3731 = vmatpush1.bf16.msra.mxu1 %v1231_v62  ;;  %v1243_v10 = vpack.c.bf16 %v732_v0, %v725_v39  ;;  %v1245_v62 = vpack.c.bf16 %v734_v36, %v727_v32  ;;  %v760_v39 = vld [vmem:[#allocation5 + $0x598] sm:$0xff]  ;;  %v755_v0 = vld [vmem:[#allocation5 + $0x570] sm:$0xff]  ;;  %v6521_v32 = vpack.c.bf16 %v285_v13, %v279_v55  ;;  %v762_v36 = vld [vmem:[#allocation5 + $0x5a8] sm:$0xff] }
 0x216   : > { %3003 = vmatprep.subr.bf16.mxu0 %v1237_v7  ;;  %3732 = vmatprep.subr.bf16.mxu1 %v7670_v44  ;;  %v1251_v7 = vpack.c.bf16 %v747_v27, %v740_v38  ;;  %v292_v27 = vld [vmem:[%s5900_s26 + $0x2c8] sm:$0xff]  ;;  %v768_v38 = vld [vmem:[#allocation5 + $0x5d8] sm:$0xff]  ;;  %v291_v55 = vld [vmem:[%s5900_s26 + $0x2c0] sm:$0xff] }
 0x217   : > { %7680 = vst [vmem:[#allocation70_spill] sm:$0xff] %v6521_v32  ;;  %v6524_v6 = vpack.c.bf16 %v298_v26, %v292_v27  ;;  %v297_v13 = vld [vmem:[%s5900_s26 + $0x2f0] sm:$0xff]  ;;  %v310_v27 = vld [vmem:[%s5900_s26 + $0x358] sm:$0xff]  ;;  %v1264_v26 = vpack.c.bf16 %v774_v20, %v767_v60  ;;  %v802_v20 = vld [vmem:[#allocation5 + $0x6e8] sm:$0xff] }
 0x218   : > { %v795_v60 = vld [vmem:[#allocation5 + $0x6b0] sm:$0xff] }
 0x219   : > { %3004 = vmatpush1.bf16.msra.mxu0 %v1236_v4  ;;  %3733 = vmatpush1.bf16.msra.mxu1 %v1238_v31  ;;  %v1252_v4 = vpack.c.bf16 %v748_v5, %v741_v23  ;;  %v1258_v31 = vpack.c.bf16 %v761_v46, %v754_v15  ;;  %v769_v23 = vld [vmem:[#allocation5 + $0x5e0] sm:$0xff]  ;;  %v776_v5 = vld [vmem:[#allocation5 + $0x618] sm:$0xff]  ;;  %v782_v15 = vld [vmem:[#allocation5 + $0x648] sm:$0xff] }
 0x21a   : > { %3005 = vmatprep.subr.bf16.mxu0 %v1244_v34  ;;  %3734 = vmatprep.subr.bf16.mxu1 %v7670_v44  ;;  %v753_v34 = vld [vmem:[#allocation5 + $0x560] sm:$0xff] }
 0x21b   : > { %2096 = vmatmul.mubr.bf16.gmra.mrb[20].mxu0 %v6505_v42  ;;  %2825 = vmatmul.mubr.bf16.gmra.mrb[20].mxu1 %v6505_v42  ;;  %v775_v42 = vld [vmem:[#allocation5 + $0x610] sm:$0xff]  ;;  %v789_v46 = vld [vmem:[#allocation5 + $0x680] sm:$0xff] }
 0x21c   : > { %4739 = vmatprep.mubr.msk.bf16.mxu0 %vm1463_vm0, %v6508_v43  ;;  %4760 = vmatprep.mubr.msk.bf16.mxu1 %vm1463_vm0, %v6508_v43 }
 0x21d   : > { %3006 = vmatpush1.bf16.msra.mxu0 %v1243_v10  ;;  %3735 = vmatpush1.bf16.msra.mxu1 %v1245_v62  ;;  %v1257_v10 = vpack.c.bf16 %v760_v39, %v753_v34  ;;  %v1259_v62 = vpack.c.bf16 %v762_v36, %v755_v0  ;;  %v788_v34 = vld [vmem:[#allocation5 + $0x678] sm:$0xff]  ;;  %v783_v39 = vld [vmem:[#allocation5 + $0x650] sm:$0xff]  ;;  %v6537_v0 = vpack.c.bf16 %v297_v13, %v291_v55  ;;  %v790_v36 = vld [vmem:[#allocation5 + $0x688] sm:$0xff] }
 0x21e   : > { %3007 = vmatprep.subr.bf16.mxu0 %v1251_v7  ;;  %3736 = vmatprep.subr.bf16.mxu1 %v7670_v44  ;;  %v1265_v7 = vpack.c.bf16 %v775_v42, %v768_v38  ;;  %v304_v42 = vld [vmem:[%s5900_s26 + $0x328] sm:$0xff]  ;;  %v796_v38 = vld [vmem:[#allocation5 + $0x6b8] sm:$0xff]  ;;  %v303_v55 = vld [vmem:[%s5900_s26 + $0x320] sm:$0xff] }
 0x21f   : > { %v6540_v43 = vpack.c.bf16 %v310_v27, %v304_v42  ;;  %v309_v13 = vld [vmem:[%s5900_s26 + $0x350] sm:$0xff]  ;;  %v322_v42 = vld [vmem:[%s5900_s26 + $0x3b8] sm:$0xff]  ;;  %v1278_v27 = vpack.c.bf16 %v802_v20, %v795_v60  ;;  %v340_v20 = vld [vmem:[%s5900_s26 + $0x448] sm:$0xff] }
 0x220   : > { %v333_v60 = vld [vmem:[%s5900_s26 + $0x410] sm:$0xff] }
 0x221   : > { %3008 = vmatpush1.bf16.msra.mxu0 %v1250_v54  ;;  %3737 = vmatpush1.bf16.msra.mxu1 %v1252_v4  ;;  %v1266_v54 = vpack.c.bf16 %v776_v5, %v769_v23  ;;  %v1272_v4 = vpack.c.bf16 %v789_v46, %v782_v15  ;;  %v797_v23 = vld [vmem:[#allocation5 + $0x6c0] sm:$0xff]  ;;  %v804_v5 = vld [vmem:[#allocation5 + $0x6f8] sm:$0xff]  ;;  %v810_v15 = vld [vmem:[#allocation5 + $0x728] sm:$0xff] }
 0x222   : > { %3009 = vmatprep.subr.bf16.mxu0 %v1258_v31  ;;  %3738 = vmatprep.subr.bf16.mxu1 %v7670_v44  ;;  %v781_v31 = vld [vmem:[#allocation5 + $0x640] sm:$0xff] }
 0x223   : > { %2106 = vmatmul.mubr.bf16.gmra.mrb[24].mxu0 %v6521_v32  ;;  %2835 = vmatmul.mubr.bf16.gmra.mrb[24].mxu1 %v6521_v32  ;;  %v803_v32 = vld [vmem:[#allocation5 + $0x6f0] sm:$0xff]  ;;  %v817_v46 = vld [vmem:[#allocation5 + $0x760] sm:$0xff] }
 0x224   : > { %4740 = vmatprep.mubr.msk.bf16.mxu0 %vm1463_vm0, %v6524_v6  ;;  %4761 = vmatprep.mubr.msk.bf16.mxu1 %vm1463_vm0, %v6524_v6 }
 0x225   : > { %3010 = vmatpush1.bf16.msra.mxu0 %v1257_v10  ;;  %3739 = vmatpush1.bf16.msra.mxu1 %v1259_v62  ;;  %v1271_v10 = vpack.c.bf16 %v788_v34, %v781_v31  ;;  %v1273_v62 = vpack.c.bf16 %v790_v36, %v783_v39  ;;  %v315_v34 = vld [vmem:[%s5900_s26 + $0x380] sm:$0xff]  ;;  %v321_v39 = vld [vmem:[%s5900_s26 + $0x3b0] sm:$0xff]  ;;  %v328_v36 = vld [vmem:[%s5900_s26 + $0x3e8] sm:$0xff] }
 0x226   : > { %3011 = vmatprep.subr.bf16.mxu0 %v1265_v7  ;;  %3740 = vmatprep.subr.bf16.mxu1 %v7670_v44  ;;  %v1279_v7 = vpack.c.bf16 %v803_v32, %v796_v38  ;;  %v316_v32 = vld [vmem:[%s5900_s26 + $0x388] sm:$0xff]  ;;  %v334_v38 = vld [vmem:[%s5900_s26 + $0x418] sm:$0xff] }
 0x227   : > { %v6556_v31 = vpack.c.bf16 %v322_v42, %v316_v32  ;;  %v358_v32 = vld [vmem:[%s5900_s26 + $0x4d8] sm:$0xff] }
 0x229   : > { %3012 = vmatpush1.bf16.msra.mxu0 %v1264_v26  ;;  %3741 = vmatpush1.bf16.msra.mxu1 %v1266_v54  ;;  %v1280_v26 = vpack.c.bf16 %v804_v5, %v797_v23  ;;  %v1286_v54 = vpack.c.bf16 %v817_v46, %v810_v15  ;;  %v346_v23 = vld [vmem:[%s5900_s26 + $0x478] sm:$0xff]  ;;  %v339_v46 = vld [vmem:[%s5900_s26 + $0x440] sm:$0xff] }
 0x22a   : > { %3013 = vmatprep.subr.bf16.mxu0 %v1272_v4  ;;  %3742 = vmatprep.subr.bf16.mxu1 %v7670_v44  ;;  %v6553_v4 = vpack.c.bf16 %v309_v13, %v303_v55  ;;  %v6585_v15 = vpack.c.bf16 %v346_v23, %v340_v20  ;;  %v345_v55 = vld [vmem:[%s5900_s26 + $0x470] sm:$0xff]  ;;  %v352_v13 = vld [vmem:[%s5900_s26 + $0x4a8] sm:$0xff]  ;;  %v382_v23 = vld [vmem:[%s5900_s26 + $0x598] sm:$0xff] }
 0x22b   : > { %2116 = vmatmul.mubr.bf16.gmra.mrb[28].mxu0 %v6537_v0  ;;  %2845 = vmatmul.mubr.bf16.gmra.mrb[28].mxu1 %v6537_v0  ;;  %v6597_v42 = vpack.c.bf16 %v345_v55, %v339_v46  ;;  %v376_v20 = vld [vmem:[%s5900_s26 + $0x568] sm:$0xff] }
 0x22c   : > { %4741 = vmatprep.mubr.msk.bf16.mxu0 %vm1463_vm0, %v6540_v43  ;;  %4762 = vmatprep.mubr.msk.bf16.mxu1 %vm1463_vm0, %v6540_v43  ;;  %7681 = vst [vmem:[#allocation71_spill] sm:$0xff] %v6585_v15  ;;  %v6627_v55 = vpack.c.bf16 %v382_v23, %v376_v20  ;;  %v400_v20 = vld [vmem:[%s5900_s26 + $0x628] sm:$0xff]  ;;  %v406_v23 = vld [vmem:[%s5900_s26 + $0x658] sm:$0xff] }
 0x22d   : > { %3014 = vmatpush1.bf16.msra.mxu0 %v1271_v10  ;;  %3743 = vmatpush1.bf16.msra.mxu1 %v1273_v62  ;;  %v6569_v10 = vpack.c.bf16 %v321_v39, %v315_v34  ;;  %v6571_v62 = vpack.c.bf16 %v334_v38, %v328_v36  ;;  %7682 = vst [vmem:[#allocation72_spill] sm:$0xff] %v6597_v42  ;;  %v364_v34 = vld [vmem:[%s5900_s26 + $0x508] sm:$0xff]  ;;  %v370_v39 = vld [vmem:[%s5900_s26 + $0x538] sm:$0xff] }
 0x22e   : > { %3015 = vmatprep.subr.bf16.mxu0 %v1279_v7  ;;  %3744 = vmatprep.subr.bf16.mxu1 %v7670_v44  ;;  %v327_v7 = vld [vmem:[%s5900_s26 + $0x3e0] sm:$0xff]  ;;  %v6613_v38 = vpack.c.bf16 %v370_v39, %v364_v34  ;;  %7687 = vst [vmem:[#allocation77_spill] sm:$0xff] %v6627_v55 }
 0x22f   : > { %v6583_v5 = vpack.c.bf16 %v333_v60, %v327_v7  ;;  %v363_v7 = vld [vmem:[%s5900_s26 + $0x500] sm:$0xff]  ;;  %v369_v60 = vld [vmem:[%s5900_s26 + $0x530] sm:$0xff] }
 0x230   : > { %7685 = vst [vmem:[#allocation75_spill] sm:$0xff] %v6613_v38  ;;  %v6625_v46 = vpack.c.bf16 %v369_v60, %v363_v7  ;;  %v387_v7 = vld [vmem:[%s5900_s26 + $0x5c0] sm:$0xff]  ;;  %v393_v60 = vld [vmem:[%s5900_s26 + $0x5f0] sm:$0xff] }
 0x231   : > { %3016 = vmatpush1.bf16.msra.mxu0 %v1278_v27  ;;  %3745 = vmatpush1.bf16.msra.mxu1 %v1280_v26  ;;  %v6599_v27 = vpack.c.bf16 %v358_v32, %v352_v13  ;;  %v351_v26 = vld [vmem:[%s5900_s26 + $0x4a0] sm:$0xff]  ;;  %v381_v32 = vld [vmem:[%s5900_s26 + $0x590] sm:$0xff] }
 0x232   : > { %3228 = vmatprep.subr.bf16.mxu0 %v1286_v54  ;;  %3915 = vmatprep.subr.bf16.mxu1 %v7670_v44  ;;  %v357_v54 = vld [vmem:[%s5900_s26 + $0x4d0] sm:$0xff]  ;;  %7686 = vst [vmem:[#allocation76_spill] sm:$0xff] %v6625_v46  ;;  %v375_v13 = vld [vmem:[%s5900_s26 + $0x560] sm:$0xff] }
 0x233   : > { %2126 = vmatmul.mubr.bf16.gmra.mrb[32].mxu0 %v6553_v4  ;;  %2855 = vmatmul.mubr.bf16.gmra.mrb[32].mxu1 %v6553_v4  ;;  %7683 = vst [vmem:[#allocation73_spill] sm:$0xff] %v6599_v27  ;;  %v6611_v36 = vpack.c.bf16 %v357_v54, %v351_v26  ;;  %v388_v26 = vld [vmem:[%s5900_s26 + $0x5c8] sm:$0xff]  ;;  %v394_v54 = vld [vmem:[%s5900_s26 + $0x5f8] sm:$0xff]  ;;  %v6639_v34 = vpack.c.bf16 %v381_v32, %v375_v13 }
 0x234   : > { %4742 = vmatprep.mubr.msk.bf16.mxu0 %vm1463_vm0, %v6556_v31  ;;  %4763 = vmatprep.mubr.msk.bf16.mxu1 %vm1463_vm0, %v6556_v31  ;;  %v6641_v39 = vpack.c.bf16 %v394_v54, %v388_v26  ;;  %v6653_v13 = vpack.c.bf16 %v393_v60, %v387_v7  ;;  %v6655_v32 = vpack.c.bf16 %v406_v23, %v400_v20  ;;  %v399_v26 = vld [vmem:[%s5900_s26 + $0x620] sm:$0xff]  ;;  %v405_v54 = vld [vmem:[%s5900_s26 + $0x650] sm:$0xff]  ;;  %v418_v7 = vld [vmem:[%s5900_s26 + $0x6b8] sm:$0xff] }
 0x235   : > { %7684 = vst [vmem:[#allocation74_spill] sm:$0xff] %v6611_v36  ;;  %7688 = vst [vmem:[#allocation78_spill] sm:$0xff] %v6639_v34  ;;  %v6667_v60 = vpack.c.bf16 %v405_v54, %v399_v26  ;;  %v411_v23 = vld [vmem:[%s5900_s26 + $0x680] sm:$0xff]  ;;  %v430_v26 = vld [vmem:[%s5900_s26 + $0x718] sm:$0xff] }
 0x236   : > { %7689 = vst [vmem:[#allocation79_spill] sm:$0xff] %v6641_v39  ;;  %7690 = vst [vmem:[#allocation80_spill] sm:$0xff] %v6653_v13 }
 0x237   : > { %7691 = vst [vmem:[#allocation81_spill] sm:$0xff] %v6655_v32  ;;  %7692 = vst [vmem:[#allocation82_spill] sm:$0xff] %v6667_v60 }
 0x23b   : > { %2136 = vmatmul.mubr.bf16.gmra.mrb[36].mxu0 %v6569_v10  ;;  %2865 = vmatmul.mubr.bf16.gmra.mrb[36].mxu1 %v6569_v10 }
 0x23c   : > { %4743 = vmatprep.mubr.msk.bf16.mxu0 %vm1463_vm0, %v6571_v62  ;;  %4764 = vmatprep.mubr.msk.bf16.mxu1 %vm1463_vm0, %v6571_v62 }
 0x243   : > { %2146 = vmatmul.mubr.bf16.gmra.mrb[40].mxu0 %v6583_v5  ;;  %2875 = vmatmul.mubr.bf16.gmra.mrb[40].mxu1 %v6583_v5 }
 0x244   : > { %4744 = vmatprep.mubr.msk.bf16.mxu0 %vm1463_vm0, %v6585_v15  ;;  %4765 = vmatprep.mubr.msk.bf16.mxu1 %vm1463_vm0, %v6585_v15 }
 0x24b   : > { %2156 = vmatmul.mubr.bf16.gmra.mrb[44].mxu0 %v6597_v42  ;;  %2885 = vmatmul.mubr.bf16.gmra.mrb[44].mxu1 %v6597_v42  ;;  %v845_v42 = vld [vmem:[#allocation5 + $0x840] sm:$0xff] }
 0x24c   : > { %4745 = vmatprep.mubr.msk.bf16.mxu0 %vm1463_vm0, %v6599_v27  ;;  %4766 = vmatprep.mubr.msk.bf16.mxu1 %vm1463_vm0, %v6599_v27  ;;  %v838_v27 = vld [vmem:[#allocation5 + $0x808] sm:$0xff] }
 0x24d   : > { %v1300_v15 = vpack.c.bf16 %v845_v42, %v838_v27  ;;  %v851_v42 = vld [vmem:[#allocation5 + $0x870] sm:$0xff]  ;;  %v858_v27 = vld [vmem:[#allocation5 + $0x8a8] sm:$0xff] }
 0x253   : > { %2166 = vmatmul.mubr.bf16.gmra.mrb[48].mxu0 %v6611_v36  ;;  %2895 = vmatmul.mubr.bf16.gmra.mrb[48].mxu1 %v6611_v36  ;;  %v832_v36 = vld [vmem:[#allocation5 + $0x7d8] sm:$0xff] }
 0x254   : > { %4746 = vmatprep.mubr.msk.bf16.mxu0 %vm1463_vm0, %v6613_v38  ;;  %4767 = vmatprep.mubr.msk.bf16.mxu1 %vm1463_vm0, %v6613_v38  ;;  %v823_v38 = vld [vmem:[#allocation5 + $0x790] sm:$0xff] }
 0x25b   : > { %2176 = vmatmul.mubr.bf16.gmra.mrb[52].mxu0 %v6625_v46  ;;  %2905 = vmatmul.mubr.bf16.gmra.mrb[52].mxu1 %v6625_v46 }
 0x25c   : > { %4747 = vmatprep.mubr.msk.bf16.mxu0 %vm1463_vm0, %v6627_v55  ;;  %4768 = vmatprep.mubr.msk.bf16.mxu1 %vm1463_vm0, %v6627_v55 }
 0x263   : > { %2186 = vmatmul.mubr.bf16.gmra.mrb[56].mxu0 %v6639_v34  ;;  %2915 = vmatmul.mubr.bf16.gmra.mrb[56].mxu1 %v6639_v34  ;;  %v454_v34 = vld [vmem:[%s5900_s26 + $0x7d8] sm:$0xff] }
 0x264   : > { %4748 = vmatprep.mubr.msk.bf16.mxu0 %vm1463_vm0, %v6641_v39  ;;  %4769 = vmatprep.mubr.msk.bf16.mxu1 %vm1463_vm0, %v6641_v39  ;;  %v412_v39 = vld [vmem:[%s5900_s26 + $0x688] sm:$0xff] }
 0x265   : > { %v6669_v20 = vpack.c.bf16 %v418_v7, %v412_v39  ;;  %v423_v7 = vld [vmem:[%s5900_s26 + $0x6e0] sm:$0xff] }
 0x267   : > { %7693 = vst [vmem:[#allocation83_spill] sm:$0xff] %v6669_v20 }
 0x26b   : > { %2196 = vmatmul.mubr.bf16.gmra.mrb[60].mxu0 %v6653_v13  ;;  %2925 = vmatmul.mubr.bf16.gmra.mrb[60].mxu1 %v6653_v13  ;;  %v417_v13 = vld [vmem:[%s5900_s26 + $0x6b0] sm:$0xff] }
 0x26c   : > { %4749 = vmatprep.mubr.msk.bf16.mxu0 %vm1463_vm0, %v6655_v32  ;;  %4770 = vmatprep.mubr.msk.bf16.mxu1 %vm1463_vm0, %v6655_v32  ;;  %v424_v32 = vld [vmem:[%s5900_s26 + $0x6e8] sm:$0xff]  ;;  %v6681_v54 = vpack.c.bf16 %v417_v13, %v411_v23  ;;  %v442_v13 = vld [vmem:[%s5900_s26 + $0x778] sm:$0xff] }
 0x26d   : > { %v6683_v39 = vpack.c.bf16 %v430_v26, %v424_v32  ;;  %v435_v26 = vld [vmem:[%s5900_s26 + $0x740] sm:$0xff] }
 0x26e   : > { %7694 = vst [vmem:[#allocation84_spill] sm:$0xff] %v6681_v54 }
 0x26f   : > { %7695 = vst [vmem:[#allocation85_spill] sm:$0xff] %v6683_v39 }
 0x273   : > { %2206 = vmatmul.mubr.bf16.gmra.mrb[64].mxu0 %v6667_v60  ;;  %2935 = vmatmul.mubr.bf16.gmra.mrb[64].mxu1 %v6667_v60  ;;  %v429_v60 = vld [vmem:[%s5900_s26 + $0x710] sm:$0xff] }
 0x274   : > { %4750 = vmatprep.mubr.msk.bf16.mxu0 %vm1463_vm0, %v6669_v20  ;;  %4771 = vmatprep.mubr.msk.bf16.mxu1 %vm1463_vm0, %v6669_v20  ;;  %v436_v20 = vld [vmem:[%s5900_s26 + $0x748] sm:$0xff]  ;;  %v6695_v23 = vpack.c.bf16 %v429_v60, %v423_v7  ;;  %v453_v7 = vld [vmem:[%s5900_s26 + $0x7d0] sm:$0xff] }
 0x275   : > { %v6697_v32 = vpack.c.bf16 %v442_v13, %v436_v20  ;;  %v447_v20 = vld [vmem:[%s5900_s26 + $0x7a0] sm:$0xff] }
 0x276   : > { %7696 = vst [vmem:[#allocation86_spill] sm:$0xff] %v6695_v23  ;;  %v6721_v13 = vpack.c.bf16 %v453_v7, %v447_v20  ;;  %v825_v20 = vld [vmem:[#allocation5 + $0x7a0] sm:$0xff] }
 0x277   : > { %7697 = vst [vmem:[#allocation87_spill] sm:$0xff] %v6697_v32 }
 0x278   : > { %7700 = vst [vmem:[#allocation90_spill] sm:$0xff] %v6721_v13 }
 0x27b   : > { %2216 = vmatmul.mubr.bf16.gmra.mrb[68].mxu0 %v6681_v54  ;;  %2945 = vmatmul.mubr.bf16.gmra.mrb[68].mxu1 %v6681_v54  ;;  %v441_v54 = vld [vmem:[%s5900_s26 + $0x770] sm:$0xff] }
 0x27c   : > { %4751 = vmatprep.mubr.msk.bf16.mxu0 %vm1463_vm0, %v6683_v39  ;;  %4772 = vmatprep.mubr.msk.bf16.mxu1 %vm1463_vm0, %v6683_v39  ;;  %v448_v39 = vld [vmem:[%s5900_s26 + $0x7a8] sm:$0xff]  ;;  %v6709_v55 = vpack.c.bf16 %v441_v54, %v435_v26  ;;  %v816_v54 = vld [vmem:[#allocation5 + $0x758] sm:$0xff] }
 0x27d   : > { %v6711_v60 = vpack.c.bf16 %v454_v34, %v448_v39  ;;  %v809_v34 = vld [vmem:[#allocation5 + $0x720] sm:$0xff]  ;;  %v811_v39 = vld [vmem:[#allocation5 + $0x730] sm:$0xff]  ;;  %v818_v26 = vld [vmem:[#allocation5 + $0x768] sm:$0xff] }
 0x27e   : > { %7698 = vst [vmem:[#allocation88_spill] sm:$0xff] %v6709_v55  ;;  %v1287_v46 = vpack.c.bf16 %v818_v26, %v811_v39  ;;  %v852_v39 = vld [vmem:[#allocation5 + $0x878] sm:$0xff]  ;;  %v859_v26 = vld [vmem:[#allocation5 + $0x8b0] sm:$0xff] }
 0x27f   : > { %7699 = vst [vmem:[#allocation89_spill] sm:$0xff] %v6711_v60 }
 0x283   : > { %2226 = vmatmul.mubr.bf16.gmra.mrb[72].mxu0 %v6695_v23  ;;  %2955 = vmatmul.mubr.bf16.gmra.mrb[72].mxu1 %v6695_v23  ;;  %v1285_v23 = vpack.c.bf16 %v816_v54, %v809_v34  ;;  %v837_v34 = vld [vmem:[#allocation5 + $0x800] sm:$0xff]  ;;  %v844_v54 = vld [vmem:[#allocation5 + $0x838] sm:$0xff] }
 0x284   : > { %4752 = vmatprep.mubr.msk.bf16.mxu0 %vm1463_vm0, %v6697_v32  ;;  %4773 = vmatprep.mubr.msk.bf16.mxu1 %vm1463_vm0, %v6697_v32  ;;  %v831_v32 = vld [vmem:[#allocation5 + $0x7d0] sm:$0xff] }
 0x28b   : > { %2236 = vmatmul.mubr.bf16.gmra.mrb[76].mxu0 %v6709_v55  ;;  %2965 = vmatmul.mubr.bf16.gmra.mrb[76].mxu1 %v6709_v55  ;;  %v824_v55 = vld [vmem:[#allocation5 + $0x798] sm:$0xff] }
 0x28c   : > { %4753 = vmatprep.mubr.msk.bf16.mxu0 %vm1463_vm0, %v6711_v60  ;;  %4774 = vmatprep.mubr.msk.bf16.mxu1 %vm1463_vm0, %v6711_v60  ;;  %v830_v60 = vld [vmem:[#allocation5 + $0x7c8] sm:$0xff]  ;;  %v1293_v7 = vpack.c.bf16 %v831_v32, %v824_v55  ;;  %v839_v55 = vld [vmem:[#allocation5 + $0x810] sm:$0xff] }
 0x28d   : > { %v846_v32 = vld [vmem:[#allocation5 + $0x848] sm:$0xff] }
 0x293   : > { %2246 = vmatmul.mubr.bf16.gmra.mrb[80].mxu0 %v6721_v13  ;;  %2975 = vmatmul.mubr.bf16.gmra.mrb[80].mxu1 %v6721_v13  ;;  %v1294_v13 = vpack.c.bf16 %v832_v36, %v825_v20  ;;  %v1307_v36 = vpack.c.bf16 %v859_v26, %v852_v39  ;;  %v879_v26 = vld [vmem:[#allocation5 + $0x950] sm:$0xff] }
 0x294   : > { %3017 = vmatprep.mubr.bf16.mxu0 %v5912_v21  ;;  %3746 = vmatprep.mubr.bf16.mxu1 %v5912_v21  ;;  %v1292_v21 = vpack.c.bf16 %v830_v60, %v823_v38  ;;  %v1301_v38 = vpack.c.bf16 %v846_v32, %v839_v55  ;;  %v873_v60 = vld [vmem:[#allocation5 + $0x920] sm:$0xff]  ;;  %v880_v55 = vld [vmem:[#allocation5 + $0x958] sm:$0xff]  ;;  %v887_v32 = vld [vmem:[#allocation5 + $0x990] sm:$0xff] }
 0x29b   : > { %3018 = vmatmul.mubr.bf16.vlgmr.msra.gmra.mrb[84].mxu0 %v5920_v17  ;;  %3747 = vmatmul.mubr.bf16.vlgmr.msra.gmra.mrb[84].mxu1 %v5920_v17  ;;  %v1299_v17 = vpack.c.bf16 %v844_v54, %v837_v34  ;;  %v867_v34 = vld [vmem:[#allocation5 + $0x8f0] sm:$0xff]  ;;  %v874_v54 = vld [vmem:[#allocation5 + $0x928] sm:$0xff] }
 0x29c   : > { %3229 = vmatpush1.bf16.msra.mxu0 %v1285_v23  ;;  %3916 = vmatpush1.bf16.msra.mxu1 %v1287_v46  ;;  %v860_v46 = vld [vmem:[#allocation5 + $0x8b8] sm:$0xff]  ;;  %v866_v23 = vld [vmem:[#allocation5 + $0x8e8] sm:$0xff]  ;;  %v1315_v39 = vpack.c.bf16 %v874_v54, %v867_v34  ;;  %v907_v54 = vld [vmem:[#allocation5 + $0xa30] sm:$0xff] }
 0x29d   : > { %3027 = vmatprep.mubr.bf16.mxu0 %v5922_v25  ;;  %3754 = vmatprep.mubr.bf16.mxu1 %v5922_v25  ;;  %v853_v25 = vld [vmem:[#allocation5 + $0x880] sm:$0xff]  ;;  %v1314_v20 = vpack.c.bf16 %v873_v60, %v866_v23 }
 0x29e   : > { %3230 = vmatprep.subr.bf16.mxu0 %v1293_v7  ;;  %3917 = vmatprep.subr.bf16.mxu1 %v7670_v44  ;;  %v865_v7 = vld [vmem:[#allocation5 + $0x8e0] sm:$0xff] }
 0x29f   : > { %v893_v60 = vld [vmem:[#allocation5 + $0x9c0] sm:$0xff] }
 0x2a0   : > { %3231 = vmatpush1.bf16.msra.mxu0 %v1292_v21  ;;  %3918 = vmatpush1.bf16.msra.mxu1 %v1294_v13  ;;  %v1308_v13 = vpack.c.bf16 %v860_v46, %v853_v25  ;;  %v872_v21 = vld [vmem:[#allocation5 + $0x918] sm:$0xff] }
 0x2a1   : > { %3232 = vmatprep.subr.bf16.mxu0 %v1300_v15  ;;  %3919 = vmatprep.subr.bf16.mxu1 %v7670_v44  ;;  %v1306_v15 = vpack.c.bf16 %v858_v27, %v851_v42  ;;  %v894_v42 = vld [vmem:[#allocation5 + $0x9c8] sm:$0xff]  ;;  %v901_v27 = vld [vmem:[#allocation5 + $0xa00] sm:$0xff] }
 0x2a2   : > { %v1328_v23 = vpack.c.bf16 %v901_v27, %v894_v42  ;;  %v928_v42 = vld [vmem:[#allocation5 + $0xad8] sm:$0xff]  ;;  %v923_v27 = vld [vmem:[#allocation5 + $0xab0] sm:$0xff] }
 0x2a3   : > { %3028 = vmatmul.mubr.bf16.gmra.mrb[88].mxu0 %v5932_v47  ;;  %3755 = vmatmul.mubr.bf16.gmra.mrb[88].mxu1 %v5932_v47  ;;  %v1313_v47 = vpack.c.bf16 %v872_v21, %v865_v7  ;;  %v908_v7 = vld [vmem:[#allocation5 + $0xa38] sm:$0xff]  ;;  %v915_v21 = vld [vmem:[#allocation5 + $0xa70] sm:$0xff] }
 0x2a4   : > { %3037 = vmatprep.mubr.bf16.mxu0 %v5934_v51  ;;  %3762 = vmatprep.mubr.bf16.mxu1 %v5934_v51  ;;  %v1321_v51 = vpack.c.bf16 %v887_v32, %v880_v55  ;;  %v914_v55 = vld [vmem:[#allocation5 + $0xa68] sm:$0xff]  ;;  %v909_v32 = vld [vmem:[#allocation5 + $0xa40] sm:$0xff] }
 0x2a5   : > { %3233 = vmatpush1.bf16.msra.mxu0 %v1299_v17  ;;  %3920 = vmatpush1.bf16.msra.mxu1 %v1301_v38  ;;  %v886_v17 = vld [vmem:[#allocation5 + $0x988] sm:$0xff]  ;;  %v881_v38 = vld [vmem:[#allocation5 + $0x960] sm:$0xff] }
 0x2a6   : > { %3234 = vmatprep.subr.bf16.mxu0 %v1307_v36  ;;  %3921 = vmatprep.subr.bf16.mxu1 %v7670_v44  ;;  %v888_v36 = vld [vmem:[#allocation5 + $0x998] sm:$0xff]  ;;  %v1320_v25 = vpack.c.bf16 %v886_v17, %v879_v26  ;;  %v1334_v26 = vpack.c.bf16 %v914_v55, %v907_v54  ;;  %v949_v55 = vld [vmem:[#allocation5 + $0xb80] sm:$0xff] }
 0x2a7   : > { %v1322_v46 = vpack.c.bf16 %v888_v36, %v881_v38  ;;  %v921_v36 = vld [vmem:[#allocation5 + $0xaa0] sm:$0xff] }
 0x2a9   : > { %3235 = vmatpush1.bf16.msra.mxu0 %v1306_v15  ;;  %3922 = vmatpush1.bf16.msra.mxu1 %v1308_v13  ;;  %v900_v15 = vld [vmem:[#allocation5 + $0x9f8] sm:$0xff]  ;;  %v895_v13 = vld [vmem:[#allocation5 + $0x9d0] sm:$0xff] }
 0x2aa   : > { %3236 = vmatprep.subr.bf16.mxu0 %v1314_v20  ;;  %3923 = vmatprep.subr.bf16.mxu1 %v7670_v44  ;;  %v902_v20 = vld [vmem:[#allocation5 + $0xa08] sm:$0xff] }
 0x2ab   : > { %3038 = vmatmul.mubr.bf16.gmra.mrb[92].mxu0 %v5944_v12  ;;  %3763 = vmatmul.mubr.bf16.gmra.mrb[92].mxu1 %v5944_v12  ;;  %v1327_v12 = vpack.c.bf16 %v900_v15, %v893_v60  ;;  %v1329_v34 = vpack.c.bf16 %v902_v20, %v895_v13  ;;  %v935_v15 = vld [vmem:[#allocation5 + $0xb10] sm:$0xff]  ;;  %v942_v13 = vld [vmem:[#allocation5 + $0xb48] sm:$0xff]  ;;  %v937_v20 = vld [vmem:[#allocation5 + $0xb20] sm:$0xff] }
 0x2ac   : > { %3047 = vmatprep.mubr.bf16.mxu0 %v5946_v18  ;;  %3770 = vmatprep.mubr.bf16.mxu1 %v5946_v18  ;;  %v1335_v18 = vpack.c.bf16 %v915_v21, %v908_v7  ;;  %v944_v7 = vld [vmem:[#allocation5 + $0xb58] sm:$0xff]  ;;  %v950_v21 = vld [vmem:[#allocation5 + $0xb88] sm:$0xff] }
 0x2ad   : > { %3237 = vmatpush1.bf16.msra.mxu0 %v1313_v47  ;;  %3924 = vmatpush1.bf16.msra.mxu1 %v1315_v39  ;;  %v916_v47 = vld [vmem:[#allocation5 + $0xa78] sm:$0xff]  ;;  %v922_v39 = vld [vmem:[#allocation5 + $0xaa8] sm:$0xff] }
 0x2ae   : > { %3238 = vmatprep.subr.bf16.mxu0 %v1321_v51  ;;  %3925 = vmatprep.subr.bf16.mxu1 %v7670_v44  ;;  %v929_v51 = vld [vmem:[#allocation5 + $0xae0] sm:$0xff]  ;;  %v1336_v17 = vpack.c.bf16 %v916_v47, %v909_v32  ;;  %v956_v32 = vld [vmem:[#allocation5 + $0xbb8] sm:$0xff]  ;;  %v951_v47 = vld [vmem:[#allocation5 + $0xb90] sm:$0xff] }
 0x2af   : > { %v1342_v38 = vpack.c.bf16 %v929_v51, %v922_v39  ;;  %v958_v39 = vld [vmem:[#allocation5 + $0xbc8] sm:$0xff]  ;;  %v964_v51 = vld [vmem:[#allocation5 + $0xbf8] sm:$0xff] }
 0x2b1   : > { %3239 = vmatpush1.bf16.msra.mxu0 %v1320_v25  ;;  %3926 = vmatpush1.bf16.msra.mxu1 %v1322_v46  ;;  %v930_v25 = vld [vmem:[#allocation5 + $0xae8] sm:$0xff]  ;;  %v936_v46 = vld [vmem:[#allocation5 + $0xb18] sm:$0xff] }
 0x2b2   : > { %3240 = vmatprep.subr.bf16.mxu0 %v1328_v23  ;;  %3927 = vmatprep.subr.bf16.mxu1 %v7670_v44  ;;  %v943_v23 = vld [vmem:[#allocation5 + $0xb50] sm:$0xff]  ;;  %v1343_v60 = vpack.c.bf16 %v930_v25, %v923_v27  ;;  %v972_v27 = vld [vmem:[#allocation5 + $0xc38] sm:$0xff]  ;;  %v978_v25 = vld [vmem:[#allocation5 + $0xc68] sm:$0xff] }
 0x2b3   : > { %3048 = vmatmul.mubr.bf16.gmra.mrb[96].mxu0 %v5956_v45  ;;  %3771 = vmatmul.mubr.bf16.gmra.mrb[96].mxu1 %v5956_v45  ;;  %v1341_v45 = vpack.c.bf16 %v928_v42, %v921_v36  ;;  %v970_v36 = vld [vmem:[#allocation5 + $0xc28] sm:$0xff]  ;;  %v965_v42 = vld [vmem:[#allocation5 + $0xc00] sm:$0xff] }
 0x2b4   : > { %3057 = vmatprep.mubr.bf16.mxu0 %v5958_v52  ;;  %3778 = vmatprep.mubr.bf16.mxu1 %v5958_v52  ;;  %v1349_v52 = vpack.c.bf16 %v943_v23, %v936_v46  ;;  %v985_v46 = vld [vmem:[#allocation5 + $0xca0] sm:$0xff] }
 0x2b5   : > { %3241 = vmatpush1.bf16.msra.mxu0 %v1327_v12  ;;  %3928 = vmatpush1.bf16.msra.mxu1 %v1329_v34  ;;  %v957_v12 = vld [vmem:[#allocation5 + $0xbc0] sm:$0xff]  ;;  %v1348_v34 = vpack.c.bf16 %v942_v13, %v935_v15  ;;  %v984_v13 = vld [vmem:[#allocation5 + $0xc98] sm:$0xff] }
 0x2b6   : > { %3242 = vmatprep.subr.bf16.mxu0 %v1335_v18  ;;  %3929 = vmatprep.subr.bf16.mxu1 %v7670_v44  ;;  %v1350_v18 = vpack.c.bf16 %v944_v7, %v937_v20  ;;  %v1356_v54 = vpack.c.bf16 %v957_v12, %v950_v21  ;;  %v977_v15 = vld [vmem:[#allocation5 + $0xc60] sm:$0xff]  ;;  %v979_v20 = vld [vmem:[#allocation5 + $0xc70] sm:$0xff]  ;;  %v986_v7 = vld [vmem:[#allocation5 + $0xca8] sm:$0xff] }
 0x2b7   : > { %v992_v21 = vld [vmem:[#allocation5 + $0xcd8] sm:$0xff]  ;;  %v999_v12 = vld [vmem:[#allocation5 + $0xd10] sm:$0xff] }
 0x2b9   : > { %3243 = vmatpush1.bf16.msra.mxu0 %v1334_v26  ;;  %3930 = vmatpush1.bf16.msra.mxu1 %v1336_v17  ;;  %v971_v26 = vld [vmem:[#allocation5 + $0xc30] sm:$0xff] }
 0x2ba   : > { %3244 = vmatprep.subr.bf16.mxu0 %v1342_v38  ;;  %3931 = vmatprep.subr.bf16.mxu1 %v7670_v44  ;;  %v1363_v17 = vpack.c.bf16 %v971_v26, %v964_v51  ;;  %v963_v38 = vld [vmem:[#allocation5 + $0xbf0] sm:$0xff]  ;;  %v1377_v51 = vpack.c.bf16 %v999_v12, %v992_v21 }
 0x2bb   : > { %3058 = vmatmul.mubr.bf16.gmra.mrb[100].mxu0 %v5968_v14  ;;  %3779 = vmatmul.mubr.bf16.gmra.mrb[100].mxu1 %v5968_v14  ;;  %v1355_v14 = vpack.c.bf16 %v956_v32, %v949_v55  ;;  %v1362_v23 = vpack.c.bf16 %v970_v36, %v963_v38  ;;  %v1369_v32 = vpack.c.bf16 %v984_v13, %v977_v15  ;;  %v991_v26 = vld [vmem:[#allocation5 + $0xcd0] sm:$0xff]  ;;  %v1006_v38 = vld [vmem:[#allocation5 + $0xd48] sm:$0xff]  ;;  %v1013_v36 = vld [vmem:[#allocation5 + $0xd80] sm:$0xff] }
 0x2bc   : > { %3067 = vmatprep.mubr.bf16.mxu0 %v5970_v22  ;;  %3786 = vmatprep.mubr.bf16.mxu1 %v5970_v22  ;;  %v1357_v22 = vpack.c.bf16 %v958_v39, %v951_v47  ;;  %v1371_v39 = vpack.c.bf16 %v986_v7, %v979_v20  ;;  %v1020_v15 = vld [vmem:[#allocation5 + $0xdb8] sm:$0xff]  ;;  %v1027_v13 = vld [vmem:[#allocation5 + $0xdf0] sm:$0xff] }
 0x2bd   : > { %3245 = vmatpush1.bf16.msra.mxu0 %v1341_v45  ;;  %3932 = vmatpush1.bf16.msra.mxu1 %v1343_v60  ;;  %v1364_v60 = vpack.c.bf16 %v972_v27, %v965_v42 }
 0x2be   : > { %3246 = vmatprep.subr.bf16.mxu0 %v1349_v52  ;;  %3933 = vmatprep.subr.bf16.mxu1 %v7670_v44  ;;  %v1370_v52 = vpack.c.bf16 %v985_v46, %v978_v25  ;;  %v1384_v46 = vpack.c.bf16 %v1013_v36, %v1006_v38 }
 0x2c1   : > { %3247 = vmatpush1.bf16.msra.mxu0 %v1348_v34  ;;  %3934 = vmatpush1.bf16.msra.mxu1 %v1350_v18 }
 0x2c2   : > { %3248 = vmatprep.subr.bf16.mxu0 %v1356_v54  ;;  %3935 = vmatprep.subr.bf16.mxu1 %v7670_v44 }
 0x2c3   : > { %3068 = vmatmul.mubr.bf16.gmra.mrb[104].mxu0 %v5980_v50  ;;  %3787 = vmatmul.mubr.bf16.gmra.mrb[104].mxu1 %v5980_v50 }
 0x2c4   : > { %3077 = vmatprep.mubr.bf16.mxu0 %v5982_v57  ;;  %3794 = vmatprep.mubr.bf16.mxu1 %v5982_v57 }
 0x2c5   : > { %3249 = vmatpush1.bf16.msra.mxu0 %v1355_v14  ;;  %3936 = vmatpush1.bf16.msra.mxu1 %v1357_v22  ;;  %v998_v14 = vld [vmem:[#allocation5 + $0xd08] sm:$0xff]  ;;  %v993_v22 = vld [vmem:[#allocation5 + $0xce0] sm:$0xff] }
 0x2c6   : > { %v2047_v45 = vpop.f32.mrb[0].mxu0  ;;  %3250 = vmatprep.subr.bf16.mxu0 %v1363_v17  ;;  %v2776_v50 = vpop.f32.mrb[0].mxu1  ;;  %3937 = vmatprep.subr.bf16.mxu1 %v7670_v44  ;;  %v1000_v17 = vld [vmem:[#allocation5 + $0xd18] sm:$0xff]  ;;  %v1376_v42 = vpack.c.bf16 %v998_v14, %v991_v26 }
 0x2c7   : > { %4317 = vst [vmem:[%s6762_s19] sm:$0xff] %v2047_v45  ;;  %v2049_v57 = vpop.f32.mrb[1].mxu0  ;;  %4319 = vst [vmem:[%s6762_s19 + $0x10] sm:$0xff] %v2776_v50  ;;  %v2778_v34 = vpop.f32.mrb[1].mxu1  ;;  %v1378_v25 = vpack.c.bf16 %v1000_v17, %v993_v22  ;;  %v1012_v45 = vld [vmem:[#allocation5 + $0xd78] sm:$0xff] }
 0x2c8   : > { %4318 = vst [vmem:[%s6762_s19 + $0x8] sm:$0xff] %v2049_v57  ;;  %v2051_v18 = vpop.f32.mrb[2].mxu0  ;;  %4320 = vst [vmem:[%s6762_s19 + $0x18] sm:$0xff] %v2778_v34  ;;  %v2780_v54 = vpop.f32.mrb[2].mxu1 }
 0x2c9   : > { %4325 = vst [vmem:[%s6762_s19 + $0x38] sm:$0xff] %v2051_v18  ;;  %v2053_v55 = vpop.f32.mrb[3].mxu0  ;;  %3251 = vmatpush1.bf16.msra.mxu0 %v1362_v23  ;;  %4327 = vst [vmem:[%s6762_s19 + $0x48] sm:$0xff] %v2780_v54  ;;  %v2782_v47 = vpop.f32.mrb[3].mxu1  ;;  %3938 = vmatpush1.bf16.msra.mxu1 %v1364_v60  ;;  %v1005_v23 = vld [vmem:[#allocation5 + $0xd40] sm:$0xff]  ;;  %v1007_v60 = vld [vmem:[#allocation5 + $0xd50] sm:$0xff]  ;;  %v1391_v18 = vpack.c.bf16 %v1027_v13, %v1020_v15 }
 0x2ca   : > { %4326 = vst [vmem:[%s6762_s19 + $0x40] sm:$0xff] %v2053_v55  ;;  %3252 = vmatprep.subr.bf16.mxu0 %v1370_v52  ;;  %4328 = vst [vmem:[%s6762_s19 + $0x50] sm:$0xff] %v2782_v47  ;;  %3939 = vmatprep.subr.bf16.mxu1 %v7670_v44  ;;  %v1383_v21 = vpack.c.bf16 %v1012_v45, %v1005_v23  ;;  %v1019_v54 = vld [vmem:[#allocation5 + $0xdb0] sm:$0xff]  ;;  %v1026_v55 = vld [vmem:[#allocation5 + $0xde8] sm:$0xff] }
 0x2cb   : > { %3078 = vmatmul.mubr.bf16.gmra.mrb[108].mxu0 %v5992_v24  ;;  %3795 = vmatmul.mubr.bf16.gmra.mrb[108].mxu1 %v5992_v24  ;;  %v1028_v47 = vld [vmem:[#allocation5 + $0xdf8] sm:$0xff]  ;;  %v1390_v26 = vpack.c.bf16 %v1026_v55, %v1019_v54 }
 0x2cc   : > { %3087 = vmatprep.mubr.bf16.mxu0 %v5994_v30  ;;  %3802 = vmatprep.mubr.bf16.mxu1 %v5994_v30  ;;  %v1014_v30 = vld [vmem:[#allocation5 + $0xd88] sm:$0xff] }
 0x2cd   : > { %3253 = vmatpush1.bf16.msra.mxu0 %v1369_v32  ;;  %3940 = vmatpush1.bf16.msra.mxu1 %v1371_v39  ;;  %v1385_v34 = vpack.c.bf16 %v1014_v30, %v1007_v60  ;;  %v1021_v32 = vld [vmem:[#allocation5 + $0xdc0] sm:$0xff]  ;;  %v1034_v39 = vld [vmem:[#allocation5 + $0xe28] sm:$0xff] }
 0x2ce   : > { %v2057_v27 = vpop.f32.mrb[4].mxu0  ;;  %3254 = vmatprep.subr.bf16.mxu0 %v1377_v51  ;;  %v2786_v24 = vpop.f32.mrb[4].mxu1  ;;  %3941 = vmatprep.subr.bf16.mxu1 %v7670_v44  ;;  %v1041_v51 = vld [vmem:[#allocation5 + $0xe60] sm:$0xff]  ;;  %v1392_v22 = vpack.c.bf16 %v1028_v47, %v1021_v32 }
 0x2cf   : > { %4332 = vst [vmem:[%s6762_s19 + $0x70] sm:$0xff] %v2057_v27  ;;  %v2059_v52 = vpop.f32.mrb[5].mxu0  ;;  %4334 = vst [vmem:[%s6762_s19 + $0x80] sm:$0xff] %v2786_v24  ;;  %v2788_v20 = vpop.f32.mrb[5].mxu1  ;;  %v1398_v17 = vpack.c.bf16 %v1041_v51, %v1034_v39 }
 0x2d0   : > { %4333 = vst [vmem:[%s6762_s19 + $0x78] sm:$0xff] %v2059_v52  ;;  %v2061_v50 = vpop.f32.mrb[6].mxu0  ;;  %4335 = vst [vmem:[%s6762_s19 + $0x88] sm:$0xff] %v2788_v20  ;;  %v2790_v57 = vpop.f32.mrb[6].mxu1 }
 0x2d1   : > { %4339 = vst [vmem:[%s6762_s19 + $0xa8] sm:$0xff] %v2061_v50  ;;  %v2063_v7 = vpop.f32.mrb[7].mxu0  ;;  %3255 = vmatpush1.bf16.msra.mxu0 %v1376_v42  ;;  %4341 = vst [vmem:[%s6762_s19 + $0xb8] sm:$0xff] %v2790_v57  ;;  %v2792_v12 = vpop.f32.mrb[7].mxu1  ;;  %3942 = vmatpush1.bf16.msra.mxu1 %v1378_v25 }
 0x2d2   : > { %4340 = vst [vmem:[%s6762_s19 + $0xb0] sm:$0xff] %v2063_v7  ;;  %3256 = vmatprep.subr.bf16.mxu0 %v1384_v46  ;;  %4342 = vst [vmem:[%s6762_s19 + $0xc0] sm:$0xff] %v2792_v12  ;;  %3943 = vmatprep.subr.bf16.mxu1 %v7670_v44 }
 0x2d3   : > { %3088 = vmatmul.mubr.bf16.gmra.mrb[112].mxu0 %v6004_v61  ;;  %3803 = vmatmul.mubr.bf16.gmra.mrb[112].mxu1 %v6004_v61 }
 0x2d4   : > { %3097 = vmatprep.mubr.bf16.mxu0 %v6006_v2  ;;  %3810 = vmatprep.mubr.bf16.mxu1 %v6006_v2 }
 0x2d5   : > { %3257 = vmatpush1.bf16.msra.mxu0 %v1383_v21  ;;  %3944 = vmatpush1.bf16.msra.mxu1 %v1385_v34 }
 0x2d6   : > { %v2067_v14 = vpop.f32.mrb[8].mxu0  ;;  %3258 = vmatprep.subr.bf16.mxu0 %v1391_v18  ;;  %v2796_v38 = vpop.f32.mrb[8].mxu1  ;;  %3945 = vmatprep.subr.bf16.mxu1 %v7670_v44 }
 0x2d7   : > { %4346 = vst [vmem:[%s6762_s19 + $0xe0] sm:$0xff] %v2067_v14  ;;  %v2069_v36 = vpop.f32.mrb[9].mxu0  ;;  %4348 = vst [vmem:[%s6762_s19 + $0xf0] sm:$0xff] %v2796_v38  ;;  %v2798_v61 = vpop.f32.mrb[9].mxu1 }
 0x2d8   : > { %4347 = vst [vmem:[%s6762_s19 + $0xe8] sm:$0xff] %v2069_v36  ;;  %v2071_v2 = vpop.f32.mrb[10].mxu0  ;;  %4349 = vst [vmem:[%s6762_s19 + $0xf8] sm:$0xff] %v2798_v61  ;;  %v2800_v42 = vpop.f32.mrb[10].mxu1 }
 0x2d9   : > { %4353 = vst [vmem:[%s6762_s19 + $0x118] sm:$0xff] %v2071_v2  ;;  %v2073_v27 = vpop.f32.mrb[11].mxu0  ;;  %3259 = vmatpush1.bf16.msra.mxu0 %v1390_v26  ;;  %4355 = vst [vmem:[%s6762_s19 + $0x128] sm:$0xff] %v2800_v42  ;;  %v2802_v25 = vpop.f32.mrb[11].mxu1  ;;  %3946 = vmatpush1.bf16.msra.mxu1 %v1392_v22 }
 0x2da   : > { %4354 = vst [vmem:[%s6762_s19 + $0x120] sm:$0xff] %v2073_v27  ;;  %3471 = vmatprep.subr.bf16.mxu0 %v1398_v17  ;;  %4356 = vst [vmem:[%s6762_s19 + $0x130] sm:$0xff] %v2802_v25  ;;  %4116 = vmatprep.subr.bf16.mxu1 %v7670_v44 }
 0x2db   : > { %3098 = vmatmul.mubr.bf16.gmra.mrb[116].mxu0 %v6016_v33  ;;  %3811 = vmatmul.mubr.bf16.gmra.mrb[116].mxu1 %v6016_v33 }
 0x2dc   : > { %3107 = vmatprep.mubr.bf16.mxu0 %v6018_v35  ;;  %3818 = vmatprep.mubr.bf16.mxu1 %v6018_v35 }
 0x2de   : > { %v2077_v46 = vpop.f32.mrb[12].mxu0  ;;  %v2806_v23 = vpop.f32.mrb[12].mxu1 }
 0x2df   : > { %4360 = vst [vmem:[%s6762_s19 + $0x150] sm:$0xff] %v2077_v46  ;;  %v2079_v45 = vpop.f32.mrb[13].mxu0  ;;  %4362 = vst [vmem:[%s6762_s19 + $0x160] sm:$0xff] %v2806_v23  ;;  %v2808_v60 = vpop.f32.mrb[13].mxu1 }
 0x2e0   : > { %4361 = vst [vmem:[%s6762_s19 + $0x158] sm:$0xff] %v2079_v45  ;;  %v2081_v24 = vpop.f32.mrb[14].mxu0  ;;  %4363 = vst [vmem:[%s6762_s19 + $0x168] sm:$0xff] %v2808_v60  ;;  %v2810_v33 = vpop.f32.mrb[14].mxu1 }
 0x2e1   : > { %4367 = vst [vmem:[%s6762_s19 + $0x188] sm:$0xff] %v2081_v24  ;;  %v2083_v52 = vpop.f32.mrb[15].mxu0  ;;  %4369 = vst [vmem:[%s6762_s19 + $0x198] sm:$0xff] %v2810_v33  ;;  %v2812_v35 = vpop.f32.mrb[15].mxu1 }
 0x2e2   : > { %4368 = vst [vmem:[%s6762_s19 + $0x190] sm:$0xff] %v2083_v52  ;;  %4370 = vst [vmem:[%s6762_s19 + $0x1a0] sm:$0xff] %v2812_v35 }
 0x2e3   : > { %3108 = vmatmul.mubr.bf16.gmra.mrb[120].mxu0 %v6028_v40  ;;  %3819 = vmatmul.mubr.bf16.gmra.mrb[120].mxu1 %v6028_v40 }
 0x2e4   : > { %3117 = vmatprep.mubr.bf16.mxu0 %v6030_v41  ;;  %3826 = vmatprep.mubr.bf16.mxu1 %v6030_v41 }
 0x2e6   : > { %v2087_v30 = vpop.f32.mrb[16].mxu0  ;;  %v2816_v15 = vpop.f32.mrb[16].mxu1 }
 0x2e7   : > { %4374 = vst [vmem:[%s6762_s19 + $0x1c0] sm:$0xff] %v2087_v30  ;;  %v2089_v13 = vpop.f32.mrb[17].mxu0  ;;  %4376 = vst [vmem:[%s6762_s19 + $0x1d0] sm:$0xff] %v2816_v15  ;;  %v2818_v20 = vpop.f32.mrb[17].mxu1 }
 0x2e8   : > { %4375 = vst [vmem:[%s6762_s19 + $0x1c8] sm:$0xff] %v2089_v13  ;;  %v2091_v50 = vpop.f32.mrb[18].mxu0  ;;  %4377 = vst [vmem:[%s6762_s19 + $0x1d8] sm:$0xff] %v2818_v20  ;;  %v2820_v40 = vpop.f32.mrb[18].mxu1 }
 0x2e9   : > { %4381 = vst [vmem:[%s6762_s19 + $0x1f8] sm:$0xff] %v2091_v50  ;;  %v2093_v57 = vpop.f32.mrb[19].mxu0  ;;  %4383 = vst [vmem:[%s6762_s19 + $0x208] sm:$0xff] %v2820_v40  ;;  %v2822_v41 = vpop.f32.mrb[19].mxu1 }
 0x2ea   : > { %4382 = vst [vmem:[%s6762_s19 + $0x200] sm:$0xff] %v2093_v57  ;;  %4384 = vst [vmem:[%s6762_s19 + $0x210] sm:$0xff] %v2822_v41  ;;  %v7701_v57 = vld [vmem:[#allocation11_spill] sm:$0xff] }
 0x2eb   : > { %3118 = vmatmul.mubr.bf16.gmra.mrb[124].mxu0 %v6040_v48  ;;  %3827 = vmatmul.mubr.bf16.gmra.mrb[124].mxu1 %v6040_v48 }
 0x2ec   : > { %3127 = vmatprep.mubr.bf16.mxu0 %v6042_v49  ;;  %3834 = vmatprep.mubr.bf16.mxu1 %v6042_v49 }
 0x2ee   : > { %v2097_v7 = vpop.f32.mrb[20].mxu0  ;;  %v2826_v21 = vpop.f32.mrb[20].mxu1 }
 0x2ef   : > { %4388 = vst [vmem:[%s6762_s19 + $0x230] sm:$0xff] %v2097_v7  ;;  %v2099_v12 = vpop.f32.mrb[21].mxu0  ;;  %4390 = vst [vmem:[%s6762_s19 + $0x240] sm:$0xff] %v2826_v21  ;;  %v2828_v34 = vpop.f32.mrb[21].mxu1 }
 0x2f0   : > { %4389 = vst [vmem:[%s6762_s19 + $0x238] sm:$0xff] %v2099_v12  ;;  %v2101_v18 = vpop.f32.mrb[22].mxu0  ;;  %4391 = vst [vmem:[%s6762_s19 + $0x248] sm:$0xff] %v2828_v34  ;;  %v2830_v48 = vpop.f32.mrb[22].mxu1 }
 0x2f1   : > { %4395 = vst [vmem:[%s6762_s19 + $0x268] sm:$0xff] %v2101_v18  ;;  %v2103_v54 = vpop.f32.mrb[23].mxu0  ;;  %4397 = vst [vmem:[%s6762_s19 + $0x278] sm:$0xff] %v2830_v48  ;;  %v2832_v49 = vpop.f32.mrb[23].mxu1 }
 0x2f2   : > { %4396 = vst [vmem:[%s6762_s19 + $0x270] sm:$0xff] %v2103_v54  ;;  %4398 = vst [vmem:[%s6762_s19 + $0x280] sm:$0xff] %v2832_v49  ;;  %v7702_v54 = vld [vmem:[#allocation12_spill] sm:$0xff]  ;;  %v7703_v49 = vld [vmem:[#allocation13_spill] sm:$0xff] }
 0x2f3   : > { %3128 = vmatmul.mubr.bf16.gmra.mrb[128].mxu0 %v6052_v58  ;;  %3835 = vmatmul.mubr.bf16.gmra.mrb[128].mxu1 %v6052_v58 }
 0x2f4   : > { %3137 = vmatprep.mubr.bf16.mxu0 %v6054_v59  ;;  %3842 = vmatprep.mubr.bf16.mxu1 %v6054_v59 }
 0x2f6   : > { %v2107_v55 = vpop.f32.mrb[24].mxu0  ;;  %v2836_v32 = vpop.f32.mrb[24].mxu1 }
 0x2f7   : > { %4402 = vst [vmem:[%s6762_s19 + $0x2a0] sm:$0xff] %v2107_v55  ;;  %v2109_v47 = vpop.f32.mrb[25].mxu0  ;;  %4404 = vst [vmem:[%s6762_s19 + $0x2b0] sm:$0xff] %v2836_v32  ;;  %v2838_v39 = vpop.f32.mrb[25].mxu1 }
 0x2f8   : > { %4403 = vst [vmem:[%s6762_s19 + $0x2a8] sm:$0xff] %v2109_v47  ;;  %v2111_v51 = vpop.f32.mrb[26].mxu0  ;;  %4405 = vst [vmem:[%s6762_s19 + $0x2b8] sm:$0xff] %v2838_v39  ;;  %v2840_v58 = vpop.f32.mrb[26].mxu1 }
 0x2f9   : > { %4409 = vst [vmem:[%s6762_s19 + $0x2d8] sm:$0xff] %v2111_v51  ;;  %v2113_v26 = vpop.f32.mrb[27].mxu0  ;;  %4411 = vst [vmem:[%s6762_s19 + $0x2e8] sm:$0xff] %v2840_v58  ;;  %v2842_v59 = vpop.f32.mrb[27].mxu1 }
 0x2fa   : > { %4410 = vst [vmem:[%s6762_s19 + $0x2e0] sm:$0xff] %v2113_v26  ;;  %4412 = vst [vmem:[%s6762_s19 + $0x2f0] sm:$0xff] %v2842_v59 }
 0x2fb   : > { %3138 = vmatmul.mubr.bf16.gmra.mrb[132].mxu0 %v6064_v1  ;;  %3843 = vmatmul.mubr.bf16.gmra.mrb[132].mxu1 %v6064_v1 }
 0x2fc   : > { %3147 = vmatprep.mubr.bf16.mxu0 %v6066_v3  ;;  %3850 = vmatprep.mubr.bf16.mxu1 %v6066_v3 }
 0x2fe   : > { %v2117_v14 = vpop.f32.mrb[28].mxu0  ;;  %v2846_v22 = vpop.f32.mrb[28].mxu1 }
 0x2ff   : > { %4416 = vst [vmem:[%s6762_s19 + $0x310] sm:$0xff] %v2117_v14  ;;  %v2119_v17 = vpop.f32.mrb[29].mxu0  ;;  %4418 = vst [vmem:[%s6762_s19 + $0x320] sm:$0xff] %v2846_v22  ;;  %v2848_v38 = vpop.f32.mrb[29].mxu1  ;;  %v7704_v14 = vld [vmem:[#allocation14_spill] sm:$0xff]  ;;  %v7705_v22 = vld [vmem:[#allocation15_spill] sm:$0xff] }
 0x300   : > { %4417 = vst [vmem:[%s6762_s19 + $0x318] sm:$0xff] %v2119_v17  ;;  %v2121_v36 = vpop.f32.mrb[30].mxu0  ;;  %4419 = vst [vmem:[%s6762_s19 + $0x328] sm:$0xff] %v2848_v38  ;;  %v2850_v1 = vpop.f32.mrb[30].mxu1 }
 0x301   : > { %4423 = vst [vmem:[%s6762_s19 + $0x348] sm:$0xff] %v2121_v36  ;;  %v2123_v61 = vpop.f32.mrb[31].mxu0  ;;  %4425 = vst [vmem:[%s6762_s19 + $0x358] sm:$0xff] %v2850_v1  ;;  %v2852_v3 = vpop.f32.mrb[31].mxu1 }
 0x302   : > { %4424 = vst [vmem:[%s6762_s19 + $0x350] sm:$0xff] %v2123_v61  ;;  %4426 = vst [vmem:[%s6762_s19 + $0x360] sm:$0xff] %v2852_v3 }
 0x303   : > { %3148 = vmatmul.mubr.bf16.gmra.mrb[136].mxu0 %v6076_v8  ;;  %3851 = vmatmul.mubr.bf16.gmra.mrb[136].mxu1 %v6076_v8 }
 0x304   : > { %3157 = vmatprep.mubr.bf16.mxu0 %v6078_v9  ;;  %3858 = vmatprep.mubr.bf16.mxu1 %v6078_v9 }
 0x306   : > { %v2127_v2 = vpop.f32.mrb[32].mxu0  ;;  %v2856_v42 = vpop.f32.mrb[32].mxu1 }
 0x307   : > { %4430 = vst [vmem:[%s6762_s19 + $0x380] sm:$0xff] %v2127_v2  ;;  %v2129_v27 = vpop.f32.mrb[33].mxu0  ;;  %4432 = vst [vmem:[%s6762_s19 + $0x390] sm:$0xff] %v2856_v42  ;;  %v2858_v25 = vpop.f32.mrb[33].mxu1 }
 0x308   : > { %4431 = vst [vmem:[%s6762_s19 + $0x388] sm:$0xff] %v2129_v27  ;;  %v2131_v46 = vpop.f32.mrb[34].mxu0  ;;  %4433 = vst [vmem:[%s6762_s19 + $0x398] sm:$0xff] %v2858_v25  ;;  %v2860_v8 = vpop.f32.mrb[34].mxu1  ;;  %v7706_v27 = vld [vmem:[#allocation16_spill] sm:$0xff]  ;;  %v7707_v25 = vld [vmem:[#allocation17_spill] sm:$0xff] }
 0x309   : > { %4437 = vst [vmem:[%s6762_s19 + $0x3b8] sm:$0xff] %v2131_v46  ;;  %v2133_v23 = vpop.f32.mrb[35].mxu0  ;;  %4439 = vst [vmem:[%s6762_s19 + $0x3c8] sm:$0xff] %v2860_v8  ;;  %v2862_v9 = vpop.f32.mrb[35].mxu1 }
 0x30a   : > { %4438 = vst [vmem:[%s6762_s19 + $0x3c0] sm:$0xff] %v2133_v23  ;;  %4440 = vst [vmem:[%s6762_s19 + $0x3d0] sm:$0xff] %v2862_v9 }
 0x30b   : > { %3158 = vmatmul.mubr.bf16.gmra.mrb[140].mxu0 %v6088_v16  ;;  %3859 = vmatmul.mubr.bf16.gmra.mrb[140].mxu1 %v6088_v16 }
 0x30c   : > { %3167 = vmatprep.mubr.bf16.mxu0 %v6090_v19  ;;  %3866 = vmatprep.mubr.bf16.mxu1 %v6090_v19 }
 0x30e   : > { %v2137_v45 = vpop.f32.mrb[36].mxu0  ;;  %v2866_v60 = vpop.f32.mrb[36].mxu1 }
 0x30f   : > { %4444 = vst [vmem:[%s6762_s19 + $0x3f0] sm:$0xff] %v2137_v45  ;;  %v2139_v24 = vpop.f32.mrb[37].mxu0  ;;  %4446 = vst [vmem:[%s6762_s19 + $0x400] sm:$0xff] %v2866_v60  ;;  %v2868_v33 = vpop.f32.mrb[37].mxu1 }
 0x310   : > { %4445 = vst [vmem:[%s6762_s19 + $0x3f8] sm:$0xff] %v2139_v24  ;;  %v2141_v52 = vpop.f32.mrb[38].mxu0  ;;  %4447 = vst [vmem:[%s6762_s19 + $0x408] sm:$0xff] %v2868_v33  ;;  %v2870_v16 = vpop.f32.mrb[38].mxu1 }
 0x311   : > { %4451 = vst [vmem:[%s6762_s19 + $0x428] sm:$0xff] %v2141_v52  ;;  %v2143_v35 = vpop.f32.mrb[39].mxu0  ;;  %4453 = vst [vmem:[%s6762_s19 + $0x438] sm:$0xff] %v2870_v16  ;;  %v2872_v19 = vpop.f32.mrb[39].mxu1  ;;  %v7708_v52 = vld [vmem:[#allocation18_spill] sm:$0xff]  ;;  %v7709_v16 = vld [vmem:[#allocation19_spill] sm:$0xff] }
 0x312   : > { %4452 = vst [vmem:[%s6762_s19 + $0x430] sm:$0xff] %v2143_v35  ;;  %4454 = vst [vmem:[%s6762_s19 + $0x440] sm:$0xff] %v2872_v19  ;;  %v1033_v35 = vld [vmem:[#allocation5 + $0xe20] sm:$0xff]  ;;  %v1040_v19 = vld [vmem:[#allocation5 + $0xe58] sm:$0xff] }
 0x313   : > { %3168 = vmatmul.mubr.bf16.gmra.mrb[144].mxu0 %v6100_v28  ;;  %3867 = vmatmul.mubr.bf16.gmra.mrb[144].mxu1 %v6100_v28 }
 0x314   : > { %3177 = vmatprep.mubr.bf16.mxu0 %v6102_v29  ;;  %3874 = vmatprep.mubr.bf16.mxu1 %v6102_v29 }
 0x316   : > { %v2147_v30 = vpop.f32.mrb[40].mxu0  ;;  %v2876_v15 = vpop.f32.mrb[40].mxu1 }
 0x317   : > { %4458 = vst [vmem:[%s6762_s19 + $0x460] sm:$0xff] %v2147_v30  ;;  %v2149_v13 = vpop.f32.mrb[41].mxu0  ;;  %4460 = vst [vmem:[%s6762_s19 + $0x470] sm:$0xff] %v2876_v15  ;;  %v2878_v20 = vpop.f32.mrb[41].mxu1  ;;  %v1035_v15 = vld [vmem:[#allocation5 + $0xe30] sm:$0xff] }
 0x318   : > { %4459 = vst [vmem:[%s6762_s19 + $0x468] sm:$0xff] %v2149_v13  ;;  %v2151_v50 = vpop.f32.mrb[42].mxu0  ;;  %4461 = vst [vmem:[%s6762_s19 + $0x478] sm:$0xff] %v2878_v20  ;;  %v2880_v28 = vpop.f32.mrb[42].mxu1  ;;  %v1042_v13 = vld [vmem:[#allocation5 + $0xe68] sm:$0xff] }
 0x319   : > { %4465 = vst [vmem:[%s6762_s19 + $0x498] sm:$0xff] %v2151_v50  ;;  %v2153_v40 = vpop.f32.mrb[43].mxu0  ;;  %4467 = vst [vmem:[%s6762_s19 + $0x4a8] sm:$0xff] %v2880_v28  ;;  %v2882_v29 = vpop.f32.mrb[43].mxu1  ;;  %v1048_v28 = vld [vmem:[#allocation5 + $0xe98] sm:$0xff] }
 0x31a   : > { %4466 = vst [vmem:[%s6762_s19 + $0x4a0] sm:$0xff] %v2153_v40  ;;  %4468 = vst [vmem:[%s6762_s19 + $0x4b0] sm:$0xff] %v2882_v29  ;;  %v1055_v40 = vld [vmem:[#allocation5 + $0xed0] sm:$0xff] }
 0x31b   : > { %3178 = vmatmul.mubr.bf16.gmra.mrb[148].mxu0 %v6112_v37  ;;  %3875 = vmatmul.mubr.bf16.gmra.mrb[148].mxu1 %v6112_v37 }
 0x31c   : > { %3187 = vmatprep.mubr.bf16.mxu0 %v7701_v57  ;;  %3882 = vmatprep.mubr.bf16.mxu1 %v7701_v57 }
 0x31e   : > { %v2157_v41 = vpop.f32.mrb[44].mxu0  ;;  %v2886_v7 = vpop.f32.mrb[44].mxu1 }
 0x31f   : > { %4472 = vst [vmem:[%s6762_s19 + $0x4d0] sm:$0xff] %v2157_v41  ;;  %v2159_v21 = vpop.f32.mrb[45].mxu0  ;;  %4474 = vst [vmem:[%s6762_s19 + $0x4e0] sm:$0xff] %v2886_v7  ;;  %v2888_v12 = vpop.f32.mrb[45].mxu1  ;;  %v1397_v41 = vpack.c.bf16 %v1040_v19, %v1033_v35  ;;  %v1097_v35 = vld [vmem:[#allocation5 + $0x1020] sm:$0xff] }
 0x320   : > { %4473 = vst [vmem:[%s6762_s19 + $0x4d8] sm:$0xff] %v2159_v21  ;;  %v2161_v34 = vpop.f32.mrb[46].mxu0  ;;  %4475 = vst [vmem:[%s6762_s19 + $0x4e8] sm:$0xff] %v2888_v12  ;;  %v2890_v37 = vpop.f32.mrb[46].mxu1  ;;  %v1399_v12 = vpack.c.bf16 %v1042_v13, %v1035_v15  ;;  %v7713_v19 = vld [vmem:[#allocation23_spill] sm:$0xff] }
 0x321   : > { %4479 = vst [vmem:[%s6762_s19 + $0x508] sm:$0xff] %v2161_v34  ;;  %v2163_v18 = vpop.f32.mrb[47].mxu0  ;;  %4481 = vst [vmem:[%s6762_s19 + $0x518] sm:$0xff] %v2890_v37  ;;  %v2892_v48 = vpop.f32.mrb[47].mxu1  ;;  %v1047_v34 = vld [vmem:[#allocation5 + $0xe90] sm:$0xff]  ;;  %v1054_v37 = vld [vmem:[#allocation5 + $0xec8] sm:$0xff] }
 0x322   : > { %4480 = vst [vmem:[%s6762_s19 + $0x510] sm:$0xff] %v2163_v18  ;;  %4482 = vst [vmem:[%s6762_s19 + $0x520] sm:$0xff] %v2892_v48  ;;  %v1049_v18 = vld [vmem:[#allocation5 + $0xea0] sm:$0xff] }
 0x323   : > { %3188 = vmatmul.mubr.bf16.gmra.mrb[152].mxu0 %v7702_v54  ;;  %3883 = vmatmul.mubr.bf16.gmra.mrb[152].mxu1 %v7702_v54  ;;  %v1405_v54 = vpack.c.bf16 %v1055_v40, %v1048_v28  ;;  %v1096_v28 = vld [vmem:[#allocation5 + $0x1018] sm:$0xff]  ;;  %v1091_v40 = vld [vmem:[#allocation5 + $0xff0] sm:$0xff] }
 0x324   : > { %3197 = vmatprep.mubr.bf16.mxu0 %v7703_v49  ;;  %3890 = vmatprep.mubr.bf16.mxu1 %v7703_v49  ;;  %v1056_v49 = vld [vmem:[#allocation5 + $0xed8] sm:$0xff] }
 0x326   : > { %v2167_v55 = vpop.f32.mrb[48].mxu0  ;;  %v2896_v32 = vpop.f32.mrb[48].mxu1 }
 0x327   : > { %4486 = vst [vmem:[%s6762_s19 + $0x540] sm:$0xff] %v2167_v55  ;;  %v2169_v47 = vpop.f32.mrb[49].mxu0  ;;  %4488 = vst [vmem:[%s6762_s19 + $0x550] sm:$0xff] %v2896_v32  ;;  %v2898_v39 = vpop.f32.mrb[49].mxu1  ;;  %v1062_v55 = vld [vmem:[#allocation5 + $0xf08] sm:$0xff]  ;;  %v1069_v32 = vld [vmem:[#allocation5 + $0xf40] sm:$0xff] }
 0x328   : > { %4487 = vst [vmem:[%s6762_s19 + $0x548] sm:$0xff] %v2169_v47  ;;  %v2171_v51 = vpop.f32.mrb[50].mxu0  ;;  %4489 = vst [vmem:[%s6762_s19 + $0x558] sm:$0xff] %v2898_v39  ;;  %v2900_v58 = vpop.f32.mrb[50].mxu1  ;;  %v7710_v47 = vld [vmem:[#allocation20_spill] sm:$0xff]  ;;  %v1404_v39 = vpack.c.bf16 %v1054_v37, %v1047_v34 }
 0x329   : > { %4493 = vst [vmem:[%s6762_s19 + $0x578] sm:$0xff] %v2171_v51  ;;  %v2173_v26 = vpop.f32.mrb[51].mxu0  ;;  %4495 = vst [vmem:[%s6762_s19 + $0x588] sm:$0xff] %v2900_v58  ;;  %v2902_v59 = vpop.f32.mrb[51].mxu1  ;;  %v7711_v51 = vld [vmem:[#allocation21_spill] sm:$0xff]  ;;  %v1406_v58 = vpack.c.bf16 %v1056_v49, %v1049_v18 }
 0x32a   : > { %4494 = vst [vmem:[%s6762_s19 + $0x580] sm:$0xff] %v2173_v26  ;;  %4496 = vst [vmem:[%s6762_s19 + $0x590] sm:$0xff] %v2902_v59  ;;  %v1412_v26 = vpack.c.bf16 %v1069_v32, %v1062_v55  ;;  %v1103_v32 = vld [vmem:[#allocation5 + $0x1050] sm:$0xff] }
 0x32b   : > { %3198 = vmatmul.mubr.bf16.gmra.mrb[156].mxu0 %v7704_v14  ;;  %3891 = vmatmul.mubr.bf16.gmra.mrb[156].mxu1 %v7704_v14  ;;  %v1061_v14 = vld [vmem:[#allocation5 + $0xf00] sm:$0xff] }
 0x32c   : > { %3207 = vmatprep.mubr.bf16.mxu0 %v7705_v22  ;;  %3898 = vmatprep.mubr.bf16.mxu1 %v7705_v22  ;;  %v1068_v22 = vld [vmem:[#allocation5 + $0xf38] sm:$0xff] }
 0x32e   : > { %v2177_v17 = vpop.f32.mrb[52].mxu0  ;;  %v2906_v38 = vpop.f32.mrb[52].mxu1 }
 0x32f   : > { %4500 = vst [vmem:[%s6762_s19 + $0x5b0] sm:$0xff] %v2177_v17  ;;  %v2179_v36 = vpop.f32.mrb[53].mxu0  ;;  %4502 = vst [vmem:[%s6762_s19 + $0x5c0] sm:$0xff] %v2906_v38  ;;  %v2908_v1 = vpop.f32.mrb[53].mxu1  ;;  %v1063_v17 = vld [vmem:[#allocation5 + $0xf10] sm:$0xff] }
 0x330   : > { %4501 = vst [vmem:[%s6762_s19 + $0x5b8] sm:$0xff] %v2179_v36  ;;  %v2181_v61 = vpop.f32.mrb[54].mxu0  ;;  %4503 = vst [vmem:[%s6762_s19 + $0x5c8] sm:$0xff] %v2908_v1  ;;  %v2910_v3 = vpop.f32.mrb[54].mxu1  ;;  %v1070_v1 = vld [vmem:[#allocation5 + $0xf48] sm:$0xff] }
 0x331   : > { %4507 = vst [vmem:[%s6762_s19 + $0x5e8] sm:$0xff] %v2181_v61  ;;  %v2183_v2 = vpop.f32.mrb[55].mxu0  ;;  %4509 = vst [vmem:[%s6762_s19 + $0x5f8] sm:$0xff] %v2910_v3  ;;  %v2912_v42 = vpop.f32.mrb[55].mxu1  ;;  %v1076_v61 = vld [vmem:[#allocation5 + $0xf78] sm:$0xff]  ;;  %v1083_v3 = vld [vmem:[#allocation5 + $0xfb0] sm:$0xff] }
 0x332   : > { %4508 = vst [vmem:[%s6762_s19 + $0x5f0] sm:$0xff] %v2183_v2  ;;  %4510 = vst [vmem:[%s6762_s19 + $0x600] sm:$0xff] %v2912_v42 }
 0x333   : > { %3208 = vmatmul.mubr.bf16.gmra.mrb[160].mxu0 %v7706_v27  ;;  %3899 = vmatmul.mubr.bf16.gmra.mrb[160].mxu1 %v7706_v27 }
 0x334   : > { %3217 = vmatprep.mubr.bf16.mxu0 %v7707_v25  ;;  %3906 = vmatprep.mubr.bf16.mxu1 %v7707_v25 }
 0x336   : > { %v2187_v46 = vpop.f32.mrb[56].mxu0  ;;  %v2916_v8 = vpop.f32.mrb[56].mxu1 }
 0x337   : > { %4514 = vst [vmem:[%s6762_s19 + $0x620] sm:$0xff] %v2187_v46  ;;  %v2189_v23 = vpop.f32.mrb[57].mxu0  ;;  %4516 = vst [vmem:[%s6762_s19 + $0x630] sm:$0xff] %v2916_v8  ;;  %v2918_v9 = vpop.f32.mrb[57].mxu1  ;;  %v1411_v46 = vpack.c.bf16 %v1068_v22, %v1061_v14  ;;  %v7715_v14 = vld [vmem:[#allocation25_spill] sm:$0xff] }
 0x338   : > { %4515 = vst [vmem:[%s6762_s19 + $0x628] sm:$0xff] %v2189_v23  ;;  %v2191_v45 = vpop.f32.mrb[58].mxu0  ;;  %4517 = vst [vmem:[%s6762_s19 + $0x638] sm:$0xff] %v2918_v9  ;;  %v2920_v60 = vpop.f32.mrb[58].mxu1  ;;  %v1413_v23 = vpack.c.bf16 %v1070_v1, %v1063_v17  ;;  %v1419_v9 = vpack.c.bf16 %v1083_v3, %v1076_v61  ;;  %v1117_v1 = vld [vmem:[#allocation5 + $0x10c0] sm:$0xff]  ;;  %v1124_v61 = vld [vmem:[#allocation5 + $0x10f8] sm:$0xff] }
 0x339   : > { %4521 = vst [vmem:[%s6762_s19 + $0x658] sm:$0xff] %v2191_v45  ;;  %v2193_v24 = vpop.f32.mrb[59].mxu0  ;;  %4523 = vst [vmem:[%s6762_s19 + $0x668] sm:$0xff] %v2920_v60  ;;  %v2922_v33 = vpop.f32.mrb[59].mxu1  ;;  %v1075_v45 = vld [vmem:[#allocation5 + $0xf70] sm:$0xff]  ;;  %v1082_v60 = vld [vmem:[#allocation5 + $0xfa8] sm:$0xff] }
 0x33a   : > { %4522 = vst [vmem:[%s6762_s19 + $0x660] sm:$0xff] %v2193_v24  ;;  %4524 = vst [vmem:[%s6762_s19 + $0x670] sm:$0xff] %v2922_v33  ;;  %v1077_v24 = vld [vmem:[#allocation5 + $0xf80] sm:$0xff]  ;;  %v7712_v33 = vld [vmem:[#allocation22_spill] sm:$0xff] }
 0x33b   : > { %3218 = vmatmul.mubr.bf16.gmra.mrb[164].mxu0 %v7708_v52  ;;  %3907 = vmatmul.mubr.bf16.gmra.mrb[164].mxu1 %v7708_v52  ;;  %v1084_v52 = vld [vmem:[#allocation5 + $0xfb8] sm:$0xff]  ;;  %v1119_v3 = vld [vmem:[#allocation5 + $0x10d0] sm:$0xff] }
 0x33c   : > { %3260 = vmatprep.mubr.bf16.mxu0 %v7709_v16  ;;  %3947 = vmatprep.mubr.bf16.mxu1 %v7709_v16  ;;  %v1090_v16 = vld [vmem:[#allocation5 + $0xfe8] sm:$0xff]  ;;  %v1420_v13 = vpack.c.bf16 %v1084_v52, %v1077_v24 }
 0x33e   : > { %v2197_v30 = vpop.f32.mrb[60].mxu0  ;;  %v2926_v20 = vpop.f32.mrb[60].mxu1 }
 0x33f   : > { %4528 = vst [vmem:[%s6762_s19 + $0x690] sm:$0xff] %v2197_v30  ;;  %v2199_v50 = vpop.f32.mrb[61].mxu0  ;;  %4530 = vst [vmem:[%s6762_s19 + $0x6a0] sm:$0xff] %v2926_v20  ;;  %v2928_v29 = vpop.f32.mrb[61].mxu1  ;;  %v1418_v30 = vpack.c.bf16 %v1082_v60, %v1075_v45  ;;  %v1426_v20 = vpack.c.bf16 %v1097_v35, %v1090_v16  ;;  %v1439_v60 = vpack.c.bf16 %v1124_v61, %v1117_v1  ;;  %v1131_v16 = vld [vmem:[#allocation5 + $0x1130] sm:$0xff]  ;;  %v1138_v35 = vld [vmem:[#allocation5 + $0x1168] sm:$0xff] }
 0x340   : > { %4529 = vst [vmem:[%s6762_s19 + $0x698] sm:$0xff] %v2199_v50  ;;  %v2201_v57 = vpop.f32.mrb[62].mxu0  ;;  %4531 = vst [vmem:[%s6762_s19 + $0x6a8] sm:$0xff] %v2928_v29  ;;  %v2930_v7 = vpop.f32.mrb[62].mxu1  ;;  %v1089_v50 = vld [vmem:[#allocation5 + $0xfe0] sm:$0xff] }
 0x341   : > { %4535 = vst [vmem:[%s6762_s19 + $0x6c8] sm:$0xff] %v2201_v57  ;;  %v2203_v21 = vpop.f32.mrb[63].mxu0  ;;  %4537 = vst [vmem:[%s6762_s19 + $0x6d8] sm:$0xff] %v2930_v7  ;;  %v2932_v48 = vpop.f32.mrb[63].mxu1  ;;  %v1104_v7 = vld [vmem:[#allocation5 + $0x1058] sm:$0xff] }
 0x342   : > { %4536 = vst [vmem:[%s6762_s19 + $0x6d0] sm:$0xff] %v2203_v21  ;;  %4538 = vst [vmem:[%s6762_s19 + $0x6e0] sm:$0xff] %v2932_v48  ;;  %v1111_v21 = vld [vmem:[#allocation5 + $0x1090] sm:$0xff]  ;;  %v1425_v48 = vpack.c.bf16 %v1096_v28, %v1089_v50  ;;  %v7717_v50 = vld [vmem:[#allocation27_spill] sm:$0xff]  ;;  %v1446_v28 = vpack.c.bf16 %v1138_v35, %v1131_v16 }
 0x343   : > { %3261 = vmatmul.mubr.bf16.vlgmr.msra.gmra.mrb[84].mxu0 %v7710_v47  ;;  %3948 = vmatmul.mubr.bf16.vlgmr.msra.gmra.mrb[84].mxu1 %v7710_v47  ;;  %v1433_v55 = vpack.c.bf16 %v1111_v21, %v1104_v7  ;;  %v1110_v47 = vld [vmem:[#allocation5 + $0x1088] sm:$0xff]  ;;  %v1152_v7 = vld [vmem:[#allocation5 + $0x11d8] sm:$0xff]  ;;  %v1147_v21 = vld [vmem:[#allocation5 + $0x11b0] sm:$0xff] }
 0x344   : > { %3472 = vmatpush1.bf16.msra.mxu0 %v1397_v41  ;;  %4117 = vmatpush1.bf16.msra.mxu1 %v1399_v12  ;;  %v1098_v41 = vld [vmem:[#allocation5 + $0x1028] sm:$0xff]  ;;  %v1432_v22 = vpack.c.bf16 %v1110_v47, %v1103_v32  ;;  %v7732_v16 = vld [vmem:[#allocation42_spill] sm:$0xff]  ;;  %v7733_v35 = vld [vmem:[#allocation43_spill] sm:$0xff] }
 0x345   : > { %3270 = vmatprep.mubr.bf16.mxu0 %v7711_v51  ;;  %3955 = vmatprep.mubr.bf16.mxu1 %v7711_v51  ;;  %v1427_v49 = vpack.c.bf16 %v1098_v41, %v1091_v40  ;;  %v7714_v51 = vld [vmem:[#allocation24_spill] sm:$0xff]  ;;  %v1145_v41 = vld [vmem:[#allocation5 + $0x11a0] sm:$0xff] }
 0x346   : > { %v2207_v59 = vpop.f32.mrb[64].mxu0  ;;  %3473 = vmatprep.subr.bf16.mxu0 %v1405_v54  ;;  %v2936_v38 = vpop.f32.mrb[64].mxu1  ;;  %4118 = vmatprep.subr.bf16.mxu1 %v7670_v44  ;;  %v1453_v47 = vpack.c.bf16 %v1152_v7, %v1145_v41  ;;  %v7744_v41 = vld [vmem:[#allocation54_spill] sm:$0xff]  ;;  %v7745_v7 = vld [vmem:[#allocation55_spill] sm:$0xff] }
 0x347   : > { %4542 = vst [vmem:[%s6762_s19 + $0x700] sm:$0xff] %v2207_v59  ;;  %v2209_v36 = vpop.f32.mrb[65].mxu0  ;;  %4544 = vst [vmem:[%s6762_s19 + $0x710] sm:$0xff] %v2936_v38  ;;  %v2938_v2 = vpop.f32.mrb[65].mxu1  ;;  %v1125_v59 = vld [vmem:[#allocation5 + $0x1100] sm:$0xff] }
 0x348   : > { %4543 = vst [vmem:[%s6762_s19 + $0x708] sm:$0xff] %v2209_v36  ;;  %v2211_v42 = vpop.f32.mrb[66].mxu0  ;;  %3474 = vmatpush1.bf16.msra.mxu0 %v1404_v39  ;;  %4545 = vst [vmem:[%s6762_s19 + $0x718] sm:$0xff] %v2938_v2  ;;  %v2940_v27 = vpop.f32.mrb[66].mxu1  ;;  %4119 = vmatpush1.bf16.msra.mxu1 %v1406_v58  ;;  %v1105_v39 = vld [vmem:[#allocation5 + $0x1060] sm:$0xff]  ;;  %v1112_v58 = vld [vmem:[#allocation5 + $0x1098] sm:$0xff] }
 0x349   : > { %4549 = vst [vmem:[%s6762_s19 + $0x738] sm:$0xff] %v2211_v42  ;;  %v2213_v25 = vpop.f32.mrb[67].mxu0  ;;  %3475 = vmatprep.subr.bf16.mxu0 %v1412_v26  ;;  %4551 = vst [vmem:[%s6762_s19 + $0x748] sm:$0xff] %v2940_v27  ;;  %v2942_v8 = vpop.f32.mrb[67].mxu1  ;;  %4120 = vmatprep.subr.bf16.mxu1 %v7670_v44  ;;  %v1118_v26 = vld [vmem:[#allocation5 + $0x10c8] sm:$0xff]  ;;  %v1434_v38 = vpack.c.bf16 %v1112_v58, %v1105_v39 }
 0x34a   : > { %4550 = vst [vmem:[%s6762_s19 + $0x740] sm:$0xff] %v2213_v25  ;;  %4552 = vst [vmem:[%s6762_s19 + $0x750] sm:$0xff] %v2942_v8  ;;  %v1440_v36 = vpack.c.bf16 %v1125_v59, %v1118_v26  ;;  %v1126_v27 = vld [vmem:[#allocation5 + $0x1108] sm:$0xff]  ;;  %v1132_v25 = vld [vmem:[#allocation5 + $0x1138] sm:$0xff] }
 0x34b   : > { %3271 = vmatmul.mubr.bf16.gmra.mrb[88].mxu0 %v7712_v33  ;;  %3956 = vmatmul.mubr.bf16.gmra.mrb[88].mxu1 %v7712_v33  ;;  %v1441_v33 = vpack.c.bf16 %v1126_v27, %v1119_v3  ;;  %v1159_v26 = vld [vmem:[#allocation5 + $0x1210] sm:$0xff]  ;;  %v1166_v59 = vld [vmem:[#allocation5 + $0x1248] sm:$0xff] }
 0x34c   : > { %3280 = vmatprep.mubr.bf16.mxu0 %v7713_v19  ;;  %3963 = vmatprep.mubr.bf16.mxu1 %v7713_v19  ;;  %v1133_v19 = vld [vmem:[#allocation5 + $0x1140] sm:$0xff]  ;;  %v7719_v27 = vld [vmem:[#allocation29_spill] sm:$0xff] }
 0x34d   : > { %3476 = vmatpush1.bf16.msra.mxu0 %v1411_v46  ;;  %4121 = vmatpush1.bf16.msra.mxu1 %v1413_v23  ;;  %v1139_v46 = vld [vmem:[#allocation5 + $0x1170] sm:$0xff] }
 0x34e   : > { %v2217_v15 = vpop.f32.mrb[68].mxu0  ;;  %3477 = vmatprep.subr.bf16.mxu0 %v1419_v9  ;;  %v2946_v29 = vpop.f32.mrb[68].mxu1  ;;  %4122 = vmatprep.subr.bf16.mxu1 %v7670_v44  ;;  %v1447_v52 = vpack.c.bf16 %v1139_v46, %v1132_v25  ;;  %v7720_v25 = vld [vmem:[#allocation30_spill] sm:$0xff]  ;;  %v7721_v46 = vld [vmem:[#allocation31_spill] sm:$0xff] }
 0x34f   : > { %4556 = vst [vmem:[%s6762_s19 + $0x770] sm:$0xff] %v2217_v15  ;;  %v2219_v57 = vpop.f32.mrb[69].mxu0  ;;  %4558 = vst [vmem:[%s6762_s19 + $0x780] sm:$0xff] %v2946_v29  ;;  %v2948_v12 = vpop.f32.mrb[69].mxu1  ;;  %v1140_v15 = vld [vmem:[#allocation5 + $0x1178] sm:$0xff] }
 0x350   : > { %4557 = vst [vmem:[%s6762_s19 + $0x778] sm:$0xff] %v2219_v57  ;;  %v2221_v34 = vpop.f32.mrb[70].mxu0  ;;  %4559 = vst [vmem:[%s6762_s19 + $0x788] sm:$0xff] %v2948_v12  ;;  %v2950_v37 = vpop.f32.mrb[70].mxu1  ;;  %v1448_v29 = vpack.c.bf16 %v1140_v15, %v1133_v19  ;;  %v7734_v19 = vld [vmem:[#allocation44_spill] sm:$0xff]  ;;  %v7736_v15 = vld [vmem:[#allocation46_spill] sm:$0xff] }
 0x351   : > { %4563 = vst [vmem:[%s6762_s19 + $0x7a8] sm:$0xff] %v2221_v34  ;;  %v2223_v18 = vpop.f32.mrb[71].mxu0  ;;  %3478 = vmatpush1.bf16.msra.mxu0 %v1418_v30  ;;  %4565 = vst [vmem:[%s6762_s19 + $0x7b8] sm:$0xff] %v2950_v37  ;;  %v2952_v54 = vpop.f32.mrb[71].mxu1  ;;  %4123 = vmatpush1.bf16.msra.mxu1 %v1420_v13  ;;  %v7716_v30 = vld [vmem:[#allocation26_spill] sm:$0xff]  ;;  %v1146_v13 = vld [vmem:[#allocation5 + $0x11a8] sm:$0xff] }
 0x352   : > { %4564 = vst [vmem:[%s6762_s19 + $0x7b0] sm:$0xff] %v2223_v18  ;;  %3479 = vmatprep.subr.bf16.mxu0 %v1426_v20  ;;  %4566 = vst [vmem:[%s6762_s19 + $0x7c0] sm:$0xff] %v2952_v54  ;;  %4124 = vmatprep.subr.bf16.mxu1 %v7670_v44  ;;  %v1153_v20 = vld [vmem:[#allocation5 + $0x11e0] sm:$0xff]  ;;  %v1154_v37 = vld [vmem:[#allocation5 + $0x11e8] sm:$0xff] }
 0x353   : > { %3281 = vmatmul.mubr.bf16.gmra.mrb[92].mxu0 %v7714_v51  ;;  %3964 = vmatmul.mubr.bf16.gmra.mrb[92].mxu1 %v7714_v51  ;;  %v1454_v57 = vpack.c.bf16 %v1153_v20, %v1146_v13  ;;  %v1160_v18 = vld [vmem:[#allocation5 + $0x1218] sm:$0xff]  ;;  %v1455_v51 = vpack.c.bf16 %v1154_v37, %v1147_v21  ;;  %v7737_v13 = vld [vmem:[#allocation47_spill] sm:$0xff]  ;;  %v7738_v20 = vld [vmem:[#allocation48_spill] sm:$0xff] }
 0x354   : > { %3290 = vmatprep.mubr.bf16.mxu0 %v7715_v14  ;;  %3971 = vmatprep.mubr.bf16.mxu1 %v7715_v14  ;;  %v1161_v14 = vld [vmem:[#allocation5 + $0x1220] sm:$0xff]  ;;  %v7746_v21 = vld [vmem:[#allocation56_spill] sm:$0xff] }
 0x355   : > { %3480 = vmatpush1.bf16.msra.mxu0 %v1425_v48  ;;  %4125 = vmatpush1.bf16.msra.mxu1 %v1427_v49  ;;  %v1167_v48 = vld [vmem:[#allocation5 + $0x1250] sm:$0xff]  ;;  %v7749_v37 = vld [vmem:[#allocation59_spill] sm:$0xff] }
 0x356   : > { %v2227_v17 = vpop.f32.mrb[72].mxu0  ;;  %3481 = vmatprep.subr.bf16.mxu0 %v1433_v55  ;;  %v2956_v2 = vpop.f32.mrb[72].mxu1  ;;  %4126 = vmatprep.subr.bf16.mxu1 %v7670_v44  ;;  %v1461_v58 = vpack.c.bf16 %v1167_v48, %v1160_v18  ;;  %v7750_v18 = vld [vmem:[#allocation60_spill] sm:$0xff]  ;;  %v7751_v48 = vld [vmem:[#allocation61_spill] sm:$0xff] }
 0x357   : > { %4570 = vst [vmem:[%s6762_s19 + $0x7e0] sm:$0xff] %v2227_v17  ;;  %v2229_v42 = vpop.f32.mrb[73].mxu0  ;;  %4572 = vst [vmem:[%s6762_s19 + $0x7f0] sm:$0xff] %v2956_v2  ;;  %v2958_v8 = vpop.f32.mrb[73].mxu1  ;;  %v1460_v17 = vpack.c.bf16 %v1166_v59, %v1159_v26  ;;  %v7760_v26 = vld [vmem:[#allocation70_spill] sm:$0xff]  ;;  %v7769_v59 = vld [vmem:[#allocation79_spill] sm:$0xff] }
 0x358   : > { %4571 = vst [vmem:[%s6762_s19 + $0x7e8] sm:$0xff] %v2229_v42  ;;  %v2231_v23 = vpop.f32.mrb[74].mxu0  ;;  %4573 = vst [vmem:[%s6762_s19 + $0x7f8] sm:$0xff] %v2958_v8  ;;  %v2960_v9 = vpop.f32.mrb[74].mxu1  ;;  %v7724_v8 = vld [vmem:[#allocation34_spill] sm:$0xff] }
 0x359   : > { %4577 = vst [vmem:[%s6762_s19 + $0x818] sm:$0xff] %v2231_v23  ;;  %v2233_v45 = vpop.f32.mrb[75].mxu0  ;;  %3482 = vmatpush1.bf16.msra.mxu0 %v1432_v22  ;;  %4579 = vst [vmem:[%s6762_s19 + $0x828] sm:$0xff] %v2960_v9  ;;  %v2962_v24 = vpop.f32.mrb[75].mxu1  ;;  %4127 = vmatpush1.bf16.msra.mxu1 %v1434_v38  ;;  %v1168_v22 = vld [vmem:[#allocation5 + $0x1258] sm:$0xff]  ;;  %v7725_v23 = vld [vmem:[#allocation35_spill] sm:$0xff] }
 0x35a   : > { %4578 = vst [vmem:[%s6762_s19 + $0x820] sm:$0xff] %v2233_v45  ;;  %3483 = vmatprep.subr.bf16.mxu0 %v1440_v36  ;;  %4580 = vst [vmem:[%s6762_s19 + $0x830] sm:$0xff] %v2962_v24  ;;  %4128 = vmatprep.subr.bf16.mxu1 %v7670_v44  ;;  %v1462_v36 = vpack.c.bf16 %v1168_v22, %v1161_v14  ;;  %v7726_v9 = vld [vmem:[#allocation36_spill] sm:$0xff]  ;;  %v7727_v45 = vld [vmem:[#allocation37_spill] sm:$0xff] }
 0x35b   : > { %3291 = vmatmul.mubr.bf16.gmra.mrb[96].mxu0 %v7716_v30  ;;  %3972 = vmatmul.mubr.bf16.gmra.mrb[96].mxu1 %v7716_v30  ;;  %v7729_v24 = vld [vmem:[#allocation39_spill] sm:$0xff]  ;;  %v7735_v30 = vld [vmem:[#allocation45_spill] sm:$0xff]  ;;  %v7770_v14 = vld [vmem:[#allocation80_spill] sm:$0xff] }
 0x35c   : > { %3300 = vmatprep.mubr.bf16.mxu0 %v7717_v50  ;;  %3979 = vmatprep.mubr.bf16.mxu1 %v7717_v50  ;;  %v7739_v50 = vld [vmem:[#allocation49_spill] sm:$0xff] }
 0x35d   : > { %3484 = vmatpush1.bf16.msra.mxu0 %v1439_v60  ;;  %4129 = vmatpush1.bf16.msra.mxu1 %v1441_v33  ;;  %v7728_v60 = vld [vmem:[#allocation38_spill] sm:$0xff]  ;;  %v7730_v33 = vld [vmem:[#allocation40_spill] sm:$0xff]  ;;  %v7771_v22 = vld [vmem:[#allocation81_spill] sm:$0xff] }
 0x35e   : > { %v2237_v40 = vpop.f32.mrb[76].mxu0  ;;  %3485 = vmatprep.subr.bf16.mxu0 %v1447_v52  ;;  %v2966_v12 = vpop.f32.mrb[76].mxu1  ;;  %4130 = vmatprep.subr.bf16.mxu1 %v7670_v44  ;;  %v7731_v52 = vld [vmem:[#allocation41_spill] sm:$0xff] }
 0x35f   : > { %4584 = vst [vmem:[%s6762_s19 + $0x850] sm:$0xff] %v2237_v40  ;;  %v2239_v34 = vpop.f32.mrb[77].mxu0  ;;  %4586 = vst [vmem:[%s6762_s19 + $0x860] sm:$0xff] %v2966_v12  ;;  %v2968_v54 = vpop.f32.mrb[77].mxu1  ;;  %v7741_v40 = vld [vmem:[#allocation51_spill] sm:$0xff]  ;;  %v7747_v12 = vld [vmem:[#allocation57_spill] sm:$0xff] }
 0x360   : > { %4585 = vst [vmem:[%s6762_s19 + $0x858] sm:$0xff] %v2239_v34  ;;  %v2241_v49 = vpop.f32.mrb[78].mxu0  ;;  %4587 = vst [vmem:[%s6762_s19 + $0x868] sm:$0xff] %v2968_v54  ;;  %v2970_v55 = vpop.f32.mrb[78].mxu1  ;;  %v7748_v34 = vld [vmem:[#allocation58_spill] sm:$0xff] }
 0x361   : > { %4591 = vst [vmem:[%s6762_s19 + $0x888] sm:$0xff] %v2241_v49  ;;  %v2243_v32 = vpop.f32.mrb[79].mxu0  ;;  %3486 = vmatpush1.bf16.msra.mxu0 %v1446_v28  ;;  %4593 = vst [vmem:[%s6762_s19 + $0x898] sm:$0xff] %v2970_v55  ;;  %v2972_v39 = vpop.f32.mrb[79].mxu1  ;;  %4131 = vmatpush1.bf16.msra.mxu1 %v1448_v29  ;;  %v7740_v28 = vld [vmem:[#allocation50_spill] sm:$0xff]  ;;  %v7742_v29 = vld [vmem:[#allocation52_spill] sm:$0xff] }
 0x362   : > { %4592 = vst [vmem:[%s6762_s19 + $0x890] sm:$0xff] %v2243_v32  ;;  %3487 = vmatprep.subr.bf16.mxu0 %v1454_v57  ;;  %4594 = vst [vmem:[%s6762_s19 + $0x8a0] sm:$0xff] %v2972_v39  ;;  %4132 = vmatprep.subr.bf16.mxu1 %v7670_v44  ;;  %v7743_v57 = vld [vmem:[#allocation53_spill] sm:$0xff]  ;;  %v7752_v54 = vld [vmem:[#allocation62_spill] sm:$0xff] }
 0x363   : > { %3301 = vmatmul.mubr.bf16.gmra.mrb[100].mxu0 %v6220_v56  ;;  %3980 = vmatmul.mubr.bf16.gmra.mrb[100].mxu1 %v6220_v56  ;;  %v7753_v49 = vld [vmem:[#allocation63_spill] sm:$0xff]  ;;  %v7754_v55 = vld [vmem:[#allocation64_spill] sm:$0xff]  ;;  %v7755_v32 = vld [vmem:[#allocation65_spill] sm:$0xff] }
 0x364   : > { %3310 = vmatprep.mubr.bf16.mxu0 %v6222_v63  ;;  %3987 = vmatprep.mubr.bf16.mxu1 %v6222_v63  ;;  %v7757_v39 = vld [vmem:[#allocation67_spill] sm:$0xff] }
 0x365   : > { %3488 = vmatpush1.bf16.msra.mxu0 %v1453_v47  ;;  %4133 = vmatpush1.bf16.msra.mxu1 %v1455_v51  ;;  %v7756_v47 = vld [vmem:[#allocation66_spill] sm:$0xff]  ;;  %v7758_v51 = vld [vmem:[#allocation68_spill] sm:$0xff] }
 0x366   : > { %v2247_v38 = vpop.f32.mrb[80].mxu0  ;;  %3489 = vmatprep.subr.bf16.mxu0 %v1461_v58  ;;  %v2976_v1 = vpop.f32.mrb[80].mxu1  ;;  %4134 = vmatprep.subr.bf16.mxu1 %v7670_v44  ;;  %v7718_v44 = vld [vmem:[#allocation28_spill] sm:$0xff]  ;;  %v7759_v58 = vld [vmem:[#allocation69_spill] sm:$0xff] }
 0x367   : > { %4598 = vst [vmem:[%s6762_s19 + $0x8c0] sm:$0xff] %v2247_v38  ;;  %v2249_v61 = vpop.f32.mrb[81].mxu0  ;;  %4600 = vst [vmem:[%s6762_s19 + $0x8d0] sm:$0xff] %v2976_v1  ;;  %v2978_v56 = vpop.f32.mrb[81].mxu1  ;;  %v7773_v38 = vld [vmem:[#allocation83_spill] sm:$0xff]  ;;  %v7775_v1 = vld [vmem:[#allocation85_spill] sm:$0xff] }
 0x368   : > { %4599 = vst [vmem:[%s6762_s19 + $0x8c8] sm:$0xff] %v2249_v61  ;;  %v2251_v3 = vpop.f32.mrb[82].mxu0  ;;  %4601 = vst [vmem:[%s6762_s19 + $0x8d8] sm:$0xff] %v2978_v56  ;;  %v2980_v63 = vpop.f32.mrb[82].mxu1  ;;  %v7776_v61 = vld [vmem:[#allocation86_spill] sm:$0xff]  ;;  %v7777_v56 = vld [vmem:[#allocation87_spill] sm:$0xff] }
 0x369   : > { %4605 = vst [vmem:[%s6762_s19 + $0x8f8] sm:$0xff] %v2251_v3  ;;  %v2253_v2 = vpop.f32.mrb[83].mxu0  ;;  %3490 = vmatpush1.bf16.msra.mxu0 %v1460_v17  ;;  %4607 = vst [vmem:[%s6762_s19 + $0x908] sm:$0xff] %v2980_v63  ;;  %v2982_v42 = vpop.f32.mrb[83].mxu1  ;;  %4135 = vmatpush1.bf16.msra.mxu1 %v1462_v36  ;;  %v7772_v17 = vld [vmem:[#allocation82_spill] sm:$0xff]  ;;  %v7774_v36 = vld [vmem:[#allocation84_spill] sm:$0xff] }
 0x36a   : > { %4606 = vst [vmem:[%s6762_s19 + $0x900] sm:$0xff] %v2253_v2  ;;  %4608 = vst [vmem:[%s6762_s19 + $0x910] sm:$0xff] %v2982_v42  ;;  %v7778_v3 = vld [vmem:[#allocation88_spill] sm:$0xff]  ;;  %v7779_v63 = vld [vmem:[#allocation89_spill] sm:$0xff] }
 0x36b   : > { %3311 = vmatmul.mubr.bf16.gmra.mrb[104].mxu0 %v6232_v11  ;;  %3988 = vmatmul.mubr.bf16.gmra.mrb[104].mxu1 %v6232_v11  ;;  %v7722_v11 = vld [vmem:[#allocation32_spill] sm:$0xff]  ;;  %v7780_v2 = vld [vmem:[#allocation90_spill] sm:$0xff] }
 0x36c   : > { %3320 = vmatprep.mubr.bf16.mxu0 %v6234_v53  ;;  %3995 = vmatprep.mubr.bf16.mxu1 %v6234_v53  ;;  %v7723_v53 = vld [vmem:[#allocation33_spill] sm:$0xff] }
 0x373   : > { %3321 = vmatmul.mubr.bf16.gmra.mrb[108].mxu0 %v7718_v44  ;;  %3996 = vmatmul.mubr.bf16.gmra.mrb[108].mxu1 %v7718_v44 }
 0x374   : > { %3330 = vmatprep.mubr.bf16.mxu0 %v7719_v27  ;;  %4003 = vmatprep.mubr.bf16.mxu1 %v7719_v27 }
 0x37b   : > { %3331 = vmatmul.mubr.bf16.gmra.mrb[112].mxu0 %v7720_v25  ;;  %4004 = vmatmul.mubr.bf16.gmra.mrb[112].mxu1 %v7720_v25 }
 0x37c   : > { %3340 = vmatprep.mubr.bf16.mxu0 %v7721_v46  ;;  %4011 = vmatprep.mubr.bf16.mxu1 %v7721_v46 }
 0x383   : > { %3341 = vmatmul.mubr.bf16.gmra.mrb[116].mxu0 %v7722_v11  ;;  %4012 = vmatmul.mubr.bf16.gmra.mrb[116].mxu1 %v7722_v11 }
 0x384   : > { %3350 = vmatprep.mubr.bf16.mxu0 %v7723_v53  ;;  %4019 = vmatprep.mubr.bf16.mxu1 %v7723_v53 }
 0x38b   : > { %3351 = vmatmul.mubr.bf16.gmra.mrb[120].mxu0 %v7724_v8  ;;  %4020 = vmatmul.mubr.bf16.gmra.mrb[120].mxu1 %v7724_v8 }
 0x38c   : > { %3360 = vmatprep.mubr.bf16.mxu0 %v7725_v23  ;;  %4027 = vmatprep.mubr.bf16.mxu1 %v7725_v23 }
 0x393   : > { %3361 = vmatmul.mubr.bf16.gmra.mrb[124].mxu0 %v7726_v9  ;;  %4028 = vmatmul.mubr.bf16.gmra.mrb[124].mxu1 %v7726_v9 }
 0x394   : > { %3370 = vmatprep.mubr.bf16.mxu0 %v7727_v45  ;;  %4035 = vmatprep.mubr.bf16.mxu1 %v7727_v45 }
 0x39b   : > { %3371 = vmatmul.mubr.bf16.gmra.mrb[128].mxu0 %v7728_v60  ;;  %4036 = vmatmul.mubr.bf16.gmra.mrb[128].mxu1 %v7728_v60 }
 0x39c   : > { %3380 = vmatprep.mubr.bf16.mxu0 %v7729_v24  ;;  %4043 = vmatprep.mubr.bf16.mxu1 %v7729_v24 }
 0x3a3   : > { %3381 = vmatmul.mubr.bf16.gmra.mrb[132].mxu0 %v7730_v33  ;;  %4044 = vmatmul.mubr.bf16.gmra.mrb[132].mxu1 %v7730_v33 }
 0x3a4   : > { %3390 = vmatprep.mubr.bf16.mxu0 %v7731_v52  ;;  %4051 = vmatprep.mubr.bf16.mxu1 %v7731_v52 }
 0x3ab   : > { %3391 = vmatmul.mubr.bf16.gmra.mrb[136].mxu0 %v7732_v16  ;;  %4052 = vmatmul.mubr.bf16.gmra.mrb[136].mxu1 %v7732_v16 }
 0x3ac   : > { %3400 = vmatprep.mubr.bf16.mxu0 %v7733_v35  ;;  %4059 = vmatprep.mubr.bf16.mxu1 %v7733_v35 }
 0x3b3   : > { %3401 = vmatmul.mubr.bf16.gmra.mrb[140].mxu0 %v7734_v19  ;;  %4060 = vmatmul.mubr.bf16.gmra.mrb[140].mxu1 %v7734_v19 }
 0x3b4   : > { %3410 = vmatprep.mubr.bf16.mxu0 %v7735_v30  ;;  %4067 = vmatprep.mubr.bf16.mxu1 %v7735_v30 }
 0x3bb   : > { %3411 = vmatmul.mubr.bf16.gmra.mrb[144].mxu0 %v7736_v15  ;;  %4068 = vmatmul.mubr.bf16.gmra.mrb[144].mxu1 %v7736_v15 }
 0x3bc   : > { %3420 = vmatprep.mubr.bf16.mxu0 %v7737_v13  ;;  %4075 = vmatprep.mubr.bf16.mxu1 %v7737_v13 }
 0x3c3   : > { %3421 = vmatmul.mubr.bf16.gmra.mrb[148].mxu0 %v7738_v20  ;;  %4076 = vmatmul.mubr.bf16.gmra.mrb[148].mxu1 %v7738_v20 }
 0x3c4   : > { %3430 = vmatprep.mubr.bf16.mxu0 %v7739_v50  ;;  %4083 = vmatprep.mubr.bf16.mxu1 %v7739_v50 }
 0x3cb   : > { %3431 = vmatmul.mubr.bf16.gmra.mrb[152].mxu0 %v7740_v28  ;;  %4084 = vmatmul.mubr.bf16.gmra.mrb[152].mxu1 %v7740_v28 }
 0x3cc   : > { %3440 = vmatprep.mubr.bf16.mxu0 %v7741_v40  ;;  %4091 = vmatprep.mubr.bf16.mxu1 %v7741_v40 }
 0x3d3   : > { %3441 = vmatmul.mubr.bf16.gmra.mrb[156].mxu0 %v7742_v29  ;;  %4092 = vmatmul.mubr.bf16.gmra.mrb[156].mxu1 %v7742_v29 }
 0x3d4   : > { %3450 = vmatprep.mubr.bf16.mxu0 %v7743_v57  ;;  %4099 = vmatprep.mubr.bf16.mxu1 %v7743_v57 }
 0x3db   : > { %3451 = vmatmul.mubr.bf16.gmra.mrb[160].mxu0 %v7744_v41  ;;  %4100 = vmatmul.mubr.bf16.gmra.mrb[160].mxu1 %v7744_v41 }
 0x3dc   : > { %3460 = vmatprep.mubr.bf16.mxu0 %v7745_v7  ;;  %4107 = vmatprep.mubr.bf16.mxu1 %v7745_v7 }
 0x3e3   : > { %3461 = vmatmul.mubr.bf16.gmra.mrb[164].mxu0 %v7746_v21  ;;  %4108 = vmatmul.mubr.bf16.gmra.mrb[164].mxu1 %v7746_v21 }
 0x3e4   : > { %4775 = vmatprep.mubr.msk.bf16.mxu0 %vm1463_vm0, %v7747_v12  ;;  %4796 = vmatprep.mubr.msk.bf16.mxu1 %vm1463_vm0, %v7747_v12 }
 0x3eb   : > { %3504 = vmatmul.mubr.bf16.vlgmr.msra.gmra.mrb[84].mxu0 %v7748_v34  ;;  %4149 = vmatmul.mubr.bf16.vlgmr.msra.gmra.mrb[84].mxu1 %v7748_v34 }
 0x3ec   : > { %4776 = vmatprep.mubr.msk.bf16.mxu0 %vm1463_vm0, %v7749_v37  ;;  %4797 = vmatprep.mubr.msk.bf16.mxu1 %vm1463_vm0, %v7749_v37 }
 0x3f3   : > { %3514 = vmatmul.mubr.bf16.gmra.mrb[88].mxu0 %v7750_v18  ;;  %4157 = vmatmul.mubr.bf16.gmra.mrb[88].mxu1 %v7750_v18 }
 0x3f4   : > { %4777 = vmatprep.mubr.msk.bf16.mxu0 %vm1463_vm0, %v7751_v48  ;;  %4798 = vmatprep.mubr.msk.bf16.mxu1 %vm1463_vm0, %v7751_v48 }
 0x3fb   : > { %3524 = vmatmul.mubr.bf16.gmra.mrb[92].mxu0 %v7752_v54  ;;  %4165 = vmatmul.mubr.bf16.gmra.mrb[92].mxu1 %v7752_v54 }
 0x3fc   : > { %4778 = vmatprep.mubr.msk.bf16.mxu0 %vm1463_vm0, %v7753_v49  ;;  %4799 = vmatprep.mubr.msk.bf16.mxu1 %vm1463_vm0, %v7753_v49 }
 0x403   : > { %3534 = vmatmul.mubr.bf16.gmra.mrb[96].mxu0 %v7754_v55  ;;  %4173 = vmatmul.mubr.bf16.gmra.mrb[96].mxu1 %v7754_v55 }
 0x404   : > { %4779 = vmatprep.mubr.msk.bf16.mxu0 %vm1463_vm0, %v7755_v32  ;;  %4800 = vmatprep.mubr.msk.bf16.mxu1 %vm1463_vm0, %v7755_v32 }
 0x40b   : > { %3544 = vmatmul.mubr.bf16.gmra.mrb[100].mxu0 %v7756_v47  ;;  %4181 = vmatmul.mubr.bf16.gmra.mrb[100].mxu1 %v7756_v47 }
 0x40c   : > { %4780 = vmatprep.mubr.msk.bf16.mxu0 %vm1463_vm0, %v7757_v39  ;;  %4801 = vmatprep.mubr.msk.bf16.mxu1 %vm1463_vm0, %v7757_v39 }
 0x413   : > { %3554 = vmatmul.mubr.bf16.gmra.mrb[104].mxu0 %v7758_v51  ;;  %4189 = vmatmul.mubr.bf16.gmra.mrb[104].mxu1 %v7758_v51 }
 0x414   : > { %4781 = vmatprep.mubr.msk.bf16.mxu0 %vm1463_vm0, %v7759_v58  ;;  %4802 = vmatprep.mubr.msk.bf16.mxu1 %vm1463_vm0, %v7759_v58 }
 0x41b   : > { %3564 = vmatmul.mubr.bf16.gmra.mrb[108].mxu0 %v7760_v26  ;;  %4197 = vmatmul.mubr.bf16.gmra.mrb[108].mxu1 %v7760_v26 }
 0x41c   : > { %4782 = vmatprep.mubr.msk.bf16.mxu0 %vm1463_vm0, %v6524_v6  ;;  %4803 = vmatprep.mubr.msk.bf16.mxu1 %vm1463_vm0, %v6524_v6  ;;  %v7761_v6 = vld [vmem:[#allocation71_spill] sm:$0xff] }
 0x423   : > { %3574 = vmatmul.mubr.bf16.gmra.mrb[112].mxu0 %v6537_v0  ;;  %4205 = vmatmul.mubr.bf16.gmra.mrb[112].mxu1 %v6537_v0  ;;  %v7763_v0 = vld [vmem:[#allocation73_spill] sm:$0xff] }
 0x424   : > { %4783 = vmatprep.mubr.msk.bf16.mxu0 %vm1463_vm0, %v6540_v43  ;;  %4804 = vmatprep.mubr.msk.bf16.mxu1 %vm1463_vm0, %v6540_v43  ;;  %v7762_v43 = vld [vmem:[#allocation72_spill] sm:$0xff] }
 0x42b   : > { %3584 = vmatmul.mubr.bf16.gmra.mrb[116].mxu0 %v6553_v4  ;;  %4213 = vmatmul.mubr.bf16.gmra.mrb[116].mxu1 %v6553_v4  ;;  %v7764_v4 = vld [vmem:[#allocation74_spill] sm:$0xff] }
 0x42c   : > { %4784 = vmatprep.mubr.msk.bf16.mxu0 %vm1463_vm0, %v6556_v31  ;;  %4805 = vmatprep.mubr.msk.bf16.mxu1 %vm1463_vm0, %v6556_v31  ;;  %v7765_v31 = vld [vmem:[#allocation75_spill] sm:$0xff] }
 0x433   : > { %3594 = vmatmul.mubr.bf16.gmra.mrb[120].mxu0 %v6569_v10  ;;  %4221 = vmatmul.mubr.bf16.gmra.mrb[120].mxu1 %v6569_v10  ;;  %v7766_v10 = vld [vmem:[#allocation76_spill] sm:$0xff] }
 0x434   : > { %4785 = vmatprep.mubr.msk.bf16.mxu0 %vm1463_vm0, %v6571_v62  ;;  %4806 = vmatprep.mubr.msk.bf16.mxu1 %vm1463_vm0, %v6571_v62  ;;  %v7767_v62 = vld [vmem:[#allocation77_spill] sm:$0xff] }
 0x43b   : > { %3604 = vmatmul.mubr.bf16.gmra.mrb[124].mxu0 %v6583_v5  ;;  %4229 = vmatmul.mubr.bf16.gmra.mrb[124].mxu1 %v6583_v5  ;;  %v7768_v5 = vld [vmem:[#allocation78_spill] sm:$0xff] }
 0x43c   : > { %4786 = vmatprep.mubr.msk.bf16.mxu0 %vm1463_vm0, %v7761_v6  ;;  %4807 = vmatprep.mubr.msk.bf16.mxu1 %vm1463_vm0, %v7761_v6 }
 0x443   : > { %3614 = vmatmul.mubr.bf16.gmra.mrb[128].mxu0 %v7762_v43  ;;  %4237 = vmatmul.mubr.bf16.gmra.mrb[128].mxu1 %v7762_v43 }
 0x444   : > { %4787 = vmatprep.mubr.msk.bf16.mxu0 %vm1463_vm0, %v7763_v0  ;;  %4808 = vmatprep.mubr.msk.bf16.mxu1 %vm1463_vm0, %v7763_v0 }
 0x44b   : > { %3624 = vmatmul.mubr.bf16.gmra.mrb[132].mxu0 %v7764_v4  ;;  %4245 = vmatmul.mubr.bf16.gmra.mrb[132].mxu1 %v7764_v4 }
 0x44c   : > { %4788 = vmatprep.mubr.msk.bf16.mxu0 %vm1463_vm0, %v7765_v31  ;;  %4809 = vmatprep.mubr.msk.bf16.mxu1 %vm1463_vm0, %v7765_v31 }
 0x453   : > { %3634 = vmatmul.mubr.bf16.gmra.mrb[136].mxu0 %v7766_v10  ;;  %4253 = vmatmul.mubr.bf16.gmra.mrb[136].mxu1 %v7766_v10 }
 0x454   : > { %4789 = vmatprep.mubr.msk.bf16.mxu0 %vm1463_vm0, %v7767_v62  ;;  %4810 = vmatprep.mubr.msk.bf16.mxu1 %vm1463_vm0, %v7767_v62 }
 0x45b   : > { %3644 = vmatmul.mubr.bf16.gmra.mrb[140].mxu0 %v7768_v5  ;;  %4261 = vmatmul.mubr.bf16.gmra.mrb[140].mxu1 %v7768_v5 }
 0x45c   : > { %4790 = vmatprep.mubr.msk.bf16.mxu0 %vm1463_vm0, %v7769_v59  ;;  %4811 = vmatprep.mubr.msk.bf16.mxu1 %vm1463_vm0, %v7769_v59 }
 0x463   : > { %3654 = vmatmul.mubr.bf16.gmra.mrb[144].mxu0 %v7770_v14  ;;  %4269 = vmatmul.mubr.bf16.gmra.mrb[144].mxu1 %v7770_v14 }
 0x464   : > { %4791 = vmatprep.mubr.msk.bf16.mxu0 %vm1463_vm0, %v7771_v22  ;;  %4812 = vmatprep.mubr.msk.bf16.mxu1 %vm1463_vm0, %v7771_v22 }
 0x46b   : > { %3664 = vmatmul.mubr.bf16.gmra.mrb[148].mxu0 %v7772_v17  ;;  %4277 = vmatmul.mubr.bf16.gmra.mrb[148].mxu1 %v7772_v17 }
 0x46c   : > { %4792 = vmatprep.mubr.msk.bf16.mxu0 %vm1463_vm0, %v7773_v38  ;;  %4813 = vmatprep.mubr.msk.bf16.mxu1 %vm1463_vm0, %v7773_v38 }
 0x473   : > { %3674 = vmatmul.mubr.bf16.gmra.mrb[152].mxu0 %v7774_v36  ;;  %4285 = vmatmul.mubr.bf16.gmra.mrb[152].mxu1 %v7774_v36 }
 0x474   : > { %4793 = vmatprep.mubr.msk.bf16.mxu0 %vm1463_vm0, %v7775_v1  ;;  %4814 = vmatprep.mubr.msk.bf16.mxu1 %vm1463_vm0, %v7775_v1 }
 0x47b   : > { %3684 = vmatmul.mubr.bf16.gmra.mrb[156].mxu0 %v7776_v61  ;;  %4293 = vmatmul.mubr.bf16.gmra.mrb[156].mxu1 %v7776_v61 }
 0x47c   : > { %4794 = vmatprep.mubr.msk.bf16.mxu0 %vm1463_vm0, %v7777_v56  ;;  %4815 = vmatprep.mubr.msk.bf16.mxu1 %vm1463_vm0, %v7777_v56 }
 0x483   : > { %3694 = vmatmul.mubr.bf16.gmra.mrb[160].mxu0 %v7778_v3  ;;  %4301 = vmatmul.mubr.bf16.gmra.mrb[160].mxu1 %v7778_v3 }
 0x484   : > { %4795 = vmatprep.mubr.msk.bf16.mxu0 %vm1463_vm0, %v7779_v63  ;;  %4816 = vmatprep.mubr.msk.bf16.mxu1 %vm1463_vm0, %v7779_v63 }
 0x48b   : > { %3704 = vmatmul.mubr.bf16.gmra.mrb[164].mxu0 %v7780_v2  ;;  %4309 = vmatmul.mubr.bf16.gmra.mrb[164].mxu1 %v7780_v2 }
 0x4be   : > { %v3505_v42 = vpop.f32.mrb[84].mxu0  ;;  %v4150_v44 = vpop.f32.mrb[84].mxu1 }
 0x4bf   : > { %4321 = vst [vmem:[%s6762_s19 + $0x20] sm:$0xff] %v3505_v42  ;;  %v3507_v27 = vpop.f32.mrb[85].mxu0  ;;  %4324 = vst.msk [vmem:[%s6762_s19 + $0x30] sm:$0xff] %vm4323_vm1, %v4150_v44  ;;  %v4152_v25 = vpop.f32.mrb[85].mxu1 }
 0x4c0   : > { %4322 = vst [vmem:[%s6762_s19 + $0x28] sm:$0xff] %v3507_v27  ;;  %v3509_v46 = vpop.f32.mrb[86].mxu0  ;;  %v4153_v11 = vpop.f32.mrb[86].mxu1 }
 0x4c1   : > { %4329 = vst [vmem:[%s6762_s19 + $0x58] sm:$0xff] %v3509_v46  ;;  %v3511_v53 = vpop.f32.mrb[87].mxu0  ;;  %4331 = vst.msk [vmem:[%s6762_s19 + $0x68] sm:$0xff] %vm4323_vm1, %v4153_v11  ;;  %v4155_v8 = vpop.f32.mrb[87].mxu1 }
 0x4c2   : > { %4330 = vst [vmem:[%s6762_s19 + $0x60] sm:$0xff] %v3511_v53 }
 0x4c6   : > { %v3515_v23 = vpop.f32.mrb[88].mxu0  ;;  %v4158_v9 = vpop.f32.mrb[88].mxu1 }
 0x4c7   : > { %4336 = vst [vmem:[%s6762_s19 + $0x90] sm:$0xff] %v3515_v23  ;;  %v3517_v45 = vpop.f32.mrb[89].mxu0  ;;  %4338 = vst.msk [vmem:[%s6762_s19 + $0xa0] sm:$0xff] %vm4323_vm1, %v4158_v9  ;;  %v4160_v60 = vpop.f32.mrb[89].mxu1 }
 0x4c8   : > { %4337 = vst [vmem:[%s6762_s19 + $0x98] sm:$0xff] %v3517_v45  ;;  %v3519_v24 = vpop.f32.mrb[90].mxu0  ;;  %v4161_v33 = vpop.f32.mrb[90].mxu1 }
 0x4c9   : > { %4343 = vst [vmem:[%s6762_s19 + $0xc8] sm:$0xff] %v3519_v24  ;;  %v3521_v52 = vpop.f32.mrb[91].mxu0  ;;  %4345 = vst.msk [vmem:[%s6762_s19 + $0xd8] sm:$0xff] %vm4323_vm1, %v4161_v33  ;;  %v4163_v16 = vpop.f32.mrb[91].mxu1 }
 0x4ca   : > { %4344 = vst [vmem:[%s6762_s19 + $0xd0] sm:$0xff] %v3521_v52 }
 0x4ce   : > { %v3525_v35 = vpop.f32.mrb[92].mxu0  ;;  %v4166_v19 = vpop.f32.mrb[92].mxu1 }
 0x4cf   : > { %4350 = vst [vmem:[%s6762_s19 + $0x100] sm:$0xff] %v3525_v35  ;;  %v3527_v30 = vpop.f32.mrb[93].mxu0  ;;  %4352 = vst.msk [vmem:[%s6762_s19 + $0x110] sm:$0xff] %vm4323_vm1, %v4166_v19  ;;  %v4168_v15 = vpop.f32.mrb[93].mxu1 }
 0x4d0   : > { %4351 = vst [vmem:[%s6762_s19 + $0x108] sm:$0xff] %v3527_v30  ;;  %v3529_v13 = vpop.f32.mrb[94].mxu0  ;;  %v4169_v20 = vpop.f32.mrb[94].mxu1 }
 0x4d1   : > { %4357 = vst [vmem:[%s6762_s19 + $0x138] sm:$0xff] %v3529_v13  ;;  %v3531_v50 = vpop.f32.mrb[95].mxu0  ;;  %4359 = vst.msk [vmem:[%s6762_s19 + $0x148] sm:$0xff] %vm4323_vm1, %v4169_v20  ;;  %v4171_v28 = vpop.f32.mrb[95].mxu1 }
 0x4d2   : > { %4358 = vst [vmem:[%s6762_s19 + $0x140] sm:$0xff] %v3531_v50 }
 0x4d6   : > { %v3535_v40 = vpop.f32.mrb[96].mxu0  ;;  %v4174_v29 = vpop.f32.mrb[96].mxu1 }
 0x4d7   : > { %4364 = vst [vmem:[%s6762_s19 + $0x170] sm:$0xff] %v3535_v40  ;;  %v3537_v57 = vpop.f32.mrb[97].mxu0  ;;  %4366 = vst.msk [vmem:[%s6762_s19 + $0x180] sm:$0xff] %vm4323_vm1, %v4174_v29  ;;  %v4176_v41 = vpop.f32.mrb[97].mxu1 }
 0x4d8   : > { %4365 = vst [vmem:[%s6762_s19 + $0x178] sm:$0xff] %v3537_v57  ;;  %v3539_v7 = vpop.f32.mrb[98].mxu0  ;;  %v4177_v21 = vpop.f32.mrb[98].mxu1 }
 0x4d9   : > { %4371 = vst [vmem:[%s6762_s19 + $0x1a8] sm:$0xff] %v3539_v7  ;;  %v3541_v12 = vpop.f32.mrb[99].mxu0  ;;  %4373 = vst.msk [vmem:[%s6762_s19 + $0x1b8] sm:$0xff] %vm4323_vm1, %v4177_v21  ;;  %v4179_v34 = vpop.f32.mrb[99].mxu1 }
 0x4da   : > { %4372 = vst [vmem:[%s6762_s19 + $0x1b0] sm:$0xff] %v3541_v12 }
 0x4de   : > { %v3545_v37 = vpop.f32.mrb[100].mxu0  ;;  %v4182_v18 = vpop.f32.mrb[100].mxu1 }
 0x4df   : > { %4378 = vst [vmem:[%s6762_s19 + $0x1e0] sm:$0xff] %v3545_v37  ;;  %v3547_v48 = vpop.f32.mrb[101].mxu0  ;;  %4380 = vst.msk [vmem:[%s6762_s19 + $0x1f0] sm:$0xff] %vm4323_vm1, %v4182_v18  ;;  %v4184_v54 = vpop.f32.mrb[101].mxu1 }
 0x4e0   : > { %4379 = vst [vmem:[%s6762_s19 + $0x1e8] sm:$0xff] %v3547_v48  ;;  %v3549_v49 = vpop.f32.mrb[102].mxu0  ;;  %v4185_v55 = vpop.f32.mrb[102].mxu1 }
 0x4e1   : > { %4385 = vst [vmem:[%s6762_s19 + $0x218] sm:$0xff] %v3549_v49  ;;  %v3551_v32 = vpop.f32.mrb[103].mxu0  ;;  %4387 = vst.msk [vmem:[%s6762_s19 + $0x228] sm:$0xff] %vm4323_vm1, %v4185_v55  ;;  %v4187_v47 = vpop.f32.mrb[103].mxu1 }
 0x4e2   : > { %4386 = vst [vmem:[%s6762_s19 + $0x220] sm:$0xff] %v3551_v32 }
 0x4e6   : > { %v3555_v39 = vpop.f32.mrb[104].mxu0  ;;  %v4190_v51 = vpop.f32.mrb[104].mxu1 }
 0x4e7   : > { %4392 = vst [vmem:[%s6762_s19 + $0x250] sm:$0xff] %v3555_v39  ;;  %v3557_v58 = vpop.f32.mrb[105].mxu0  ;;  %4394 = vst.msk [vmem:[%s6762_s19 + $0x260] sm:$0xff] %vm4323_vm1, %v4190_v51  ;;  %v4192_v26 = vpop.f32.mrb[105].mxu1 }
 0x4e8   : > { %4393 = vst [vmem:[%s6762_s19 + $0x258] sm:$0xff] %v3557_v58  ;;  %v3559_v6 = vpop.f32.mrb[106].mxu0  ;;  %v4193_v43 = vpop.f32.mrb[106].mxu1 }
 0x4e9   : > { %4399 = vst [vmem:[%s6762_s19 + $0x288] sm:$0xff] %v3559_v6  ;;  %v3561_v0 = vpop.f32.mrb[107].mxu0  ;;  %4401 = vst.msk [vmem:[%s6762_s19 + $0x298] sm:$0xff] %vm4323_vm1, %v4193_v43  ;;  %v4195_v4 = vpop.f32.mrb[107].mxu1 }
 0x4ea   : > { %4400 = vst [vmem:[%s6762_s19 + $0x290] sm:$0xff] %v3561_v0 }
 0x4ee   : > { %v3565_v31 = vpop.f32.mrb[108].mxu0  ;;  %v4198_v10 = vpop.f32.mrb[108].mxu1 }
 0x4ef   : > { %4406 = vst [vmem:[%s6762_s19 + $0x2c0] sm:$0xff] %v3565_v31  ;;  %v3567_v62 = vpop.f32.mrb[109].mxu0  ;;  %4408 = vst.msk [vmem:[%s6762_s19 + $0x2d0] sm:$0xff] %vm4323_vm1, %v4198_v10  ;;  %v4200_v5 = vpop.f32.mrb[109].mxu1 }
 0x4f0   : > { %4407 = vst [vmem:[%s6762_s19 + $0x2c8] sm:$0xff] %v3567_v62  ;;  %v3569_v59 = vpop.f32.mrb[110].mxu0  ;;  %v4201_v14 = vpop.f32.mrb[110].mxu1 }
 0x4f1   : > { %4413 = vst [vmem:[%s6762_s19 + $0x2f8] sm:$0xff] %v3569_v59  ;;  %v3571_v22 = vpop.f32.mrb[111].mxu0  ;;  %4415 = vst.msk [vmem:[%s6762_s19 + $0x308] sm:$0xff] %vm4323_vm1, %v4201_v14  ;;  %v4203_v17 = vpop.f32.mrb[111].mxu1 }
 0x4f2   : > { %4414 = vst [vmem:[%s6762_s19 + $0x300] sm:$0xff] %v3571_v22 }
 0x4f6   : > { %v3575_v38 = vpop.f32.mrb[112].mxu0  ;;  %v4206_v36 = vpop.f32.mrb[112].mxu1 }
 0x4f7   : > { %4420 = vst [vmem:[%s6762_s19 + $0x330] sm:$0xff] %v3575_v38  ;;  %v3577_v1 = vpop.f32.mrb[113].mxu0  ;;  %4422 = vst.msk [vmem:[%s6762_s19 + $0x340] sm:$0xff] %vm4323_vm1, %v4206_v36  ;;  %v4208_v61 = vpop.f32.mrb[113].mxu1 }
 0x4f8   : > { %4421 = vst [vmem:[%s6762_s19 + $0x338] sm:$0xff] %v3577_v1  ;;  %v3579_v56 = vpop.f32.mrb[114].mxu0  ;;  %v4209_v3 = vpop.f32.mrb[114].mxu1 }
 0x4f9   : > { %4427 = vst [vmem:[%s6762_s19 + $0x368] sm:$0xff] %v3579_v56  ;;  %v3581_v63 = vpop.f32.mrb[115].mxu0  ;;  %4429 = vst.msk [vmem:[%s6762_s19 + $0x378] sm:$0xff] %vm4323_vm1, %v4209_v3  ;;  %v4211_v2 = vpop.f32.mrb[115].mxu1 }
 0x4fa   : > { %4428 = vst [vmem:[%s6762_s19 + $0x370] sm:$0xff] %v3581_v63 }
 0x4fe   : > { %v3585_v42 = vpop.f32.mrb[116].mxu0  ;;  %v4214_v44 = vpop.f32.mrb[116].mxu1 }
 0x4ff   : > { %4434 = vst [vmem:[%s6762_s19 + $0x3a0] sm:$0xff] %v3585_v42  ;;  %v3587_v27 = vpop.f32.mrb[117].mxu0  ;;  %4436 = vst.msk [vmem:[%s6762_s19 + $0x3b0] sm:$0xff] %vm4323_vm1, %v4214_v44  ;;  %v4216_v25 = vpop.f32.mrb[117].mxu1 }
 0x500   : > { %4435 = vst [vmem:[%s6762_s19 + $0x3a8] sm:$0xff] %v3587_v27  ;;  %v3589_v46 = vpop.f32.mrb[118].mxu0  ;;  %v4217_v11 = vpop.f32.mrb[118].mxu1 }
 0x501   : > { %4441 = vst [vmem:[%s6762_s19 + $0x3d8] sm:$0xff] %v3589_v46  ;;  %v3591_v53 = vpop.f32.mrb[119].mxu0  ;;  %4443 = vst.msk [vmem:[%s6762_s19 + $0x3e8] sm:$0xff] %vm4323_vm1, %v4217_v11  ;;  %v4219_v8 = vpop.f32.mrb[119].mxu1 }
 0x502   : > { %4442 = vst [vmem:[%s6762_s19 + $0x3e0] sm:$0xff] %v3591_v53 }
 0x506   : > { %v3595_v23 = vpop.f32.mrb[120].mxu0  ;;  %v4222_v9 = vpop.f32.mrb[120].mxu1 }
 0x507   : > { %4448 = vst [vmem:[%s6762_s19 + $0x410] sm:$0xff] %v3595_v23  ;;  %v3597_v45 = vpop.f32.mrb[121].mxu0  ;;  %4450 = vst.msk [vmem:[%s6762_s19 + $0x420] sm:$0xff] %vm4323_vm1, %v4222_v9  ;;  %v4224_v60 = vpop.f32.mrb[121].mxu1 }
 0x508   : > { %4449 = vst [vmem:[%s6762_s19 + $0x418] sm:$0xff] %v3597_v45  ;;  %v3599_v24 = vpop.f32.mrb[122].mxu0  ;;  %v4225_v33 = vpop.f32.mrb[122].mxu1 }
 0x509   : > { %4455 = vst [vmem:[%s6762_s19 + $0x448] sm:$0xff] %v3599_v24  ;;  %v3601_v52 = vpop.f32.mrb[123].mxu0  ;;  %4457 = vst.msk [vmem:[%s6762_s19 + $0x458] sm:$0xff] %vm4323_vm1, %v4225_v33  ;;  %v4227_v16 = vpop.f32.mrb[123].mxu1 }
 0x50a   : > { %4456 = vst [vmem:[%s6762_s19 + $0x450] sm:$0xff] %v3601_v52 }
 0x50e   : > { %v3605_v35 = vpop.f32.mrb[124].mxu0  ;;  %v4230_v19 = vpop.f32.mrb[124].mxu1 }
 0x50f   : > { %4462 = vst [vmem:[%s6762_s19 + $0x480] sm:$0xff] %v3605_v35  ;;  %v3607_v30 = vpop.f32.mrb[125].mxu0  ;;  %4464 = vst.msk [vmem:[%s6762_s19 + $0x490] sm:$0xff] %vm4323_vm1, %v4230_v19  ;;  %v4232_v15 = vpop.f32.mrb[125].mxu1 }
 0x510   : > { %4463 = vst [vmem:[%s6762_s19 + $0x488] sm:$0xff] %v3607_v30  ;;  %v3609_v13 = vpop.f32.mrb[126].mxu0  ;;  %v4233_v20 = vpop.f32.mrb[126].mxu1 }
 0x511   : > { %4469 = vst [vmem:[%s6762_s19 + $0x4b8] sm:$0xff] %v3609_v13  ;;  %v3611_v50 = vpop.f32.mrb[127].mxu0  ;;  %4471 = vst.msk [vmem:[%s6762_s19 + $0x4c8] sm:$0xff] %vm4323_vm1, %v4233_v20  ;;  %v4235_v28 = vpop.f32.mrb[127].mxu1 }
 0x512   : > { %4470 = vst [vmem:[%s6762_s19 + $0x4c0] sm:$0xff] %v3611_v50 }
 0x516   : > { %v3615_v40 = vpop.f32.mrb[128].mxu0  ;;  %v4238_v29 = vpop.f32.mrb[128].mxu1 }
 0x517   : > { %4476 = vst [vmem:[%s6762_s19 + $0x4f0] sm:$0xff] %v3615_v40  ;;  %v3617_v57 = vpop.f32.mrb[129].mxu0  ;;  %4478 = vst.msk [vmem:[%s6762_s19 + $0x500] sm:$0xff] %vm4323_vm1, %v4238_v29  ;;  %v4240_v41 = vpop.f32.mrb[129].mxu1 }
 0x518   : > { %4477 = vst [vmem:[%s6762_s19 + $0x4f8] sm:$0xff] %v3617_v57  ;;  %v3619_v7 = vpop.f32.mrb[130].mxu0  ;;  %v4241_v21 = vpop.f32.mrb[130].mxu1 }
 0x519   : > { %4483 = vst [vmem:[%s6762_s19 + $0x528] sm:$0xff] %v3619_v7  ;;  %v3621_v12 = vpop.f32.mrb[131].mxu0  ;;  %4485 = vst.msk [vmem:[%s6762_s19 + $0x538] sm:$0xff] %vm4323_vm1, %v4241_v21  ;;  %v4243_v34 = vpop.f32.mrb[131].mxu1 }
 0x51a   : > { %4484 = vst [vmem:[%s6762_s19 + $0x530] sm:$0xff] %v3621_v12 }
 0x51e   : > { %v3625_v37 = vpop.f32.mrb[132].mxu0  ;;  %v4246_v18 = vpop.f32.mrb[132].mxu1 }
 0x51f   : > { %4490 = vst [vmem:[%s6762_s19 + $0x560] sm:$0xff] %v3625_v37  ;;  %v3627_v48 = vpop.f32.mrb[133].mxu0  ;;  %4492 = vst.msk [vmem:[%s6762_s19 + $0x570] sm:$0xff] %vm4323_vm1, %v4246_v18  ;;  %v4248_v54 = vpop.f32.mrb[133].mxu1 }
 0x520   : > { %4491 = vst [vmem:[%s6762_s19 + $0x568] sm:$0xff] %v3627_v48  ;;  %v3629_v49 = vpop.f32.mrb[134].mxu0  ;;  %v4249_v55 = vpop.f32.mrb[134].mxu1 }
 0x521   : > { %4497 = vst [vmem:[%s6762_s19 + $0x598] sm:$0xff] %v3629_v49  ;;  %v3631_v32 = vpop.f32.mrb[135].mxu0  ;;  %4499 = vst.msk [vmem:[%s6762_s19 + $0x5a8] sm:$0xff] %vm4323_vm1, %v4249_v55  ;;  %v4251_v47 = vpop.f32.mrb[135].mxu1 }
 0x522   : > { %4498 = vst [vmem:[%s6762_s19 + $0x5a0] sm:$0xff] %v3631_v32 }
 0x526   : > { %v3635_v39 = vpop.f32.mrb[136].mxu0  ;;  %v4254_v51 = vpop.f32.mrb[136].mxu1 }
 0x527   : > { %4504 = vst [vmem:[%s6762_s19 + $0x5d0] sm:$0xff] %v3635_v39  ;;  %v3637_v58 = vpop.f32.mrb[137].mxu0  ;;  %4506 = vst.msk [vmem:[%s6762_s19 + $0x5e0] sm:$0xff] %vm4323_vm1, %v4254_v51  ;;  %v4256_v26 = vpop.f32.mrb[137].mxu1 }
 0x528   : > { %4505 = vst [vmem:[%s6762_s19 + $0x5d8] sm:$0xff] %v3637_v58  ;;  %v3639_v6 = vpop.f32.mrb[138].mxu0  ;;  %v4257_v43 = vpop.f32.mrb[138].mxu1 }
 0x529   : > { %4511 = vst [vmem:[%s6762_s19 + $0x608] sm:$0xff] %v3639_v6  ;;  %v3641_v0 = vpop.f32.mrb[139].mxu0  ;;  %4513 = vst.msk [vmem:[%s6762_s19 + $0x618] sm:$0xff] %vm4323_vm1, %v4257_v43  ;;  %v4259_v4 = vpop.f32.mrb[139].mxu1 }
 0x52a   : > { %4512 = vst [vmem:[%s6762_s19 + $0x610] sm:$0xff] %v3641_v0 }
 0x52e   : > { %v3645_v31 = vpop.f32.mrb[140].mxu0  ;;  %v4262_v10 = vpop.f32.mrb[140].mxu1 }
 0x52f   : > { %4518 = vst [vmem:[%s6762_s19 + $0x640] sm:$0xff] %v3645_v31  ;;  %v3647_v62 = vpop.f32.mrb[141].mxu0  ;;  %4520 = vst.msk [vmem:[%s6762_s19 + $0x650] sm:$0xff] %vm4323_vm1, %v4262_v10  ;;  %v4264_v5 = vpop.f32.mrb[141].mxu1 }
 0x530   : > { %4519 = vst [vmem:[%s6762_s19 + $0x648] sm:$0xff] %v3647_v62  ;;  %v3649_v59 = vpop.f32.mrb[142].mxu0  ;;  %v4265_v14 = vpop.f32.mrb[142].mxu1 }
 0x531   : > { %4525 = vst [vmem:[%s6762_s19 + $0x678] sm:$0xff] %v3649_v59  ;;  %v3651_v22 = vpop.f32.mrb[143].mxu0  ;;  %4527 = vst.msk [vmem:[%s6762_s19 + $0x688] sm:$0xff] %vm4323_vm1, %v4265_v14  ;;  %v4267_v17 = vpop.f32.mrb[143].mxu1 }
 0x532   : > { %4526 = vst [vmem:[%s6762_s19 + $0x680] sm:$0xff] %v3651_v22 }
 0x536   : > { %v3655_v38 = vpop.f32.mrb[144].mxu0  ;;  %v4270_v36 = vpop.f32.mrb[144].mxu1 }
 0x537   : > { %4532 = vst [vmem:[%s6762_s19 + $0x6b0] sm:$0xff] %v3655_v38  ;;  %v3657_v1 = vpop.f32.mrb[145].mxu0  ;;  %4534 = vst.msk [vmem:[%s6762_s19 + $0x6c0] sm:$0xff] %vm4323_vm1, %v4270_v36  ;;  %v4272_v61 = vpop.f32.mrb[145].mxu1 }
 0x538   : > { %4533 = vst [vmem:[%s6762_s19 + $0x6b8] sm:$0xff] %v3657_v1  ;;  %v3659_v56 = vpop.f32.mrb[146].mxu0  ;;  %v4273_v3 = vpop.f32.mrb[146].mxu1 }
 0x539   : > { %4539 = vst [vmem:[%s6762_s19 + $0x6e8] sm:$0xff] %v3659_v56  ;;  %v3661_v63 = vpop.f32.mrb[147].mxu0  ;;  %4541 = vst.msk [vmem:[%s6762_s19 + $0x6f8] sm:$0xff] %vm4323_vm1, %v4273_v3  ;;  %v4275_v2 = vpop.f32.mrb[147].mxu1 }
 0x53a   : > { %4540 = vst [vmem:[%s6762_s19 + $0x6f0] sm:$0xff] %v3661_v63 }
 0x53e   : > { %v3665_v42 = vpop.f32.mrb[148].mxu0  ;;  %v4278_v44 = vpop.f32.mrb[148].mxu1 }
 0x53f   : > { %4546 = vst [vmem:[%s6762_s19 + $0x720] sm:$0xff] %v3665_v42  ;;  %v3667_v27 = vpop.f32.mrb[149].mxu0  ;;  %4548 = vst.msk [vmem:[%s6762_s19 + $0x730] sm:$0xff] %vm4323_vm1, %v4278_v44  ;;  %v4280_v25 = vpop.f32.mrb[149].mxu1 }
 0x540   : > { %4547 = vst [vmem:[%s6762_s19 + $0x728] sm:$0xff] %v3667_v27  ;;  %v3669_v46 = vpop.f32.mrb[150].mxu0  ;;  %v4281_v11 = vpop.f32.mrb[150].mxu1 }
 0x541   : > { %4553 = vst [vmem:[%s6762_s19 + $0x758] sm:$0xff] %v3669_v46  ;;  %v3671_v53 = vpop.f32.mrb[151].mxu0  ;;  %4555 = vst.msk [vmem:[%s6762_s19 + $0x768] sm:$0xff] %vm4323_vm1, %v4281_v11  ;;  %v4283_v8 = vpop.f32.mrb[151].mxu1 }
 0x542   : > { %4554 = vst [vmem:[%s6762_s19 + $0x760] sm:$0xff] %v3671_v53 }
 0x546   : > { %v3675_v23 = vpop.f32.mrb[152].mxu0  ;;  %v4286_v9 = vpop.f32.mrb[152].mxu1 }
 0x547   : > { %4560 = vst [vmem:[%s6762_s19 + $0x790] sm:$0xff] %v3675_v23  ;;  %v3677_v45 = vpop.f32.mrb[153].mxu0  ;;  %4562 = vst.msk [vmem:[%s6762_s19 + $0x7a0] sm:$0xff] %vm4323_vm1, %v4286_v9  ;;  %v4288_v60 = vpop.f32.mrb[153].mxu1 }
 0x548   : > { %4561 = vst [vmem:[%s6762_s19 + $0x798] sm:$0xff] %v3677_v45  ;;  %v3679_v24 = vpop.f32.mrb[154].mxu0  ;;  %v4289_v33 = vpop.f32.mrb[154].mxu1 }
 0x549   : > { %4567 = vst [vmem:[%s6762_s19 + $0x7c8] sm:$0xff] %v3679_v24  ;;  %v3681_v52 = vpop.f32.mrb[155].mxu0  ;;  %4569 = vst.msk [vmem:[%s6762_s19 + $0x7d8] sm:$0xff] %vm4323_vm1, %v4289_v33  ;;  %v4291_v16 = vpop.f32.mrb[155].mxu1 }
 0x54a   : > { %4568 = vst [vmem:[%s6762_s19 + $0x7d0] sm:$0xff] %v3681_v52 }
 0x54e   : > { %v3685_v35 = vpop.f32.mrb[156].mxu0  ;;  %v4294_v19 = vpop.f32.mrb[156].mxu1 }
 0x54f   : > { %4574 = vst [vmem:[%s6762_s19 + $0x800] sm:$0xff] %v3685_v35  ;;  %v3687_v30 = vpop.f32.mrb[157].mxu0  ;;  %4576 = vst.msk [vmem:[%s6762_s19 + $0x810] sm:$0xff] %vm4323_vm1, %v4294_v19  ;;  %v4296_v15 = vpop.f32.mrb[157].mxu1 }
 0x550   : > { %4575 = vst [vmem:[%s6762_s19 + $0x808] sm:$0xff] %v3687_v30  ;;  %v3689_v13 = vpop.f32.mrb[158].mxu0  ;;  %v4297_v20 = vpop.f32.mrb[158].mxu1 }
 0x551   : > { %4581 = vst [vmem:[%s6762_s19 + $0x838] sm:$0xff] %v3689_v13  ;;  %v3691_v50 = vpop.f32.mrb[159].mxu0  ;;  %4583 = vst.msk [vmem:[%s6762_s19 + $0x848] sm:$0xff] %vm4323_vm1, %v4297_v20  ;;  %v4299_v28 = vpop.f32.mrb[159].mxu1 }
 0x552   : > { %4582 = vst [vmem:[%s6762_s19 + $0x840] sm:$0xff] %v3691_v50 }
 0x556   : > { %v3695_v40 = vpop.f32.mrb[160].mxu0  ;;  %v4302_v29 = vpop.f32.mrb[160].mxu1 }
 0x557   : > { %4588 = vst [vmem:[%s6762_s19 + $0x870] sm:$0xff] %v3695_v40  ;;  %v3697_v57 = vpop.f32.mrb[161].mxu0  ;;  %4590 = vst.msk [vmem:[%s6762_s19 + $0x880] sm:$0xff] %vm4323_vm1, %v4302_v29  ;;  %v4304_v41 = vpop.f32.mrb[161].mxu1 }
 0x558   : > { %4589 = vst [vmem:[%s6762_s19 + $0x878] sm:$0xff] %v3697_v57  ;;  %v3699_v7 = vpop.f32.mrb[162].mxu0  ;;  %v4305_v21 = vpop.f32.mrb[162].mxu1 }
 0x559   : > { %4595 = vst [vmem:[%s6762_s19 + $0x8a8] sm:$0xff] %v3699_v7  ;;  %v3701_v12 = vpop.f32.mrb[163].mxu0  ;;  %4597 = vst.msk [vmem:[%s6762_s19 + $0x8b8] sm:$0xff] %vm4323_vm1, %v4305_v21  ;;  %v4307_v34 = vpop.f32.mrb[163].mxu1 }
 0x55a   : > { %4596 = vst [vmem:[%s6762_s19 + $0x8b0] sm:$0xff] %v3701_v12 }
 0x55e   : > { %v3705_v37 = vpop.f32.mrb[164].mxu0  ;;  %v4310_v18 = vpop.f32.mrb[164].mxu1 }
 0x55f   : > { %4602 = vst [vmem:[%s6762_s19 + $0x8e0] sm:$0xff] %v3705_v37  ;;  %v3707_v48 = vpop.f32.mrb[165].mxu0  ;;  %4604 = vst.msk [vmem:[%s6762_s19 + $0x8f0] sm:$0xff] %vm4323_vm1, %v4310_v18  ;;  %v4312_v54 = vpop.f32.mrb[165].mxu1 }
 0x560   : > { %4603 = vst [vmem:[%s6762_s19 + $0x8e8] sm:$0xff] %v3707_v48  ;;  %v3709_v49 = vpop.f32.mrb[166].mxu0  ;;  %v4313_v55 = vpop.f32.mrb[166].mxu1 }
 0x561   : > { %4609 = vst [vmem:[%s6762_s19 + $0x918] sm:$0xff] %v3709_v49  ;;  %v3711_v32 = vpop.f32.mrb[167].mxu0  ;;  %4611 = vst.msk [vmem:[%s6762_s19 + $0x928] sm:$0xff] %vm4323_vm1, %v4313_v55  ;;  %v4315_v47 = vpop.f32.mrb[167].mxu1 }
 0x562   : > { %4610 = vst [vmem:[%s6762_s19 + $0x920] sm:$0xff] %v3711_v32 }
 0x563   : > { %5650 = shalt.err (!%p5647_p5)
}
 0x564   : > { %s5651_s18 = scalar_lea.hbm %s7381_s6, 37632  ;;  %s5655_s15 = scalar_lea.hbm %s7441_s2, 75264 }
 0x565   : > { %p5652_p9 = scmp.ne.s32.totalorder %s7381_s6, %s5651_s18  ;;  %p5656_p3 = scmp.lt.u32.totalorder %s7381_s6, %s7441_s2 }
 0x566   : > { %p5657_p7 = scmp.lt.u32.totalorder %s5655_s15, %s5651_s18  ;;  %p5659_p4 = scmp.lt.u32.totalorder %s5651_s18, %s7381_s6 }
 0x567   : > { %p5653_p1 = pnand %p5652_p9, %p5842_p10 }
 0x568   : > { %p5658_p11 = por %p5657_p7, %p5656_p3 }
 0x569   : > { %p5654_p2 = pneg %p5653_p1 }
 0x56a   : > { %p5660_p6 = por %p5659_p4, %p5658_p11 }
 0x56c   : > { %p5661_p8 = pnand %p5660_p6, %p5654_p2 }
 0x56e   : > { %5664 = shalt.err (!%p5661_p8)
}
 0x56f   : > { %s5733_s17 = smov 896   ;;  %s5734_s19 = smov 56  }
 0x570   : > { %5503 = dma.vmem_to_hbm [thread:$0]  (%p5842_p10), %s7383_s30, 37632, %s7381_s6, %s4613_s12, %s5733_s17, %s5733_s17, %s5734_s19  }
 0x571 PF: > { %s4644_s21 = sand.u32 1, %s5703_s9   ;;  %p7781_p12 = scmp.ne.s32.totalorder %s7611_s20, 0 }
 0x572   : > { %p7782_p13 = scmp.ge.s32.totalorder %s5723_s14, 2  ;;  %s4645_s3 = scalar_lea.sflag [#allocation4], %s4644_s21 }
 0x574   : > { %p5514_p0 = pnand %p7782_p13, %p7781_p12 }
 0x576   : > { %5698 = dma.done.wait (!%p5514_p0), %s4645_s3, 37632  }
 0x577   : > { %5700 = vsyncadd (!%p5514_p0), %s4645_s3, 4294929664  ;;  %s19_s14 = sadd.s32 1, %s5723_s14   ;;  %s7783_s9 = smov %s5707_s10 }
 0x578   : > { %p16_p5 = scmp.ge.s32.totalorder %s19_s14, 4   ;;  %s7784_s10 = smov %s5711_s11 }
 0x579   : > { %s7785_s11 = smov %s5851_s28  ;;  %s7786_s12 = smov %s5719_s13 }
 0x57a   : > { %s7787_s13 = smov %s7789_s25  ;;  %18 = sbr.rel (!%p16_p5) target bundleno = 7 (0x7), region = 78 }
 0x581   :  { %4650 = vsyncpa [#allocation3], 1 }
 0x582   :  { %4652 = vsyncpa [#allocation3 + $0x1], 1 }
 0x583   :  { %4653 = vsyncpa [#allocation6], 1 }
 0x584   :  { %4654 = vsyncpa [#allocation4], 1 }
 0x585   :  { %4656 = vsyncpa [#allocation4 + $0x1], 1 }

</bundles_post_ra>
